<compile_context>
chip_gen: v7x
topology: tpu7x:2x2x1
jax: 0.10.0
libtpu: 0.0.40
codegen_flags: <defaults>
</compile_context>

<pallas_src>
import functools

import numpy as np
import jax
import jax.numpy as jnp
from jax.experimental import pallas as pl
from jax.experimental.pallas import tpu as pltpu

# NatureCNN architecture constants (from the PyTorch module).
_C1, _K1, _S1 = 32, 4, 4
_C2, _K2, _S2 = 64, 4, 2
_C3, _K3, _S3 = 64, 3, 1
_FC1 = 512


def _conv_out(n, k, s):
    return (n - k) // s + 1


# ---------------------------------------------------------------------------
# Pallas kernel: one batch tile (BT images) per grid step, five dense matmuls.
# ---------------------------------------------------------------------------
def _dqn_kernel(x_ref, w1_ref, b1_ref, w2_ref, b2_ref, w3_ref, b3_ref,
                wfc1_ref, bfc1_ref, wfc2_ref, bfc2_ref, o_ref):
    bf16 = jnp.bfloat16
    bt = x_ref.shape[0]
    gk1 = w1_ref.shape[0]          # G * K1*K1*C   (conv1 group input width)
    ng = w2_ref.shape[0]           # number of conv1 patch groups
    p2c2 = w2_ref.shape[2]         # conv2 output slab width (P2*C2)

    w1 = w1_ref[...]               # (GK1, G*C1) block-diagonal conv1 weight
    b1 = b1_ref[...]               # (1, G*C1)

    # conv1 (block-diag per patch group) + conv2 (dense fold) accumulated in f32.
    acc2 = jnp.zeros((bt, p2c2), jnp.float32)
    for g in range(ng):
        xg = x_ref[:, g * gk1:(g + 1) * gk1]                       # (BT, GK1) bf16
        h1g = jnp.maximum(
            jnp.dot(xg, w1, preferred_element_type=jnp.float32) + b1, 0.0)
        acc2 = acc2 + jnp.dot(h1g.astype(bf16), w2_ref[g],
                              preferred_element_type=jnp.float32)

    h2 = jnp.maximum(acc2 + b2_ref[...], 0.0).astype(bf16)          # (BT, P2*C2)
    h3 = jnp.maximum(
        jnp.dot(h2, w3_ref[...], preferred_element_type=jnp.float32)
        + b3_ref[...], 0.0).astype(bf16)                            # (BT, P3*C3)
    h4 = jnp.maximum(
        jnp.dot(h3, wfc1_ref[...], preferred_element_type=jnp.float32)
        + bfc1_ref[...], 0.0).astype(bf16)                          # (BT, 512)

    # Q head: lane/sublane-dense (BT, 128) f32 store.
    o_ref[...] = (jnp.dot(h4, wfc2_ref[...], preferred_element_type=jnp.float32)
                  + bfc2_ref[...])


# ---------------------------------------------------------------------------
# Parameter construction / one-time layout folding
# ---------------------------------------------------------------------------
def init_raw_params(key, n_input_channels, h, w, num_actions):
    """Synthetic parameters in the original PyTorch layouts."""
    ks = jax.random.split(key, 10)
    scale = 0.05
    c = n_input_channels
    h1, w1 = _conv_out(h, _K1, _S1), _conv_out(w, _K1, _S1)
    h2, w2 = _conv_out(h1, _K2, _S2), _conv_out(w1, _K2, _S2)
    h3, w3 = _conv_out(h2, _K3, _S3), _conv_out(w2, _K3, _S3)
    n_flatten = _C3 * h3 * w3
    return {
        "conv1_w": jax.random.normal(ks[0], (_C1, c, _K1, _K1), jnp.float32) * scale,
        "conv1_b": jax.random.normal(ks[1], (_C1,), jnp.float32) * scale,
        "conv2_w": jax.random.normal(ks[2], (_C2, _C1, _K2, _K2), jnp.float32) * scale,
        "conv2_b": jax.random.normal(ks[3], (_C2,), jnp.float32) * scale,
        "conv3_w": jax.random.normal(ks[4], (_C3, _C2, _K3, _K3), jnp.float32) * scale,
        "conv3_b": jax.random.normal(ks[5], (_C3,), jnp.float32) * scale,
        "fc1_w": jax.random.normal(ks[6], (_FC1, n_flatten), jnp.float32) * scale,
        "fc1_b": jax.random.normal(ks[7], (_FC1,), jnp.float32) * scale,
        "fc2_w": jax.random.normal(ks[8], (num_actions, _FC1), jnp.float32) * scale,
        "fc2_b": jax.random.normal(ks[9], (num_actions,), jnp.float32) * scale,
    }


def _dense_conv_weight(w_oihw, in_h, in_w, stride):
    """Fold a conv into a dense (P_in*C_in, P_out*C_out) slab weight.

    Input/output slabs are position-major: column index = position*C + channel.
    """
    c_out, c_in, k, _ = w_oihw.shape
    out_h, out_w = _conv_out(in_h, k, stride), _conv_out(in_w, k, stride)
    p_in, p_out = in_h * in_w, out_h * out_w
    # TODO(synk): for large inputs (e.g. 84x84 Atari) this dense fold is too big
    # (conv2 would be ~146 MiB); use a tap-merged im2col kernel variant there.
    assert p_in * c_in * p_out * c_out <= (8 << 20), "dense conv fold too large"
    dense = np.zeros((p_in * c_in, p_out * c_out), np.float32)
    wt = np.transpose(np.asarray(w_oihw), (2, 3, 1, 0))      # (kh, kw, ci, co)
    for oh in range(out_h):
        for ow in range(out_w):
            po = oh * out_w + ow
            for kh in range(k):
                for kw in range(k):
                    pi = (stride * oh + kh) * in_w + (stride * ow + kw)
                    dense[pi * c_in:(pi + 1) * c_in,
                          po * c_out:(po + 1) * c_out] = wt[kh, kw]
    return dense


def _choose_group(p1):
    """Patches per conv1 block-diag group (largest divisor of P1 that is <= 8)."""
    for g in (8, 7, 6, 5, 4, 3, 2, 1):
        if p1 % g == 0:
            return g
    return 1


def prepare_params(raw, n_input_channels, h, w, num_actions):
    """Fold all transposes / dense convs / flatten permutations / padding at init."""
    bf16, f32 = jnp.bfloat16, jnp.float32
    c = n_input_channels
    h1, w1 = _conv_out(h, _K1, _S1), _conv_out(w, _K1, _S1)
    h2, w2 = _conv_out(h1, _K2, _S2), _conv_out(w1, _K2, _S2)
    h3, w3 = _conv_out(h2, _K3, _S3), _conv_out(w2, _K3, _S3)
    p1, p2, p3 = h1 * w1, h2 * w2, h3 * w3

    # conv1: (O, I, kh, kw) -> per-patch (kh*kw*I, O), then block-diagonal over a
    # group of G consecutive patches so K = G*kh*kw*I and N = G*O.
    w1_mat = np.transpose(np.asarray(raw["conv1_w"]), (2, 3, 1, 0)) \
               .reshape(_K1 * _K1 * c, _C1)
    g = _choose_group(p1)
    ng = p1 // g
    w1_blk = np.kron(np.eye(g, dtype=np.float32), w1_mat)     # (G*K, G*C1)
    b1_rep = np.tile(np.asarray(raw["conv1_b"]), g)[None, :]

    # conv2 / conv3 folded to dense slab weights; conv2 split by conv1 group so
    # the kernel can accumulate straight out of each conv1 group matmul.
    w2_dense = _dense_conv_weight(np.asarray(raw["conv2_w"]), h1, w1, _S2)
    w2_grouped = w2_dense.reshape(ng, g * _C1, p2 * _C2)
    w3_dense = _dense_conv_weight(np.asarray(raw["conv3_w"]), h2, w2, _S3)
    b2_rep = np.tile(np.asarray(raw["conv2_b"]), p2)[None, :]
    b3_rep = np.tile(np.asarray(raw["conv3_b"]), p3)[None, :]

    # fc1: permute the torch NCHW flatten order (c*P3 + p) to slab order (p*C3 + c).
    wfc1 = np.asarray(raw["fc1_w"]).reshape(_FC1, _C3, p3) \
             .transpose(2, 1, 0).reshape(p3 * _C3, _FC1)

    # fc2: (A, 512) -> (512, A), zero-padded to a lane-dense 128-wide Q slab.
    qpad = max(128, -(-num_actions // 128) * 128)
    wfc2 = np.zeros((_FC1, qpad), np.float32)
    wfc2[:, :num_actions] = np.asarray(raw["fc2_w"]).T
    bfc2 = np.zeros((qpad,), np.float32)
    bfc2[:num_actions] = np.asarray(raw["fc2_b"])

    return {
        "w1": jnp.asarray(w1_blk, bf16),
        "b1": jnp.asarray(b1_rep, f32),
        "w2": jnp.asarray(w2_grouped, bf16),
        "b2": jnp.asarray(b2_rep, f32),
        "w3": jnp.asarray(w3_dense, bf16),
        "b3": jnp.asarray(b3_rep, f32),
        "wfc1": jnp.asarray(wfc1, bf16),
        "bfc1": jnp.asarray(np.asarray(raw["fc1_b"])[None, :], f32),
        "wfc2": jnp.asarray(wfc2, bf16),
        "bfc2": jnp.asarray(bfc2[None, :], f32),
    }


# ---------------------------------------------------------------------------
# Forward pass wrapper (single pallas_call, batch-tiled grid)
# ---------------------------------------------------------------------------
_WEIGHT_ORDER = ("w1", "b1", "w2", "b2", "w3", "b3",
                 "wfc1", "bfc1", "wfc2", "bfc2")


def _resident_spec(arr):
    nd = arr.ndim
    return pl.BlockSpec(arr.shape, lambda b, _n=nd: (0,) * _n)


def _choose_batch_tile(b):
    """Batch tile: multiple of 8, capped at 256, >= 2 grid steps when B > 16."""
    if b <= 16:
        return ((b + 7) // 8) * 8
    return min(256, ((b + 15) // 16) * 8)


def network_forward(params, x_nchw, *, num_actions, batch_tile=None):
    B, C, H, W = x_nchw.shape
    ho1, wo1 = _conv_out(H, _K1, _S1), _conv_out(W, _K1, _S1)
    assert H == ho1 * _S1 and W == wo1 * _S1, "conv1 patchify needs H, W % 4 == 0"
    p1 = ho1 * wo1
    patch_k = _K1 * _K1 * C

    # Patchify: cast first (halves the bytes the transpose copy moves), then
    # NCHW -> NHWC -> non-overlapping 4x4 patches -> (B, P1*patchK) slab.
    x = x_nchw.astype(jnp.bfloat16)
    x = jnp.transpose(x, (0, 2, 3, 1))
    x = x.reshape(B, ho1, _K1, wo1, _K1, C)
    x = jnp.transpose(x, (0, 1, 3, 2, 4, 5)).reshape(B, p1 * patch_k)

    bt = _choose_batch_tile(B) if batch_tile is None else batch_tile
    n_steps = -(-B // bt)
    b_pad = n_steps * bt
    if b_pad != B:
        x = jnp.pad(x, ((0, b_pad - B), (0, 0)))

    weights = [params[name] for name in _WEIGHT_ORDER]
    qpad = params["bfc2"].shape[-1]
    feat = x.shape[1]

    in_specs = [pl.BlockSpec((bt, feat), lambda b: (b, 0))]
    in_specs += [_resident_spec(wv) for wv in weights]

    out = pl.pallas_call(
        _dqn_kernel,
        out_shape=jax.ShapeDtypeStruct((b_pad, qpad), jnp.float32),
        grid=(n_steps,),
        in_specs=in_specs,
        out_specs=pl.BlockSpec((bt, qpad), lambda b: (b, 0)),
        compiler_params=pltpu.CompilerParams(
            dimension_semantics=("parallel",),
            vmem_limit_bytes=48 * 1024 * 1024),
    )(x, *weights)
    return out[:B, :num_actions]


# ---------------------------------------------------------------------------
# Pure-JAX f32 reference (matches the PyTorch module) for a sanity check
# ---------------------------------------------------------------------------
def _conv_nchw(x, w, b, stride):
    y = jax.lax.conv_general_dilated(
        x, w, window_strides=(stride, stride), padding="VALID",
        dimension_numbers=("NCHW", "OIHW", "NCHW"))
    return y + b[None, :, None, None]


def reference_forward(raw, x_nchw):
    y = jnp.maximum(_conv_nchw(x_nchw, raw["conv1_w"], raw["conv1_b"], _S1), 0.0)
    y = jnp.maximum(_conv_nchw(y, raw["conv2_w"], raw["conv2_b"], _S2), 0.0)
    y = jnp.maximum(_conv_nchw(y, raw["conv3_w"], raw["conv3_b"], _S3), 0.0)
    y = y.reshape(y.shape[0], -1)                      # NCHW flatten
    y = jnp.maximum(y @ raw["fc1_w"].T + raw["fc1_b"], 0.0)
    return y @ raw["fc2_w"].T + raw["fc2_b"]


if __name__ == "__main__":
    # Small Atari-like observation: 4 stacked 32x32 frames.
    # Spatial: 32 -(k4,s4)-> 8 -(k4,s2)-> 3 -(k3,s1)-> 1  => n_flatten = 64.
    B, C, H, W = 64, 4, 32, 32          # batch-tiled: BT = 32 -> 2 grid steps
    num_actions = 6

    key = jax.random.PRNGKey(0)
    k_x, k_p = jax.random.split(key)
    x = jax.random.uniform(k_x, (B, C, H, W), jnp.float32)

    raw = init_raw_params(k_p, C, H, W, num_actions)
    params = prepare_params(raw, C, H, W, num_actions)

    fwd = jax.jit(functools.partial(network_forward, num_actions=num_actions))
    q_values = jax.block_until_ready(fwd(params, x))

    assert q_values.shape == (B, num_actions), q_values.shape
    assert q_values.dtype == jnp.float32

    # Sanity check vs the f32 reference (bf16 MXU inputs -> generous tolerance).
    q_ref = jax.block_until_ready(jax.jit(reference_forward)(raw, x))
    np.testing.assert_allclose(np.asarray(q_values), np.asarray(q_ref),
                               atol=3e-2, rtol=3e-2)

    print("KERNEL_OK")
</pallas_src>

<mosaic_0001>
module attributes {stable_mosaic.version = 11 : i64} {
  func.func @_dqn_kernel(%arg0: i32, %arg1: memref<32x4096xbf16, #tpu.memory_space<vmem>>, %arg2: memref<512x256xbf16, #tpu.memory_space<vmem>>, %arg3: memref<1x256xf32, #tpu.memory_space<vmem>>, %arg4: memref<8x256x576xbf16, #tpu.memory_space<vmem>>, %arg5: memref<1x576xf32, #tpu.memory_space<vmem>>, %arg6: memref<576x64xbf16, #tpu.memory_space<vmem>>, %arg7: memref<1x64xf32, #tpu.memory_space<vmem>>, %arg8: memref<64x512xbf16, #tpu.memory_space<vmem>>, %arg9: memref<1x512xf32, #tpu.memory_space<vmem>>, %arg10: memref<512x128xbf16, #tpu.memory_space<vmem>>, %arg11: memref<1x128xf32, #tpu.memory_space<vmem>>, %arg12: memref<32x128xf32, #tpu.memory_space<vmem>>) attributes {dimension_semantics = [#tpu.dimension_semantics<parallel>], iteration_bounds = array<i64: 2>, scalar_prefetch = 0 : i64, scratch_operands = 0 : i64, tpu.core_type = #tpu.core_type<tc>, window_params = [{transform_indices = @transform_0, window_bounds = array<i64: 32, 4096>}, {pipeline_mode = #tpu.pipeline_mode<synchronous>, transform_indices = @transform_1, window_bounds = array<i64: 512, 256>}, {pipeline_mode = #tpu.pipeline_mode<synchronous>, transform_indices = @transform_2, window_bounds = array<i64: 1, 256>}, {pipeline_mode = #tpu.pipeline_mode<synchronous>, transform_indices = @transform_3, window_bounds = array<i64: 8, 256, 576>}, {pipeline_mode = #tpu.pipeline_mode<synchronous>, transform_indices = @transform_4, window_bounds = array<i64: 1, 576>}, {pipeline_mode = #tpu.pipeline_mode<synchronous>, transform_indices = @transform_5, window_bounds = array<i64: 576, 64>}, {pipeline_mode = #tpu.pipeline_mode<synchronous>, transform_indices = @transform_6, window_bounds = array<i64: 1, 64>}, {pipeline_mode = #tpu.pipeline_mode<synchronous>, transform_indices = @transform_7, window_bounds = array<i64: 64, 512>}, {pipeline_mode = #tpu.pipeline_mode<synchronous>, transform_indices = @transform_8, window_bounds = array<i64: 1, 512>}, {pipeline_mode = #tpu.pipeline_mode<synchronous>, transform_indices = @transform_9, window_bounds = array<i64: 512, 128>}, {pipeline_mode = #tpu.pipeline_mode<synchronous>, transform_indices = @transform_10, window_bounds = array<i64: 1, 128>}, {transform_indices = @transform_11, window_bounds = array<i64: 32, 128>}]} {
    %c0 = arith.constant 0 : index
    %c0_0 = arith.constant 0 : index
    %0 = vector.load %arg2[%c0, %c0_0] : memref<512x256xbf16, #tpu.memory_space<vmem>>, vector<512x256xbf16>
    %c0_1 = arith.constant 0 : index
    %c0_2 = arith.constant 0 : index
    %1 = vector.load %arg3[%c0_1, %c0_2] : memref<1x256xf32, #tpu.memory_space<vmem>>, vector<1x256xf32>
    %cst = arith.constant 0.000000e+00 : f32
    %2 = vector.broadcast %cst : f32 to vector<32x576xf32>
    %c0_3 = arith.constant 0 : index
    %c0_4 = arith.constant 0 : index
    %3 = vector.load %arg1[%c0_3, %c0_4] : memref<32x4096xbf16, #tpu.memory_space<vmem>>, vector<32x512xbf16>
    %cst_5 = arith.constant dense<0.000000e+00> : vector<32x256xf32>
    %4 = tpu.matmul %3, %0, %cst_5 {dimension_numbers = #tpu.dot_dimension_numbers<[1], [0], [0], [1], [0, 0, 1, 1], [], []>} : vector<32x512xbf16>, vector<512x256xbf16>, vector<32x256xf32> -> vector<32x256xf32>
    %5 = vector.broadcast %1 : vector<1x256xf32> to vector<32x256xf32>
    %6 = arith.addf %4, %5 : vector<32x256xf32>
    %cst_6 = arith.constant 0.000000e+00 : f32
    %7 = vector.broadcast %cst_6 : f32 to vector<32x256xf32>
    %8 = arith.maximumf %6, %7 : vector<32x256xf32>
    %9 = arith.truncf %8 : vector<32x256xf32> to vector<32x256xbf16>
    %c0_7 = arith.constant 0 : index
    %c0_8 = arith.constant 0 : index
    %c0_9 = arith.constant 0 : index
    %10 = vector.load %arg4[%c0_7, %c0_8, %c0_9] : memref<8x256x576xbf16, #tpu.memory_space<vmem>>, vector<1x256x576xbf16>
    %11 = vector.shape_cast %10 : vector<1x256x576xbf16> to vector<256x576xbf16>
    %cst_10 = arith.constant dense<0.000000e+00> : vector<32x576xf32>
    %12 = tpu.matmul %9, %11, %cst_10 {dimension_numbers = #tpu.dot_dimension_numbers<[1], [0], [0], [1], [0, 0, 1, 1], [], []>} : vector<32x256xbf16>, vector<256x576xbf16>, vector<32x576xf32> -> vector<32x576xf32>
    %13 = arith.addf %2, %12 : vector<32x576xf32>
    %c0_11 = arith.constant 0 : index
    %c512 = arith.constant 512 : index
    %14 = vector.load %arg1[%c0_11, %c512] : memref<32x4096xbf16, #tpu.memory_space<vmem>>, vector<32x512xbf16>
    %cst_12 = arith.constant dense<0.000000e+00> : vector<32x256xf32>
    %15 = tpu.matmul %14, %0, %cst_12 {dimension_numbers = #tpu.dot_dimension_numbers<[1], [0], [0], [1], [0, 0, 1, 1], [], []>} : vector<32x512xbf16>, vector<512x256xbf16>, vector<32x256xf32> -> vector<32x256xf32>
    %16 = vector.broadcast %1 : vector<1x256xf32> to vector<32x256xf32>
    %17 = arith.addf %15, %16 : vector<32x256xf32>
    %cst_13 = arith.constant 0.000000e+00 : f32
    %18 = vector.broadcast %cst_13 : f32 to vector<32x256xf32>
    %19 = arith.maximumf %17, %18 : vector<32x256xf32>
    %20 = arith.truncf %19 : vector<32x256xf32> to vector<32x256xbf16>
    %c1 = arith.constant 1 : index
    %c0_14 = arith.constant 0 : index
    %c0_15 = arith.constant 0 : index
    %21 = vector.load %arg4[%c1, %c0_14, %c0_15] : memref<8x256x576xbf16, #tpu.memory_space<vmem>>, vector<1x256x576xbf16>
    %22 = vector.shape_cast %21 : vector<1x256x576xbf16> to vector<256x576xbf16>
    %cst_16 = arith.constant dense<0.000000e+00> : vector<32x576xf32>
    %23 = tpu.matmul %20, %22, %cst_16 {dimension_numbers = #tpu.dot_dimension_numbers<[1], [0], [0], [1], [0, 0, 1, 1], [], []>} : vector<32x256xbf16>, vector<256x576xbf16>, vector<32x576xf32> -> vector<32x576xf32>
    %24 = arith.addf %13, %23 : vector<32x576xf32>
    %c0_17 = arith.constant 0 : index
    %c1024 = arith.constant 1024 : index
    %25 = vector.load %arg1[%c0_17, %c1024] : memref<32x4096xbf16, #tpu.memory_space<vmem>>, vector<32x512xbf16>
    %cst_18 = arith.constant dense<0.000000e+00> : vector<32x256xf32>
    %26 = tpu.matmul %25, %0, %cst_18 {dimension_numbers = #tpu.dot_dimension_numbers<[1], [0], [0], [1], [0, 0, 1, 1], [], []>} : vector<32x512xbf16>, vector<512x256xbf16>, vector<32x256xf32> -> vector<32x256xf32>
    %27 = vector.broadcast %1 : vector<1x256xf32> to vector<32x256xf32>
    %28 = arith.addf %26, %27 : vector<32x256xf32>
    %cst_19 = arith.constant 0.000000e+00 : f32
    %29 = vector.broadcast %cst_19 : f32 to vector<32x256xf32>
    %30 = arith.maximumf %28, %29 : vector<32x256xf32>
    %31 = arith.truncf %30 : vector<32x256xf32> to vector<32x256xbf16>
    %c2 = arith.constant 2 : index
    %c0_20 = arith.constant 0 : index
    %c0_21 = arith.constant 0 : index
    %32 = vector.load %arg4[%c2, %c0_20, %c0_21] : memref<8x256x576xbf16, #tpu.memory_space<vmem>>, vector<1x256x576xbf16>
    %33 = vector.shape_cast %32 : vector<1x256x576xbf16> to vector<256x576xbf16>
    %cst_22 = arith.constant dense<0.000000e+00> : vector<32x576xf32>
    %34 = tpu.matmul %31, %33, %cst_22 {dimension_numbers = #tpu.dot_dimension_numbers<[1], [0], [0], [1], [0, 0, 1, 1], [], []>} : vector<32x256xbf16>, vector<256x576xbf16>, vector<32x576xf32> -> vector<32x576xf32>
    %35 = arith.addf %24, %34 : vector<32x576xf32>
    %c0_23 = arith.constant 0 : index
    %c1536 = arith.constant 1536 : index
    %36 = vector.load %arg1[%c0_23, %c1536] : memref<32x4096xbf16, #tpu.memory_space<vmem>>, vector<32x512xbf16>
    %cst_24 = arith.constant dense<0.000000e+00> : vector<32x256xf32>
    %37 = tpu.matmul %36, %0, %cst_24 {dimension_numbers = #tpu.dot_dimension_numbers<[1], [0], [0], [1], [0, 0, 1, 1], [], []>} : vector<32x512xbf16>, vector<512x256xbf16>, vector<32x256xf32> -> vector<32x256xf32>
    %38 = vector.broadcast %1 : vector<1x256xf32> to vector<32x256xf32>
    %39 = arith.addf %37, %38 : vector<32x256xf32>
    %cst_25 = arith.constant 0.000000e+00 : f32
    %40 = vector.broadcast %cst_25 : f32 to vector<32x256xf32>
    %41 = arith.maximumf %39, %40 : vector<32x256xf32>
    %42 = arith.truncf %41 : vector<32x256xf32> to vector<32x256xbf16>
    %c3 = arith.constant 3 : index
    %c0_26 = arith.constant 0 : index
    %c0_27 = arith.constant 0 : index
    %43 = vector.load %arg4[%c3, %c0_26, %c0_27] : memref<8x256x576xbf16, #tpu.memory_space<vmem>>, vector<1x256x576xbf16>
    %44 = vector.shape_cast %43 : vector<1x256x576xbf16> to vector<256x576xbf16>
    %cst_28 = arith.constant dense<0.000000e+00> : vector<32x576xf32>
    %45 = tpu.matmul %42, %44, %cst_28 {dimension_numbers = #tpu.dot_dimension_numbers<[1], [0], [0], [1], [0, 0, 1, 1], [], []>} : vector<32x256xbf16>, vector<256x576xbf16>, vector<32x576xf32> -> vector<32x576xf32>
    %46 = arith.addf %35, %45 : vector<32x576xf32>
    %c0_29 = arith.constant 0 : index
    %c2048 = arith.constant 2048 : index
    %47 = vector.load %arg1[%c0_29, %c2048] : memref<32x4096xbf16, #tpu.memory_space<vmem>>, vector<32x512xbf16>
    %cst_30 = arith.constant dense<0.000000e+00> : vector<32x256xf32>
    %48 = tpu.matmul %47, %0, %cst_30 {dimension_numbers = #tpu.dot_dimension_numbers<[1], [0], [0], [1], [0, 0, 1, 1], [], []>} : vector<32x512xbf16>, vector<512x256xbf16>, vector<32x256xf32> -> vector<32x256xf32>
    %49 = vector.broadcast %1 : vector<1x256xf32> to vector<32x256xf32>
    %50 = arith.addf %48, %49 : vector<32x256xf32>
    %cst_31 = arith.constant 0.000000e+00 : f32
    %51 = vector.broadcast %cst_31 : f32 to vector<32x256xf32>
    %52 = arith.maximumf %50, %51 : vector<32x256xf32>
    %53 = arith.truncf %52 : vector<32x256xf32> to vector<32x256xbf16>
    %c4 = arith.constant 4 : index
    %c0_32 = arith.constant 0 : index
    %c0_33 = arith.constant 0 : index
    %54 = vector.load %arg4[%c4, %c0_32, %c0_33] : memref<8x256x576xbf16, #tpu.memory_space<vmem>>, vector<1x256x576xbf16>
    %55 = vector.shape_cast %54 : vector<1x256x576xbf16> to vector<256x576xbf16>
    %cst_34 = arith.constant dense<0.000000e+00> : vector<32x576xf32>
    %56 = tpu.matmul %53, %55, %cst_34 {dimension_numbers = #tpu.dot_dimension_numbers<[1], [0], [0], [1], [0, 0, 1, 1], [], []>} : vector<32x256xbf16>, vector<256x576xbf16>, vector<32x576xf32> -> vector<32x576xf32>
    %57 = arith.addf %46, %56 : vector<32x576xf32>
    %c0_35 = arith.constant 0 : index
    %c2560 = arith.constant 2560 : index
    %58 = vector.load %arg1[%c0_35, %c2560] : memref<32x4096xbf16, #tpu.memory_space<vmem>>, vector<32x512xbf16>
    %cst_36 = arith.constant dense<0.000000e+00> : vector<32x256xf32>
    %59 = tpu.matmul %58, %0, %cst_36 {dimension_numbers = #tpu.dot_dimension_numbers<[1], [0], [0], [1], [0, 0, 1, 1], [], []>} : vector<32x512xbf16>, vector<512x256xbf16>, vector<32x256xf32> -> vector<32x256xf32>
    %60 = vector.broadcast %1 : vector<1x256xf32> to vector<32x256xf32>
    %61 = arith.addf %59, %60 : vector<32x256xf32>
    %cst_37 = arith.constant 0.000000e+00 : f32
    %62 = vector.broadcast %cst_37 : f32 to vector<32x256xf32>
    %63 = arith.maximumf %61, %62 : vector<32x256xf32>
    %64 = arith.truncf %63 : vector<32x256xf32> to vector<32x256xbf16>
    %c5 = arith.constant 5 : index
    %c0_38 = arith.constant 0 : index
    %c0_39 = arith.constant 0 : index
    %65 = vector.load %arg4[%c5, %c0_38, %c0_39] : memref<8x256x576xbf16, #tpu.memory_space<vmem>>, vector<1x256x576xbf16>
    %66 = vector.shape_cast %65 : vector<1x256x576xbf16> to vector<256x576xbf16>
    %cst_40 = arith.constant dense<0.000000e+00> : vector<32x576xf32>
    %67 = tpu.matmul %64, %66, %cst_40 {dimension_numbers = #tpu.dot_dimension_numbers<[1], [0], [0], [1], [0, 0, 1, 1], [], []>} : vector<32x256xbf16>, vector<256x576xbf16>, vector<32x576xf32> -> vector<32x576xf32>
    %68 = arith.addf %57, %67 : vector<32x576xf32>
    %c0_41 = arith.constant 0 : index
    %c3072 = arith.constant 3072 : index
    %69 = vector.load %arg1[%c0_41, %c3072] : memref<32x4096xbf16, #tpu.memory_space<vmem>>, vector<32x512xbf16>
    %cst_42 = arith.constant dense<0.000000e+00> : vector<32x256xf32>
    %70 = tpu.matmul %69, %0, %cst_42 {dimension_numbers = #tpu.dot_dimension_numbers<[1], [0], [0], [1], [0, 0, 1, 1], [], []>} : vector<32x512xbf16>, vector<512x256xbf16>, vector<32x256xf32> -> vector<32x256xf32>
    %71 = vector.broadcast %1 : vector<1x256xf32> to vector<32x256xf32>
    %72 = arith.addf %70, %71 : vector<32x256xf32>
    %cst_43 = arith.constant 0.000000e+00 : f32
    %73 = vector.broadcast %cst_43 : f32 to vector<32x256xf32>
    %74 = arith.maximumf %72, %73 : vector<32x256xf32>
    %75 = arith.truncf %74 : vector<32x256xf32> to vector<32x256xbf16>
    %c6 = arith.constant 6 : index
    %c0_44 = arith.constant 0 : index
    %c0_45 = arith.constant 0 : index
    %76 = vector.load %arg4[%c6, %c0_44, %c0_45] : memref<8x256x576xbf16, #tpu.memory_space<vmem>>, vector<1x256x576xbf16>
    %77 = vector.shape_cast %76 : vector<1x256x576xbf16> to vector<256x576xbf16>
    %cst_46 = arith.constant dense<0.000000e+00> : vector<32x576xf32>
    %78 = tpu.matmul %75, %77, %cst_46 {dimension_numbers = #tpu.dot_dimension_numbers<[1], [0], [0], [1], [0, 0, 1, 1], [], []>} : vector<32x256xbf16>, vector<256x576xbf16>, vector<32x576xf32> -> vector<32x576xf32>
    %79 = arith.addf %68, %78 : vector<32x576xf32>
    %c0_47 = arith.constant 0 : index
    %c3584 = arith.constant 3584 : index
    %80 = vector.load %arg1[%c0_47, %c3584] : memref<32x4096xbf16, #tpu.memory_space<vmem>>, vector<32x512xbf16>
    %cst_48 = arith.constant dense<0.000000e+00> : vector<32x256xf32>
    %81 = tpu.matmul %80, %0, %cst_48 {dimension_numbers = #tpu.dot_dimension_numbers<[1], [0], [0], [1], [0, 0, 1, 1], [], []>} : vector<32x512xbf16>, vector<512x256xbf16>, vector<32x256xf32> -> vector<32x256xf32>
    %82 = vector.broadcast %1 : vector<1x256xf32> to vector<32x256xf32>
    %83 = arith.addf %81, %82 : vector<32x256xf32>
    %cst_49 = arith.constant 0.000000e+00 : f32
    %84 = vector.broadcast %cst_49 : f32 to vector<32x256xf32>
    %85 = arith.maximumf %83, %84 : vector<32x256xf32>
    %86 = arith.truncf %85 : vector<32x256xf32> to vector<32x256xbf16>
    %c7 = arith.constant 7 : index
    %c0_50 = arith.constant 0 : index
    %c0_51 = arith.constant 0 : index
    %87 = vector.load %arg4[%c7, %c0_50, %c0_51] : memref<8x256x576xbf16, #tpu.memory_space<vmem>>, vector<1x256x576xbf16>
    %88 = vector.shape_cast %87 : vector<1x256x576xbf16> to vector<256x576xbf16>
    %cst_52 = arith.constant dense<0.000000e+00> : vector<32x576xf32>
    %89 = tpu.matmul %86, %88, %cst_52 {dimension_numbers = #tpu.dot_dimension_numbers<[1], [0], [0], [1], [0, 0, 1, 1], [], []>} : vector<32x256xbf16>, vector<256x576xbf16>, vector<32x576xf32> -> vector<32x576xf32>
    %90 = arith.addf %79, %89 : vector<32x576xf32>
    %c0_53 = arith.constant 0 : index
    %c0_54 = arith.constant 0 : index
    %91 = vector.load %arg5[%c0_53, %c0_54] : memref<1x576xf32, #tpu.memory_space<vmem>>, vector<1x576xf32>
    %92 = vector.broadcast %91 : vector<1x576xf32> to vector<32x576xf32>
    %93 = arith.addf %90, %92 : vector<32x576xf32>
    %cst_55 = arith.constant 0.000000e+00 : f32
    %94 = vector.broadcast %cst_55 : f32 to vector<32x576xf32>
    %95 = arith.maximumf %93, %94 : vector<32x576xf32>
    %96 = arith.truncf %95 : vector<32x576xf32> to vector<32x576xbf16>
    %c0_56 = arith.constant 0 : index
    %c0_57 = arith.constant 0 : index
    %97 = vector.load %arg6[%c0_56, %c0_57] : memref<576x64xbf16, #tpu.memory_space<vmem>>, vector<576x64xbf16>
    %cst_58 = arith.constant dense<0.000000e+00> : vector<32x64xf32>
    %98 = tpu.matmul %96, %97, %cst_58 {dimension_numbers = #tpu.dot_dimension_numbers<[1], [0], [0], [1], [0, 0, 1, 1], [], []>} : vector<32x576xbf16>, vector<576x64xbf16>, vector<32x64xf32> -> vector<32x64xf32>
    %c0_59 = arith.constant 0 : index
    %c0_60 = arith.constant 0 : index
    %99 = vector.load %arg7[%c0_59, %c0_60] : memref<1x64xf32, #tpu.memory_space<vmem>>, vector<1x64xf32>
    %100 = vector.broadcast %99 : vector<1x64xf32> to vector<32x64xf32>
    %101 = arith.addf %98, %100 : vector<32x64xf32>
    %cst_61 = arith.constant 0.000000e+00 : f32
    %102 = vector.broadcast %cst_61 : f32 to vector<32x64xf32>
    %103 = arith.maximumf %101, %102 : vector<32x64xf32>
    %104 = arith.truncf %103 : vector<32x64xf32> to vector<32x64xbf16>
    %c0_62 = arith.constant 0 : index
    %c0_63 = arith.constant 0 : index
    %105 = vector.load %arg8[%c0_62, %c0_63] : memref<64x512xbf16, #tpu.memory_space<vmem>>, vector<64x512xbf16>
    %cst_64 = arith.constant dense<0.000000e+00> : vector<32x512xf32>
    %106 = tpu.matmul %104, %105, %cst_64 {dimension_numbers = #tpu.dot_dimension_numbers<[1], [0], [0], [1], [0, 0, 1, 1], [], []>} : vector<32x64xbf16>, vector<64x512xbf16>, vector<32x512xf32> -> vector<32x512xf32>
    %c0_65 = arith.constant 0 : index
    %c0_66 = arith.constant 0 : index
    %107 = vector.load %arg9[%c0_65, %c0_66] : memref<1x512xf32, #tpu.memory_space<vmem>>, vector<1x512xf32>
    %108 = vector.broadcast %107 : vector<1x512xf32> to vector<32x512xf32>
    %109 = arith.addf %106, %108 : vector<32x512xf32>
    %cst_67 = arith.constant 0.000000e+00 : f32
    %110 = vector.broadcast %cst_67 : f32 to vector<32x512xf32>
    %111 = arith.maximumf %109, %110 : vector<32x512xf32>
    %112 = arith.truncf %111 : vector<32x512xf32> to vector<32x512xbf16>
    %c0_68 = arith.constant 0 : index
    %c0_69 = arith.constant 0 : index
    %113 = vector.load %arg10[%c0_68, %c0_69] : memref<512x128xbf16, #tpu.memory_space<vmem>>, vector<512x128xbf16>
    %cst_70 = arith.constant dense<0.000000e+00> : vector<32x128xf32>
    %114 = tpu.matmul %112, %113, %cst_70 {dimension_numbers = #tpu.dot_dimension_numbers<[1], [0], [0], [1], [0, 0, 1, 1], [], []>} : vector<32x512xbf16>, vector<512x128xbf16>, vector<32x128xf32> -> vector<32x128xf32>
    %c0_71 = arith.constant 0 : index
    %c0_72 = arith.constant 0 : index
    %115 = vector.load %arg11[%c0_71, %c0_72] : memref<1x128xf32, #tpu.memory_space<vmem>>, vector<1x128xf32>
    %116 = vector.broadcast %115 : vector<1x128xf32> to vector<32x128xf32>
    %117 = arith.addf %114, %116 : vector<32x128xf32>
    %c0_73 = arith.constant 0 : index
    %c0_74 = arith.constant 0 : index
    %118 = vector.load %arg12[%c0_73, %c0_74] : memref<32x128xf32, #tpu.memory_space<vmem>>, vector<32x128xf32>
    tpu.vector_store %arg12[%c0_73, %c0_74], %117 {strides = array<i32>} : memref<32x128xf32, #tpu.memory_space<vmem>>, vector<32x128xf32>,
    return
  }
  func.func @transform_0(%arg0: i32) -> (i32, i32) {
    %c0_i32 = arith.constant 0 : i32
    %c0_i32_0 = arith.constant 0 : i32
    return %arg0, %c0_i32 : i32, i32
  }
  func.func @transform_1(%arg0: i32) -> (i32, i32) {
    %c0_i32 = arith.constant 0 : i32
    %c0_i32_0 = arith.constant 0 : i32
    %c0_i32_1 = arith.constant 0 : i32
    return %c0_i32, %c0_i32_0 : i32, i32
  }
  func.func @transform_2(%arg0: i32) -> (i32, i32) {
    %c0_i32 = arith.constant 0 : i32
    %c0_i32_0 = arith.constant 0 : i32
    %c0_i32_1 = arith.constant 0 : i32
    return %c0_i32, %c0_i32_0 : i32, i32
  }
  func.func @transform_3(%arg0: i32) -> (i32, i32, i32) {
    %c0_i32 = arith.constant 0 : i32
    %c0_i32_0 = arith.constant 0 : i32
    %c0_i32_1 = arith.constant 0 : i32
    %c0_i32_2 = arith.constant 0 : i32
    return %c0_i32, %c0_i32_0, %c0_i32_1 : i32, i32, i32
  }
  func.func @transform_4(%arg0: i32) -> (i32, i32) {
    %c0_i32 = arith.constant 0 : i32
    %c0_i32_0 = arith.constant 0 : i32
    %c0_i32_1 = arith.constant 0 : i32
    return %c0_i32, %c0_i32_0 : i32, i32
  }
  func.func @transform_5(%arg0: i32) -> (i32, i32) {
    %c0_i32 = arith.constant 0 : i32
    %c0_i32_0 = arith.constant 0 : i32
    %c0_i32_1 = arith.constant 0 : i32
    return %c0_i32, %c0_i32_0 : i32, i32
  }
  func.func @transform_6(%arg0: i32) -> (i32, i32) {
    %c0_i32 = arith.constant 0 : i32
    %c0_i32_0 = arith.constant 0 : i32
    %c0_i32_1 = arith.constant 0 : i32
    return %c0_i32, %c0_i32_0 : i32, i32
  }
  func.func @transform_7(%arg0: i32) -> (i32, i32) {
    %c0_i32 = arith.constant 0 : i32
    %c0_i32_0 = arith.constant 0 : i32
    %c0_i32_1 = arith.constant 0 : i32
    return %c0_i32, %c0_i32_0 : i32, i32
  }
  func.func @transform_8(%arg0: i32) -> (i32, i32) {
    %c0_i32 = arith.constant 0 : i32
    %c0_i32_0 = arith.constant 0 : i32
    %c0_i32_1 = arith.constant 0 : i32
    return %c0_i32, %c0_i32_0 : i32, i32
  }
  func.func @transform_9(%arg0: i32) -> (i32, i32) {
    %c0_i32 = arith.constant 0 : i32
    %c0_i32_0 = arith.constant 0 : i32
    %c0_i32_1 = arith.constant 0 : i32
    return %c0_i32, %c0_i32_0 : i32, i32
  }
  func.func @transform_10(%arg0: i32) -> (i32, i32) {
    %c0_i32 = arith.constant 0 : i32
    %c0_i32_0 = arith.constant 0 : i32
    %c0_i32_1 = arith.constant 0 : i32
    return %c0_i32, %c0_i32_0 : i32, i32
  }
  func.func @transform_11(%arg0: i32) -> (i32, i32) {
    %c0_i32 = arith.constant 0 : i32
    %c0_i32_0 = arith.constant 0 : i32
    return %arg0, %c0_i32 : i32, i32
  }
}

</mosaic_0001>

<bundles_post_ra>
// kernel: network_forward.1
= control target key start
LH: loop header
LB: loop body
LE: loop exit
PB: predicated region body
PF: predicated region fallthrough
CT: control target
= control target key end

     0   :  { %s12281_s17 = smov 0   ;;  %s16405_s0 = inlined_call_operand.vmem [shape: bf16[64,4096], index: 0, kind: input, shape index: {}]   ;;  %s16406_s1 = inlined_call_operand.vmem [shape: bf16[512,256], index: 1, kind: input, shape index: {}]   ;;  %s16407_s2 = inlined_call_operand.vmem [shape: f32[1,256], index: 2, kind: input, shape index: {}]   ;;  %s16408_s3 = inlined_call_operand.vmem [shape: bf16[8,256,576], index: 3, kind: input, shape index: {}]   ;;  %s16409_s4 = inlined_call_operand.vmem [shape: f32[1,576], index: 4, kind: input, shape index: {}]   ;;  %s16410_s5 = inlined_call_operand.vmem [shape: bf16[576,64], index: 5, kind: input, shape index: {}]   ;;  %s16411_s6 = inlined_call_operand.vmem [shape: f32[1,64], index: 6, kind: input, shape index: {}]   ;;  %s16412_s7 = inlined_call_operand.vmem [shape: bf16[64,512], index: 7, kind: input, shape index: {}]   ;;  %s16413_s8 = inlined_call_operand.vmem [shape: f32[1,512], index: 8, kind: input, shape index: {}]   ;;  %s16414_s9 = inlined_call_operand.vmem [shape: bf16[512,128], index: 9, kind: input, shape index: {}]   ;;  %s16415_s10 = inlined_call_operand.vmem [shape: f32[1,128], index: 10, kind: input, shape index: {}]   ;;  %s16416_s11 = inlined_call_operand.vmem [shape: f32[64,128], index: 11, kind: output, shape index: {}]  }
   0x1 LB: > { %s8788_s18 = sadd.s32 4294967295, %s12218_s17   ;;  %p8792_p0 = scmp.ge.s32.totalorder %s12218_s17, 1  ;;  %s12218_s17 = sphi %s12281_s17, %s21_s17  }
   0x2   : > { %p339_p1 = scmp.lt.s32.totalorder %s12218_s17, 3 }
   0x4   : > { %p340_p2 = pnand %p8792_p0, %p339_p1 }
   0x6   : > { %343 = sbr.rel (%p340_p2) target bundleno = 3659 (0xe4b), region = 64 }
   0xd   : > { %v10936_v0 = vld [vmem:[%s16406_s1 + $0x4] ss:$8 sps:$4 sm:$0xff]   ;;  %v10938_v1 = vld [vmem:[%s16406_s1] ss:$8 sps:$4 sm:$0xff]   ;;  %v10939_v2 = vld [vmem:[%s16406_s1 + $0x14] ss:$8 sps:$4 sm:$0xff]  }
   0xe   : > { %1100 = vmatprep.subr.bf16.mxu1 %v10936_v0  ;;  %838 = vmatprep.subr.bf16.mxu0 %v10936_v0  ;;  %v10941_v3 = vld [vmem:[%s16406_s1 + $0x10] ss:$8 sps:$4 sm:$0xff]   ;;  %v10942_v4 = vld [vmem:[%s16406_s1 + $0x24] ss:$8 sps:$4 sm:$0xff]   ;;  %s8793_s29 = sshll.u32 %s8788_s18, 2  ;;  %vm7953_vm0 = vcmask 523264  }
   0xf   : > { %1101 = vmatpush1.bf16.msra.mxu1 %v10938_v1  ;;  %839 = vmatpush1.bf16.msra.mxu0 %v10938_v1  ;;  %v10944_v5 = vld [vmem:[%s16406_s1 + $0x20] ss:$8 sps:$4 sm:$0xff]   ;;  %p381_p3 = scmp.lt.s32.totalorder %s8793_s29, 7  ;;  %v10945_v6 = vld [vmem:[%s16406_s1 + $0x34] ss:$8 sps:$4 sm:$0xff]  }
  0x10   : > { %1102 = vmatprep.subr.bf16.mxu1 %v10939_v2  ;;  %840 = vmatprep.subr.bf16.mxu0 %v10939_v2  ;;  %v10947_v7 = vld [vmem:[%s16406_s1 + $0x30] ss:$8 sps:$4 sm:$0xff]   ;;  %v10948_v8 = vld [vmem:[%s16406_s1 + $0x44] ss:$8 sps:$4 sm:$0xff]   ;;  %v10950_v9 = vld [vmem:[%s16406_s1 + $0x40] ss:$8 sps:$4 sm:$0xff]  }
  0x11   : > { %s16631_s29 = smov (!%p381_p3, %s8793_s29), 7  ;;  %v10951_v10 = vld [vmem:[%s16406_s1 + $0x54] ss:$8 sps:$4 sm:$0xff]   ;;  %v10953_v11 = vld [vmem:[%s16406_s1 + $0x50] ss:$8 sps:$4 sm:$0xff]  }
  0x12   : > { %s10332_s22 = sshll.u32 %s16631_s29, 7  ;;  %v10954_v12 = vld [vmem:[%s16406_s1 + $0x64] ss:$8 sps:$4 sm:$0xff]   ;;  %v10956_v16 = vld [vmem:[%s16406_s1 + $0x60] ss:$8 sps:$4 sm:$0xff]   ;;  %s8797_s21 = sshll.u32 %s16631_s29, 3 }
  0x13   : > { %1103 = vmatpush1.bf16.msra.mxu1 %v10941_v3  ;;  %841 = vmatpush1.bf16.msra.mxu0 %v10941_v3  ;;  %s12328_s27 = scalar_lea.vmem %s16405_s0, %s10332_s22  ;;  %v10957_v17 = vld [vmem:[%s16406_s1 + $0x74] ss:$8 sps:$4 sm:$0xff]   ;;  %v10959_v18 = vld [vmem:[%s16406_s1 + $0x70] ss:$8 sps:$4 sm:$0xff]   ;;  %v10960_v19 = vld [vmem:[%s16406_s1 + $0x84] ss:$8 sps:$4 sm:$0xff]   ;;  %s391_s24 = scalar_lea.vmem %s16416_s11, %s8797_s21 }
  0x14   : > { %1104 = vmatprep.subr.bf16.mxu1 %v10942_v4  ;;  %842 = vmatprep.subr.bf16.mxu0 %v10942_v4  ;;  %v12337_v13 = vld [vmem:[%s12328_s27 + $0x10] sm:$0xff]  ;;  %v10962_v20 = vld [vmem:[%s16406_s1 + $0x80] ss:$8 sps:$4 sm:$0xff]   ;;  %v10966_v26 = vld [vmem:[%s16406_s1 + $0xa4] ss:$8 sps:$4 sm:$0xff]  }
  0x15   : > { %v12340_v14 = vld [vmem:[%s12328_s27 + $0x90] sm:$0xff]  ;;  %v459_v22 = vld [vmem:[%s12328_s27] sm:$0xff]  ;;  %v12425_v51 = vld [vmem:[%s12328_s27 + $0x18] sm:$0xff] }
  0x16   : > { %v8871_v15 = vcombine.high %v12337_v13, %v12340_v14  ;;  %v10963_v21 = vld [vmem:[%s16406_s1 + $0x94] ss:$8 sps:$4 sm:$0xff]   ;;  %v461_v23 = vld [vmem:[%s12328_s27 + $0x80] sm:$0xff]  ;;  %v10965_v25 = vld [vmem:[%s16406_s1 + $0x90] ss:$8 sps:$4 sm:$0xff]   ;;  %v8870_v41 = vcombine.low %v12337_v13, %v12340_v14 }
  0x17   : > { %1105 = vmatpush1.bf16.msra.mxu1 %v10944_v5  ;;  %843 = vmatpush1.bf16.msra.mxu0 %v10944_v5  ;;  %v8799_v24 = vcombine.high %v459_v22, %v461_v23  ;;  %v10968_v27 = vld [vmem:[%s16406_s1 + $0xa0] ss:$8 sps:$4 sm:$0xff]   ;;  %v10969_v28 = vld [vmem:[%s16406_s1 + $0xb4] ss:$8 sps:$4 sm:$0xff]   ;;  %v10971_v29 = vld [vmem:[%s16406_s1 + $0xb0] ss:$8 sps:$4 sm:$0xff]   ;;  %v8798_v42 = vcombine.low %v459_v22, %v461_v23 }
  0x18   : > { %1106 = vmatprep.subr.bf16.mxu1 %v10945_v6  ;;  %844 = vmatprep.subr.bf16.mxu0 %v10945_v6  ;;  %v10972_v30 = vld [vmem:[%s16406_s1 + $0xc4] ss:$8 sps:$4 sm:$0xff]   ;;  %v10974_v31 = vld [vmem:[%s16406_s1 + $0xc0] ss:$8 sps:$4 sm:$0xff]   ;;  %v10975_v32 = vld [vmem:[%s16406_s1 + $0xd4] ss:$8 sps:$4 sm:$0xff]  }
  0x19   : > { %1132 = vmatprep.mubr.bf16.mxu1 %v8871_v15  ;;  %870 = vmatprep.mubr.bf16.mxu0 %v8799_v24  ;;  %v10977_v33 = vld [vmem:[%s16406_s1 + $0xd0] ss:$8 sps:$4 sm:$0xff]   ;;  %v10978_v34 = vld [vmem:[%s16406_s1 + $0xe4] ss:$8 sps:$4 sm:$0xff]   ;;  %v10980_v35 = vld [vmem:[%s16406_s1 + $0xe0] ss:$8 sps:$4 sm:$0xff]  }
  0x1a   : > { %v10981_v36 = vld [vmem:[%s16406_s1 + $0xf4] ss:$8 sps:$4 sm:$0xff]   ;;  %v10983_v37 = vld [vmem:[%s16406_s1 + $0xf0] ss:$8 sps:$4 sm:$0xff]   ;;  %v10984_v38 = vld [vmem:[%s16406_s1 + $0x104] ss:$8 sps:$4 sm:$0xff]  }
  0x1b   : > { %1107 = vmatpush1.bf16.msra.mxu1 %v10947_v7  ;;  %845 = vmatpush1.bf16.msra.mxu0 %v10947_v7  ;;  %v1056_v39 = vld [vmem:[%s12328_s27 + $0x110] sm:$0xff]  ;;  %v463_v43 = vld [vmem:[%s12328_s27 + $0x100] sm:$0xff]  ;;  %v12428_v52 = vld [vmem:[%s12328_s27 + $0x98] sm:$0xff] }
  0x1c   : > { %1108 = vmatprep.subr.bf16.mxu1 %v10948_v8  ;;  %846 = vmatprep.subr.bf16.mxu0 %v10948_v8  ;;  %v1058_v40 = vld [vmem:[%s12328_s27 + $0x190] sm:$0xff]  ;;  %v465_v44 = vld [vmem:[%s12328_s27 + $0x180] sm:$0xff]  ;;  %v12431_v55 = vld [vmem:[%s12328_s27 + $0x8] sm:$0xff]  ;;  %v8873_v59 = vcombine.high %v12425_v51, %v12428_v52 }
  0x1d   : > { %v10986_v45 = vld [vmem:[%s16406_s1 + $0x100] ss:$8 sps:$4 sm:$0xff]   ;;  %v10987_v46 = vld [vmem:[%s16406_s1 + $0x114] ss:$8 sps:$4 sm:$0xff]   ;;  %v8875_v47 = vcombine.high %v1056_v39, %v1058_v40  ;;  %v8803_v48 = vcombine.high %v463_v43, %v465_v44  ;;  %v10989_v49 = vld [vmem:[%s16406_s1 + $0x110] ss:$8 sps:$4 sm:$0xff]   ;;  %v8874_v53 = vcombine.low %v1056_v39, %v1058_v40  ;;  %v8802_v54 = vcombine.low %v463_v43, %v465_v44 }
  0x1e   : > { %v10990_v50 = vld [vmem:[%s16406_s1 + $0x124] ss:$8 sps:$4 sm:$0xff]   ;;  %v10992_v57 = vld [vmem:[%s16406_s1 + $0x120] ss:$8 sps:$4 sm:$0xff]   ;;  %v10993_v58 = vld [vmem:[%s16406_s1 + $0x134] ss:$8 sps:$4 sm:$0xff]  }
  0x1f   : > { %1109 = vmatpush1.bf16.msra.mxu1 %v10950_v9  ;;  %847 = vmatpush1.bf16.msra.mxu0 %v10950_v9  ;;  %v12434_v56 = vld [vmem:[%s12328_s27 + $0x88] sm:$0xff]  ;;  %v10995_v61 = vld [vmem:[%s16406_s1 + $0x130] ss:$8 sps:$4 sm:$0xff]   ;;  %v10999_v0 = vld [vmem:[%s16406_s1 + $0x154] ss:$8 sps:$4 sm:$0xff]  }
  0x20   : > { %1110 = vmatprep.subr.bf16.mxu1 %v10951_v10  ;;  %848 = vmatprep.subr.bf16.mxu0 %v10951_v10  ;;  %v8801_v60 = vcombine.high %v12431_v55, %v12434_v56  ;;  %v10996_v62 = vld [vmem:[%s16406_s1 + $0x144] ss:$8 sps:$4 sm:$0xff]   ;;  %v10998_v63 = vld [vmem:[%s16406_s1 + $0x140] ss:$8 sps:$4 sm:$0xff]   ;;  %v11001_v1 = vld [vmem:[%s16406_s1 + $0x150] ss:$8 sps:$4 sm:$0xff]  }
  0x21   : > { %v11002_v2 = vld [vmem:[%s16406_s1 + $0x164] ss:$8 sps:$4 sm:$0xff]   ;;  %v11004_v3 = vld [vmem:[%s16406_s1 + $0x160] ss:$8 sps:$4 sm:$0xff]   ;;  %v11005_v4 = vld [vmem:[%s16406_s1 + $0x174] ss:$8 sps:$4 sm:$0xff]  }
  0x22   : > { %v11007_v5 = vld [vmem:[%s16406_s1 + $0x170] ss:$8 sps:$4 sm:$0xff]   ;;  %v11008_v6 = vld [vmem:[%s16406_s1 + $0x184] ss:$8 sps:$4 sm:$0xff]   ;;  %v11010_v7 = vld [vmem:[%s16406_s1 + $0x180] ss:$8 sps:$4 sm:$0xff]  }
  0x23   : > { %1111 = vmatpush1.bf16.msra.mxu1 %v10953_v11  ;;  %849 = vmatpush1.bf16.msra.mxu0 %v10953_v11  ;;  %v11011_v8 = vld [vmem:[%s16406_s1 + $0x194] ss:$8 sps:$4 sm:$0xff]   ;;  %v11013_v9 = vld [vmem:[%s16406_s1 + $0x190] ss:$8 sps:$4 sm:$0xff]   ;;  %v11014_v10 = vld [vmem:[%s16406_s1 + $0x1a4] ss:$8 sps:$4 sm:$0xff]  }
  0x24   : > { %1112 = vmatprep.subr.bf16.mxu1 %v10954_v12  ;;  %850 = vmatprep.subr.bf16.mxu0 %v10954_v12  ;;  %v11016_v11 = vld [vmem:[%s16406_s1 + $0x1a0] ss:$8 sps:$4 sm:$0xff]   ;;  %v11017_v12 = vld [vmem:[%s16406_s1 + $0x1b4] ss:$8 sps:$4 sm:$0xff]   ;;  %v11019_v13 = vld [vmem:[%s16406_s1 + $0x1b0] ss:$8 sps:$4 sm:$0xff]  }
  0x25   : > { %v11020_v14 = vld [vmem:[%s16406_s1 + $0x1c4] ss:$8 sps:$4 sm:$0xff]   ;;  %v11022_v15 = vld [vmem:[%s16406_s1 + $0x1c0] ss:$8 sps:$4 sm:$0xff]   ;;  %v1057_v22 = vld [vmem:[%s12328_s27 + $0x118] sm:$0xff] }
  0x26   : > { %v1059_v23 = vld [vmem:[%s12328_s27 + $0x198] sm:$0xff]  ;;  %v464_v24 = vld [vmem:[%s12328_s27 + $0x108] sm:$0xff] }
  0x27   : > { %1113 = vmatpush1.bf16.msra.mxu1 %v10956_v16  ;;  %851 = vmatpush1.bf16.msra.mxu0 %v10956_v16  ;;  %v11023_v16 = vld [vmem:[%s16406_s1 + $0x1d4] ss:$8 sps:$4 sm:$0xff]   ;;  %v8876_v40 = vcombine.low %v1057_v22, %v1059_v23  ;;  %v11047_v43 = vld [vmem:[%s16408_s3 + $0x2d8] ss:$20 sps:$4 sm:$0xff]  }
  0x28   : > { %1114 = vmatprep.subr.bf16.mxu1 %v10957_v17  ;;  %852 = vmatprep.subr.bf16.mxu0 %v10957_v17  ;;  %v11025_v17 = vld [vmem:[%s16406_s1 + $0x1d0] ss:$8 sps:$4 sm:$0xff]  }
  0x29   : > { %v11049_v39 = vld [vmem:[%s16408_s3 + $0x2dc] ss:$20 sps:$4 sm:$0xff]  }
  0x2a   : > { %v11052_v44 = vld [vmem:[%s16408_s3 + $0x2fc] ss:$20 sps:$4 sm:$0xff]  }
  0x2b   : > { %1115 = vmatpush1.bf16.msra.mxu1 %v10959_v18  ;;  %853 = vmatpush1.bf16.msra.mxu0 %v10959_v18  ;;  %v11026_v18 = vld [vmem:[%s16406_s1 + $0x1e4] ss:$8 sps:$4 sm:$0xff]  }
  0x2c   : > { %1116 = vmatprep.subr.bf16.mxu1 %v10960_v19  ;;  %854 = vmatprep.subr.bf16.mxu0 %v10960_v19  ;;  %v11028_v19 = vld [vmem:[%s16406_s1 + $0x1e0] ss:$8 sps:$4 sm:$0xff]  }
  0x2f   : > { %1117 = vmatpush1.bf16.msra.mxu1 %v10962_v20  ;;  %855 = vmatpush1.bf16.msra.mxu0 %v10962_v20  ;;  %v11029_v20 = vld [vmem:[%s16406_s1 + $0x1f4] ss:$8 sps:$4 sm:$0xff]  }
  0x30   : > { %1118 = vmatprep.subr.bf16.mxu1 %v10963_v21  ;;  %856 = vmatprep.subr.bf16.mxu0 %v10963_v21  ;;  %v11031_v21 = vld [vmem:[%s16406_s1 + $0x1f0] ss:$8 sps:$4 sm:$0xff]  }
  0x33   : > { %1119 = vmatpush1.bf16.msra.mxu1 %v10965_v25  ;;  %857 = vmatpush1.bf16.msra.mxu0 %v10965_v25  ;;  %v466_v25 = vld [vmem:[%s12328_s27 + $0x188] sm:$0xff] }
  0x34   : > { %1120 = vmatprep.subr.bf16.mxu1 %v10966_v26  ;;  %858 = vmatprep.subr.bf16.mxu0 %v10966_v26  ;;  %v11034_v26 = vld [vmem:[%s16408_s3 + $0x284] ss:$20 sps:$4 sm:$0xff]  }
  0x37   : > { %1121 = vmatpush1.bf16.msra.mxu1 %v10968_v27  ;;  %859 = vmatpush1.bf16.msra.mxu0 %v10968_v27  ;;  %v11037_v27 = vld [vmem:[%s16408_s3 + $0x28c] ss:$20 sps:$4 sm:$0xff]  }
  0x38   : > { %1122 = vmatprep.subr.bf16.mxu1 %v10969_v28  ;;  %860 = vmatprep.subr.bf16.mxu0 %v10969_v28  ;;  %v8872_v28 = vcombine.low %v12425_v51, %v12428_v52  ;;  %v11059_v51 = vld [vmem:[%s16408_s3 + $0x328] ss:$20 sps:$4 sm:$0xff]   ;;  %v11064_v52 = vld [vmem:[%s16408_s3 + $0x34c] ss:$20 sps:$4 sm:$0xff]  }
  0x3b   : > { %1123 = vmatpush1.bf16.msra.mxu1 %v10971_v29  ;;  %861 = vmatpush1.bf16.msra.mxu0 %v10971_v29  ;;  %v8800_v29 = vcombine.low %v12431_v55, %v12434_v56  ;;  %v11065_v55 = vld [vmem:[%s16408_s3 + $0x350] ss:$20 sps:$4 sm:$0xff]   ;;  %v11070_v56 = vld [vmem:[%s16408_s3 + $0x374] ss:$20 sps:$4 sm:$0xff]  }
  0x3c   : > { %1124 = vmatprep.subr.bf16.mxu1 %v10972_v30  ;;  %862 = vmatprep.subr.bf16.mxu0 %v10972_v30  ;;  %v11032_v30 = vld [vmem:[%s16408_s3 + $0x280] ss:$20 sps:$4 sm:$0xff]  }
  0x3f   : > { %1125 = vmatpush1.bf16.msra.mxu1 %v10974_v31  ;;  %863 = vmatpush1.bf16.msra.mxu0 %v10974_v31  ;;  %v11035_v31 = vld [vmem:[%s16408_s3 + $0x288] ss:$20 sps:$4 sm:$0xff]  }
  0x40   : > { %1126 = vmatprep.subr.bf16.mxu1 %v10975_v32  ;;  %864 = vmatprep.subr.bf16.mxu0 %v10975_v32  ;;  %v8877_v32 = vcombine.high %v1057_v22, %v1059_v23  ;;  %v11110_v22 = vld [vmem:[%s16408_s3 + $0x488] ss:$20 sps:$4 sm:$0xff]   ;;  %v11113_v23 = vld [vmem:[%s16408_s3 + $0x490] ss:$20 sps:$4 sm:$0xff]  }
  0x43   : > { %1127 = vmatpush1.bf16.msra.mxu1 %v10977_v33  ;;  %865 = vmatpush1.bf16.msra.mxu0 %v10977_v33  ;;  %v8805_v33 = vcombine.high %v464_v24, %v466_v25 }
  0x44   : > { %1128 = vmatprep.subr.bf16.mxu1 %v10978_v34  ;;  %866 = vmatprep.subr.bf16.mxu0 %v10978_v34  ;;  %v11040_v34 = vld [vmem:[%s16408_s3 + $0x2ac] ss:$20 sps:$4 sm:$0xff]  }
  0x47   : > { %1129 = vmatpush1.bf16.msra.mxu1 %v10980_v35  ;;  %867 = vmatpush1.bf16.msra.mxu0 %v10980_v35  ;;  %v11043_v35 = vld [vmem:[%s16408_s3 + $0x2b4] ss:$20 sps:$4 sm:$0xff]  }
  0x48   : > { %1130 = vmatprep.subr.bf16.mxu1 %v10981_v36  ;;  %868 = vmatprep.subr.bf16.mxu0 %v10981_v36  ;;  %v11038_v36 = vld [vmem:[%s16408_s3 + $0x2a8] ss:$20 sps:$4 sm:$0xff]  }
  0x4b   : > { %1131 = vmatpush1.bf16.msra.mxu1 %v10983_v37  ;;  %869 = vmatpush1.bf16.msra.mxu0 %v10983_v37  ;;  %v11041_v37 = vld [vmem:[%s16408_s3 + $0x2b0] ss:$20 sps:$4 sm:$0xff]  }
  0x4c   : > { %1153 = vmatprep.subr.bf16.mxu1 %v10984_v38  ;;  %891 = vmatprep.subr.bf16.mxu0 %v10984_v38  ;;  %v11046_v38 = vld [vmem:[%s16408_s3 + $0x2d4] ss:$20 sps:$4 sm:$0xff]  }
  0x4e   : > { %1133 = vmatmul.mubr.bf16.vlgmr.msra.gmra.mrb[0].mxu1 %v8870_v41  ;;  %871 = vmatmul.mubr.bf16.vlgmr.msra.gmra.mrb[0].mxu0 %v8798_v42  ;;  %v8804_v41 = vcombine.low %v464_v24, %v466_v25  ;;  %v11044_v42 = vld [vmem:[%s16408_s3 + $0x2d0] ss:$20 sps:$4 sm:$0xff]   ;;  %v11118_v24 = vld [vmem:[%s16408_s3 + $0x4b4] ss:$20 sps:$4 sm:$0xff]  }
  0x4f   : > { %1154 = vmatpush1.bf16.msra.mxu1 %v10986_v45  ;;  %892 = vmatpush1.bf16.msra.mxu0 %v10986_v45  ;;  %v11055_v45 = vld [vmem:[%s16408_s3 + $0x304] ss:$20 sps:$4 sm:$0xff]   ;;  %v11121_v25 = vld [vmem:[%s16408_s3 + $0x4bc] ss:$20 sps:$4 sm:$0xff]  }
  0x50   : > { %1155 = vmatprep.subr.bf16.mxu1 %v10987_v46  ;;  %893 = vmatprep.subr.bf16.mxu0 %v10987_v46  ;;  %v11050_v46 = vld [vmem:[%s16408_s3 + $0x2f8] ss:$20 sps:$4 sm:$0xff]  }
  0x51   : > { %1142 = vmatprep.mubr.bf16.mxu1 %v8875_v47  ;;  %880 = vmatprep.mubr.bf16.mxu0 %v8803_v48  ;;  %v11053_v47 = vld [vmem:[%s16408_s3 + $0x300] ss:$20 sps:$4 sm:$0xff]   ;;  %v11058_v48 = vld [vmem:[%s16408_s3 + $0x324] ss:$20 sps:$4 sm:$0xff]  }
  0x53   : > { %1156 = vmatpush1.bf16.msra.mxu1 %v10989_v49  ;;  %894 = vmatpush1.bf16.msra.mxu0 %v10989_v49  ;;  %v11061_v49 = vld [vmem:[%s16408_s3 + $0x32c] ss:$20 sps:$4 sm:$0xff]  }
  0x54   : > { %1157 = vmatprep.subr.bf16.mxu1 %v10990_v50  ;;  %895 = vmatprep.subr.bf16.mxu0 %v10990_v50  ;;  %v11056_v50 = vld [vmem:[%s16408_s3 + $0x320] ss:$20 sps:$4 sm:$0xff]  }
  0x56   : > { %1143 = vmatmul.mubr.bf16.gmra.mrb[4].mxu1 %v8874_v53  ;;  %881 = vmatmul.mubr.bf16.gmra.mrb[4].mxu0 %v8802_v54  ;;  %v11067_v53 = vld [vmem:[%s16408_s3 + $0x354] ss:$20 sps:$4 sm:$0xff]  }
  0x57   : > { %1158 = vmatpush1.bf16.msra.mxu1 %v10992_v57  ;;  %896 = vmatpush1.bf16.msra.mxu0 %v10992_v57  ;;  %v11062_v54 = vld [vmem:[%s16408_s3 + $0x348] ss:$20 sps:$4 sm:$0xff]  }
  0x58   : > { %1159 = vmatprep.subr.bf16.mxu1 %v10993_v58  ;;  %897 = vmatprep.subr.bf16.mxu0 %v10993_v58  ;;  %v11073_v57 = vld [vmem:[%s16408_s3 + $0x37c] ss:$20 sps:$4 sm:$0xff]  }
  0x59   : > { %1185 = vmatprep.mubr.bf16.mxu1 %v8873_v59  ;;  %923 = vmatprep.mubr.bf16.mxu0 %v8801_v60  ;;  %v11068_v58 = vld [vmem:[%s16408_s3 + $0x370] ss:$20 sps:$4 sm:$0xff]   ;;  %v11071_v59 = vld [vmem:[%s16408_s3 + $0x378] ss:$20 sps:$4 sm:$0xff]  }
  0x5a   : > { %v11076_v60 = vld [vmem:[%s16408_s3 + $0x39c] ss:$20 sps:$4 sm:$0xff]  }
  0x5b   : > { %1160 = vmatpush1.bf16.msra.mxu1 %v10995_v61  ;;  %898 = vmatpush1.bf16.msra.mxu0 %v10995_v61  ;;  %v11079_v61 = vld [vmem:[%s16408_s3 + $0x3a4] ss:$20 sps:$4 sm:$0xff]  }
  0x5c   : > { %1161 = vmatprep.subr.bf16.mxu1 %v10996_v62  ;;  %899 = vmatprep.subr.bf16.mxu0 %v10996_v62  ;;  %v11074_v62 = vld [vmem:[%s16408_s3 + $0x398] ss:$20 sps:$4 sm:$0xff]  }
  0x5f   : > { %1162 = vmatpush1.bf16.msra.mxu1 %v10998_v63  ;;  %900 = vmatpush1.bf16.msra.mxu0 %v10998_v63  ;;  %v11077_v63 = vld [vmem:[%s16408_s3 + $0x3a0] ss:$20 sps:$4 sm:$0xff]  }
  0x60   : > { %1163 = vmatprep.subr.bf16.mxu1 %v10999_v0  ;;  %901 = vmatprep.subr.bf16.mxu0 %v10999_v0  ;;  %v11082_v0 = vld [vmem:[%s16408_s3 + $0x3c4] ss:$20 sps:$4 sm:$0xff]  }
  0x63   : > { %1164 = vmatpush1.bf16.msra.mxu1 %v11001_v1  ;;  %902 = vmatpush1.bf16.msra.mxu0 %v11001_v1  ;;  %v11085_v1 = vld [vmem:[%s16408_s3 + $0x3cc] ss:$20 sps:$4 sm:$0xff]  }
  0x64   : > { %1165 = vmatprep.subr.bf16.mxu1 %v11002_v2  ;;  %903 = vmatprep.subr.bf16.mxu0 %v11002_v2  ;;  %v11080_v2 = vld [vmem:[%s16408_s3 + $0x3c0] ss:$20 sps:$4 sm:$0xff]  }
  0x67   : > { %1166 = vmatpush1.bf16.msra.mxu1 %v11004_v3  ;;  %904 = vmatpush1.bf16.msra.mxu0 %v11004_v3  ;;  %v11083_v3 = vld [vmem:[%s16408_s3 + $0x3c8] ss:$20 sps:$4 sm:$0xff]  }
  0x68   : > { %1167 = vmatprep.subr.bf16.mxu1 %v11005_v4  ;;  %905 = vmatprep.subr.bf16.mxu0 %v11005_v4  ;;  %v11088_v4 = vld [vmem:[%s16408_s3 + $0x3ec] ss:$20 sps:$4 sm:$0xff]  }
  0x6b   : > { %1168 = vmatpush1.bf16.msra.mxu1 %v11007_v5  ;;  %906 = vmatpush1.bf16.msra.mxu0 %v11007_v5  ;;  %v11091_v5 = vld [vmem:[%s16408_s3 + $0x3f4] ss:$20 sps:$4 sm:$0xff]  }
  0x6c   : > { %1169 = vmatprep.subr.bf16.mxu1 %v11008_v6  ;;  %907 = vmatprep.subr.bf16.mxu0 %v11008_v6  ;;  %v11086_v6 = vld [vmem:[%s16408_s3 + $0x3e8] ss:$20 sps:$4 sm:$0xff]  }
  0x6f   : > { %1170 = vmatpush1.bf16.msra.mxu1 %v11010_v7  ;;  %908 = vmatpush1.bf16.msra.mxu0 %v11010_v7  ;;  %v11089_v7 = vld [vmem:[%s16408_s3 + $0x3f0] ss:$20 sps:$4 sm:$0xff]  }
  0x70   : > { %1171 = vmatprep.subr.bf16.mxu1 %v11011_v8  ;;  %909 = vmatprep.subr.bf16.mxu0 %v11011_v8  ;;  %v11094_v8 = vld [vmem:[%s16408_s3 + $0x414] ss:$20 sps:$4 sm:$0xff]  }
  0x73   : > { %1172 = vmatpush1.bf16.msra.mxu1 %v11013_v9  ;;  %910 = vmatpush1.bf16.msra.mxu0 %v11013_v9  ;;  %v11097_v9 = vld [vmem:[%s16408_s3 + $0x41c] ss:$20 sps:$4 sm:$0xff]  }
  0x74   : > { %1173 = vmatprep.subr.bf16.mxu1 %v11014_v10  ;;  %911 = vmatprep.subr.bf16.mxu0 %v11014_v10  ;;  %v11092_v10 = vld [vmem:[%s16408_s3 + $0x410] ss:$20 sps:$4 sm:$0xff]  }
  0x77   : > { %1174 = vmatpush1.bf16.msra.mxu1 %v11016_v11  ;;  %912 = vmatpush1.bf16.msra.mxu0 %v11016_v11  ;;  %v11095_v11 = vld [vmem:[%s16408_s3 + $0x418] ss:$20 sps:$4 sm:$0xff]  }
  0x78   : > { %1175 = vmatprep.subr.bf16.mxu1 %v11017_v12  ;;  %913 = vmatprep.subr.bf16.mxu0 %v11017_v12  ;;  %v11100_v12 = vld [vmem:[%s16408_s3 + $0x43c] ss:$20 sps:$4 sm:$0xff]  }
  0x7b   : > { %1176 = vmatpush1.bf16.msra.mxu1 %v11019_v13  ;;  %914 = vmatpush1.bf16.msra.mxu0 %v11019_v13  ;;  %v11103_v13 = vld [vmem:[%s16408_s3 + $0x444] ss:$20 sps:$4 sm:$0xff]  }
  0x7c   : > { %1177 = vmatprep.subr.bf16.mxu1 %v11020_v14  ;;  %915 = vmatprep.subr.bf16.mxu0 %v11020_v14  ;;  %v11098_v14 = vld [vmem:[%s16408_s3 + $0x438] ss:$20 sps:$4 sm:$0xff]  }
  0x7f   : > { %1178 = vmatpush1.bf16.msra.mxu1 %v11022_v15  ;;  %916 = vmatpush1.bf16.msra.mxu0 %v11022_v15  ;;  %v11101_v15 = vld [vmem:[%s16408_s3 + $0x440] ss:$20 sps:$4 sm:$0xff]  }
  0x80   : > { %1179 = vmatprep.subr.bf16.mxu1 %v11023_v16  ;;  %917 = vmatprep.subr.bf16.mxu0 %v11023_v16  ;;  %v11106_v16 = vld [vmem:[%s16408_s3 + $0x464] ss:$20 sps:$4 sm:$0xff]  }
  0x83   : > { %1180 = vmatpush1.bf16.msra.mxu1 %v11025_v17  ;;  %918 = vmatpush1.bf16.msra.mxu0 %v11025_v17  ;;  %v11109_v17 = vld [vmem:[%s16408_s3 + $0x46c] ss:$20 sps:$4 sm:$0xff]  }
  0x84   : > { %1181 = vmatprep.subr.bf16.mxu1 %v11026_v18  ;;  %919 = vmatprep.subr.bf16.mxu0 %v11026_v18  ;;  %v11104_v18 = vld [vmem:[%s16408_s3 + $0x460] ss:$20 sps:$4 sm:$0xff]  }
  0x87   : > { %1182 = vmatpush1.bf16.msra.mxu1 %v11028_v19  ;;  %920 = vmatpush1.bf16.msra.mxu0 %v11028_v19  ;;  %v11107_v19 = vld [vmem:[%s16408_s3 + $0x468] ss:$20 sps:$4 sm:$0xff]  }
  0x88   : > { %1183 = vmatprep.subr.bf16.mxu1 %v11029_v20  ;;  %921 = vmatprep.subr.bf16.mxu0 %v11029_v20  ;;  %v11112_v20 = vld [vmem:[%s16408_s3 + $0x48c] ss:$20 sps:$4 sm:$0xff]  }
  0x8b   : > { %1184 = vmatpush1.bf16.msra.mxu1 %v11031_v21  ;;  %922 = vmatpush1.bf16.msra.mxu0 %v11031_v21  ;;  %v11115_v21 = vld [vmem:[%s16408_s3 + $0x494] ss:$20 sps:$4 sm:$0xff]  }
  0x8c   : > { %1731 = vmatprep.subr.bf16.mxu0 %v11034_v26  ;;  %1784 = vmatprep.subr.bf16.mxu1 %v11037_v27  ;;  %v11116_v26 = vld [vmem:[%s16408_s3 + $0x4b0] ss:$20 sps:$4 sm:$0xff]   ;;  %v11119_v27 = vld [vmem:[%s16408_s3 + $0x4b8] ss:$20 sps:$4 sm:$0xff]  }
  0x8e   : > { %1186 = vmatmul.mubr.bf16.vlgmr.msra.gmra.mrb[0].mxu1 %v8872_v28  ;;  %924 = vmatmul.mubr.bf16.vlgmr.msra.gmra.mrb[0].mxu0 %v8800_v29  ;;  %v11124_v28 = vld [vmem:[%s16408_s3 + $0x4dc] ss:$20 sps:$4 sm:$0xff]   ;;  %v11127_v29 = vld [vmem:[%s16408_s3 + $0x4e4] ss:$20 sps:$4 sm:$0xff]  }
  0x8f   : > { %1195 = vmatprep.mubr.bf16.mxu1 %v8877_v32  ;;  %933 = vmatprep.mubr.bf16.mxu0 %v8805_v33  ;;  %v11128_v32 = vld [vmem:[%s16408_s3 + $0x3d0] ss:$20 sps:$4 sm:$0xff]   ;;  %v11131_v33 = vld [vmem:[%s16408_s3 + $0xc] ss:$20 sps:$4 sm:$0xff]  }
  0x90   : > { %1732 = vmatpush1.bf16.msra.mxu0 %v11032_v30  ;;  %1785 = vmatpush1.bf16.msra.mxu1 %v11035_v31  ;;  %v11122_v30 = vld [vmem:[%s16408_s3 + $0x4d8] ss:$20 sps:$4 sm:$0xff]   ;;  %v11125_v31 = vld [vmem:[%s16408_s3 + $0x4e0] ss:$20 sps:$4 sm:$0xff]  }
  0x91   : > { %1733 = vmatprep.subr.bf16.mxu0 %v11040_v34  ;;  %1786 = vmatprep.subr.bf16.mxu1 %v11043_v35  ;;  %v468_v34 = vlaneseq }
  0x93   : > { %v12727_v35 = vshrl.u32 %v468_v34, 7 }
  0x94   : > { %1734 = vmatpush1.bf16.msra.mxu0 %v11038_v36  ;;  %1787 = vmatpush1.bf16.msra.mxu1 %v11041_v37  ;;  %v458_v36 = vld [vmem:[%s16407_s2] sm:$0x3] }
  0x95   : > { %1735 = vmatprep.subr.bf16.mxu0 %v11046_v38  ;;  %1788 = vmatprep.subr.bf16.mxu1 %v11049_v39  ;;  %16487 = vst [vmem:[#allocation2_spill] sm:$0xff] %v12727_v35  ;;  %v12733_v37 = vsub.s32 0, %v12727_v35  ;;  %v12736_v38 = vsub.s32 1, %v12727_v35  ;;  %v11282_v35 = vld [vmem:[%s16408_s3 + $0x5ac] ss:$20 sps:$4 sm:$0xff]  }
  0x96   : > { %1196 = vmatmul.mubr.bf16.gmra.mrb[4].mxu1 %v8876_v40  ;;  %934 = vmatmul.mubr.bf16.gmra.mrb[4].mxu0 %v8804_v41 }
  0x97   : > { %16488 = vst [vmem:[#allocation3_spill] sm:$0xff] %v12733_v37  ;;  %16489 = vst [vmem:[#allocation4_spill] sm:$0xff] %v12736_v38  ;;  %v12739_v39 = vrot.slane %v458_v36, %v12733_v37  ;;  %v12742_v40 = vrot.slane %v458_v36, %v12736_v38  ;;  %v11276_v38 = vld [vmem:[%s16408_s3 + $0x584] ss:$20 sps:$4 sm:$0xff]   ;;  %v11274_v37 = vld [vmem:[%s16408_s3 + $0x580] ss:$20 sps:$4 sm:$0xff]  }
  0x98   : > { %1736 = vmatpush1.bf16.msra.mxu0 %v11044_v42  ;;  %1789 = vmatpush1.bf16.msra.mxu1 %v11047_v43 }
  0x99   : > { %1737 = vmatprep.subr.bf16.mxu0 %v11052_v44  ;;  %1790 = vmatprep.subr.bf16.mxu1 %v11055_v45  ;;  %16490 = vst [vmem:[#allocation5_spill] sm:$0xff] %v12739_v39 }
  0x9c   : > { %1738 = vmatpush1.bf16.msra.mxu0 %v11050_v46  ;;  %1791 = vmatpush1.bf16.msra.mxu1 %v11053_v47 }
  0x9d   : > { %1739 = vmatprep.subr.bf16.mxu0 %v11058_v48  ;;  %1792 = vmatprep.subr.bf16.mxu1 %v11061_v49 }
  0xa0   : > { %1740 = vmatpush1.bf16.msra.mxu0 %v11056_v50  ;;  %1793 = vmatpush1.bf16.msra.mxu1 %v11059_v51 }
  0xa1   : > { %1741 = vmatprep.subr.bf16.mxu0 %v11064_v52  ;;  %1794 = vmatprep.subr.bf16.mxu1 %v11067_v53 }
  0xa4   : > { %1742 = vmatpush1.bf16.msra.mxu0 %v11062_v54  ;;  %1795 = vmatpush1.bf16.msra.mxu1 %v11065_v55 }
  0xa5   : > { %1743 = vmatprep.subr.bf16.mxu0 %v11070_v56  ;;  %1796 = vmatprep.subr.bf16.mxu1 %v11073_v57 }
  0xa8   : > { %1744 = vmatpush1.bf16.msra.mxu0 %v11068_v58  ;;  %1797 = vmatpush1.bf16.msra.mxu1 %v11071_v59 }
  0xa9   : > { %1745 = vmatprep.subr.bf16.mxu0 %v11076_v60  ;;  %1798 = vmatprep.subr.bf16.mxu1 %v11079_v61 }
  0xac   : > { %1746 = vmatpush1.bf16.msra.mxu0 %v11074_v62  ;;  %1799 = vmatpush1.bf16.msra.mxu1 %v11077_v63 }
  0xad   : > { %1747 = vmatprep.subr.bf16.mxu0 %v11082_v0  ;;  %1800 = vmatprep.subr.bf16.mxu1 %v11085_v1  ;;  %v11129_v0 = vld [vmem:[%s16408_s3 + $0x8] ss:$20 sps:$4 sm:$0xff]   ;;  %v11132_v1 = vld [vmem:[%s16408_s3 + $0x290] ss:$20 sps:$4 sm:$0xff]  }
  0xb0   : > { %1748 = vmatpush1.bf16.msra.mxu0 %v11080_v2  ;;  %1801 = vmatpush1.bf16.msra.mxu1 %v11083_v3 }
  0xb1   : > { %1749 = vmatprep.subr.bf16.mxu0 %v11088_v4  ;;  %1802 = vmatprep.subr.bf16.mxu1 %v11091_v5  ;;  %v11133_v4 = vld [vmem:[%s16408_s3 + $0x3f8] ss:$20 sps:$4 sm:$0xff]   ;;  %v11136_v5 = vld [vmem:[%s16408_s3 + $0x34] ss:$20 sps:$4 sm:$0xff]  }
  0xb4   : > { %1750 = vmatpush1.bf16.msra.mxu0 %v11086_v6  ;;  %1803 = vmatpush1.bf16.msra.mxu1 %v11089_v7 }
  0xb5   : > { %1751 = vmatprep.subr.bf16.mxu0 %v11094_v8  ;;  %1804 = vmatprep.subr.bf16.mxu1 %v11097_v9 }
  0xb8   : > { %1752 = vmatpush1.bf16.msra.mxu0 %v11092_v10  ;;  %1805 = vmatpush1.bf16.msra.mxu1 %v11095_v11 }
  0xb9   : > { %1753 = vmatprep.subr.bf16.mxu0 %v11100_v12  ;;  %1806 = vmatprep.subr.bf16.mxu1 %v11103_v13 }
  0xbc   : > { %1754 = vmatpush1.bf16.msra.mxu0 %v11098_v14  ;;  %1807 = vmatpush1.bf16.msra.mxu1 %v11101_v15 }
  0xbd   : > { %1755 = vmatprep.subr.bf16.mxu0 %v11106_v16  ;;  %1808 = vmatprep.subr.bf16.mxu1 %v11109_v17  ;;  %v11134_v17 = vld [vmem:[%s16408_s3 + $0x30] ss:$20 sps:$4 sm:$0xff]  }
  0xc0   : > { %1756 = vmatpush1.bf16.msra.mxu0 %v11104_v18  ;;  %1809 = vmatpush1.bf16.msra.mxu1 %v11107_v19  ;;  %v11137_v18 = vld [vmem:[%s16408_s3 + $0x2b8] ss:$20 sps:$4 sm:$0xff]  }
  0xc1   : > { %1757 = vmatprep.subr.bf16.mxu0 %v11112_v20  ;;  %1810 = vmatprep.subr.bf16.mxu1 %v11115_v21 }
  0xc4   : > { %1758 = vmatpush1.bf16.msra.mxu0 %v11110_v22  ;;  %1811 = vmatpush1.bf16.msra.mxu1 %v11113_v23 }
  0xc5   : > { %1759 = vmatprep.subr.bf16.mxu0 %v11118_v24  ;;  %1812 = vmatprep.subr.bf16.mxu1 %v11121_v25  ;;  %v11138_v24 = vld [vmem:[%s16408_s3 + $0x420] ss:$20 sps:$4 sm:$0xff]   ;;  %v11141_v25 = vld [vmem:[%s16408_s3 + $0x5c] ss:$20 sps:$4 sm:$0xff]  }
  0xc8   : > { %1760 = vmatpush1.bf16.msra.mxu0 %v11116_v26  ;;  %1813 = vmatpush1.bf16.msra.mxu1 %v11119_v27 }
  0xc9   : > { %1761 = vmatprep.subr.bf16.mxu0 %v11124_v28  ;;  %1814 = vmatprep.subr.bf16.mxu1 %v11127_v29 }
  0xcc   : > { %1762 = vmatpush1.bf16.msra.mxu0 %v11122_v30  ;;  %1815 = vmatpush1.bf16.msra.mxu1 %v11125_v31 }
  0xcd   : > { %10333 = vmatprep.subr.bf16.mxu0 %v11128_v32  ;;  %2355 = vmatprep.subr.bf16.mxu1 %v11131_v33 }
 0x161   : > { %v1187_v41 = vpop.f32.mrb[0].mxu1  ;;  %v925_v42 = vpop.f32.mrb[0].mxu0 }
 0x162   : > { %v10695_v43 = vadd.f32 %v1187_v41, %v12739_v39  ;;  %v1189_v44 = vpop.f32.mrb[1].mxu1  ;;  %v10687_v45 = vadd.f32 %v925_v42, %v12739_v39  ;;  %v927_v46 = vpop.f32.mrb[1].mxu0  ;;  %v11139_v41 = vld [vmem:[%s16408_s3 + $0x58] ss:$20 sps:$4 sm:$0xff]   ;;  %v11142_v42 = vld [vmem:[%s16408_s3 + $0x2e0] ss:$20 sps:$4 sm:$0xff]  }
 0x163   : > { %v10696_v47 = vadd.f32 %v1189_v44, %v12742_v40  ;;  %v1191_v48 = vpop.f32.mrb[2].mxu1  ;;  %v10688_v49 = vadd.f32 %v927_v46, %v12742_v40  ;;  %v929_v50 = vpop.f32.mrb[2].mxu0 }
 0x164   : > { %v10697_v51 = vadd.f32 %v1191_v48, %v12739_v39  ;;  %v1193_v52 = vpop.f32.mrb[3].mxu1  ;;  %v944_v53 = vmax.f32 %v10687_v45, 0.0  ;;  %v10689_v54 = vadd.f32 %v929_v50, %v12739_v39  ;;  %v931_v55 = vpop.f32.mrb[3].mxu0  ;;  %v1206_v56 = vmax.f32 %v10695_v43, 0.0  ;;  %v11143_v45 = vld [vmem:[%s16408_s3 + $0x448] ss:$20 sps:$4 sm:$0xff]  }
 0x165   : > { %v10698_v57 = vadd.f32 %v1193_v52, %v12742_v40  ;;  %v945_v58 = vmax.f32 %v10688_v49, 0.0  ;;  %v10690_v59 = vadd.f32 %v931_v55, %v12742_v40  ;;  %v1207_v60 = vmax.f32 %v10696_v47, 0.0  ;;  %v11146_v48 = vld [vmem:[%s16408_s3 + $0x84] ss:$20 sps:$4 sm:$0xff]   ;;  %v11144_v50 = vld [vmem:[%s16408_s3 + $0x80] ss:$20 sps:$4 sm:$0xff]  }
 0x166   : > { %v1208_v61 = vmax.f32 %v10697_v51, 0.0  ;;  %v946_v62 = vmax.f32 %v10689_v54, 0.0  ;;  %v11147_v51 = vld [vmem:[%s16408_s3 + $0x308] ss:$20 sps:$4 sm:$0xff]   ;;  %v11148_v52 = vld [vmem:[%s16408_s3 + $0x470] ss:$20 sps:$4 sm:$0xff]  }
 0x167   : > { %v1209_v63 = vmax.f32 %v10698_v57, 0.0  ;;  %v947_v2 = vmax.f32 %v10690_v59, 0.0  ;;  %v11149_v54 = vld [vmem:[%s16408_s3 + $0xa8] ss:$20 sps:$4 sm:$0xff]   ;;  %v11152_v55 = vld [vmem:[%s16408_s3 + $0x330] ss:$20 sps:$4 sm:$0xff]  }
 0x168   : > { %v12758_v3 = vpack.c.bf16 %v1208_v61, %v1206_v56  ;;  %v12766_v6 = vpack.c.bf16 %v946_v62, %v944_v53  ;;  %v11151_v53 = vld [vmem:[%s16408_s3 + $0xac] ss:$20 sps:$4 sm:$0xff]   ;;  %v11156_v57 = vld [vmem:[%s16408_s3 + $0xd4] ss:$20 sps:$4 sm:$0xff]   ;;  %v11161_v61 = vld [vmem:[%s16408_s3 + $0xfc] ss:$20 sps:$4 sm:$0xff]  }
 0x169   : > { %v1215_v7 = vpack.c.bf16 %v1209_v63, %v1207_v60  ;;  %v1197_v8 = vpop.f32.mrb[4].mxu1  ;;  %v12768_v9 = vpack.c.bf16 %v947_v2, %v945_v58  ;;  %v935_v10 = vpop.f32.mrb[4].mxu0  ;;  %v11153_v56 = vld [vmem:[%s16408_s3 + $0x498] ss:$20 sps:$4 sm:$0xff]   ;;  %v11154_v58 = vld [vmem:[%s16408_s3 + $0xd0] ss:$20 sps:$4 sm:$0xff]  }
 0x16a   : > { %v10699_v11 = vadd.f32 %v1197_v8, %v12739_v39  ;;  %v1199_v12 = vpop.f32.mrb[5].mxu1  ;;  %v10691_v13 = vadd.f32 %v935_v10, %v12739_v39  ;;  %v937_v14 = vpop.f32.mrb[5].mxu0  ;;  %v11157_v59 = vld [vmem:[%s16408_s3 + $0x358] ss:$20 sps:$4 sm:$0xff]   ;;  %v11158_v60 = vld [vmem:[%s16408_s3 + $0x4c0] ss:$20 sps:$4 sm:$0xff]  }
 0x16b   : > { %v10700_v15 = vadd.f32 %v1199_v12, %v12742_v40  ;;  %v1201_v16 = vpop.f32.mrb[6].mxu1  ;;  %1763 = vmatprep.mubr.bf16.mxu0 %v1215_v7  ;;  %1816 = vmatprep.mubr.bf16.mxu1 %v1215_v7  ;;  %v10692_v19 = vadd.f32 %v937_v14, %v12742_v40  ;;  %v939_v20 = vpop.f32.mrb[6].mxu0  ;;  %v11159_v62 = vld [vmem:[%s16408_s3 + $0xf8] ss:$20 sps:$4 sm:$0xff]   ;;  %v11162_v63 = vld [vmem:[%s16408_s3 + $0x380] ss:$20 sps:$4 sm:$0xff]  }
 0x16c   : > { %v1210_v21 = vmax.f32 %v10699_v11, 0.0  ;;  %v10701_v22 = vadd.f32 %v1201_v16, %v12739_v39  ;;  %v1203_v23 = vpop.f32.mrb[7].mxu1  ;;  %1764 = vmatmul.mubr.bf16.vlgmr.msra.gmra.mrb[8].mxu0 %v12758_v3  ;;  %1817 = vmatmul.mubr.bf16.vlgmr.msra.gmra.mrb[8].mxu1 %v12758_v3  ;;  %v948_v26 = vmax.f32 %v10691_v13, 0.0  ;;  %v10693_v27 = vadd.f32 %v939_v20, %v12739_v39  ;;  %v941_v28 = vpop.f32.mrb[7].mxu0  ;;  %v11164_v2 = vld [vmem:[%s16408_s3 + $0x120] ss:$20 sps:$4 sm:$0xff]  }
 0x16d   : > { %v1211_v29 = vmax.f32 %v10700_v15, 0.0  ;;  %v10702_v30 = vadd.f32 %v1203_v23, %v12742_v40  ;;  %10334 = vmatpush3.bf16.msra.mxu0 %v11132_v1  ;;  %2356 = vmatpush1.bf16.msra.mxu1 %v11129_v0  ;;  %v949_v31 = vmax.f32 %v10692_v19, 0.0  ;;  %v10694_v32 = vadd.f32 %v941_v28, %v12742_v40  ;;  %v11163_v0 = vld [vmem:[%s16408_s3 + $0x4e8] ss:$20 sps:$4 sm:$0xff]   ;;  %v11166_v1 = vld [vmem:[%s16408_s3 + $0x124] ss:$20 sps:$4 sm:$0xff]  }
 0x16e   : > { %v1212_v33 = vmax.f32 %v10701_v22, 0.0  ;;  %10335 = vmatprep.subr.bf16.mxu0 %v11133_v4  ;;  %2357 = vmatprep.subr.bf16.mxu1 %v11136_v5  ;;  %v950_v34 = vmax.f32 %v10693_v27, 0.0  ;;  %v11167_v4 = vld [vmem:[%s16408_s3 + $0x3a8] ss:$20 sps:$4 sm:$0xff]   ;;  %v11170_v5 = vld [vmem:[%s16408_s3 + $0x4] ss:$20 sps:$4 sm:$0xff]  }
 0x16f   : > { %v1213_v36 = vmax.f32 %v10702_v30, 0.0  ;;  %v951_v43 = vmax.f32 %v10694_v32, 0.0  ;;  %v11168_v8 = vld [vmem:[%s16408_s3] ss:$20 sps:$4 sm:$0xff]   ;;  %v11171_v10 = vld [vmem:[%s16408_s3 + $0x148] ss:$20 sps:$4 sm:$0xff]  }
 0x170   : > { %v12798_v44 = vpack.c.bf16 %v1212_v33, %v1210_v21  ;;  %v12803_v46 = vpack.c.bf16 %v950_v34, %v948_v26  ;;  %v11176_v11 = vld [vmem:[%s16408_s3 + $0x2c] ss:$20 sps:$4 sm:$0xff]   ;;  %v11179_v12 = vld [vmem:[%s16408_s3 + $0x174] ss:$20 sps:$4 sm:$0xff]   ;;  %v11177_v14 = vld [vmem:[%s16408_s3 + $0x170] ss:$20 sps:$4 sm:$0xff]  }
 0x171   : > { %v12805_v47 = vpack.c.bf16 %v1213_v36, %v1211_v29  ;;  %10336 = vmatpush3.bf16.msra.mxu0 %v11137_v18  ;;  %2358 = vmatpush1.bf16.msra.mxu1 %v11134_v17  ;;  %v12810_v49 = vpack.c.bf16 %v951_v43, %v949_v31  ;;  %v11174_v13 = vld [vmem:[%s16408_s3 + $0x28] ss:$20 sps:$4 sm:$0xff]   ;;  %v11183_v17 = vld [vmem:[%s16408_s3 + $0x198] ss:$20 sps:$4 sm:$0xff]   ;;  %v11189_v21 = vld [vmem:[%s16408_s3 + $0x1c0] ss:$20 sps:$4 sm:$0xff]  }
 0x172   : > { %10337 = vmatprep.subr.bf16.mxu0 %v11138_v24  ;;  %2359 = vmatprep.subr.bf16.mxu1 %v11141_v25  ;;  %v11182_v15 = vld [vmem:[%s16408_s3 + $0x54] ss:$20 sps:$4 sm:$0xff]   ;;  %v11185_v16 = vld [vmem:[%s16408_s3 + $0x19c] ss:$20 sps:$4 sm:$0xff]   ;;  %v11191_v19 = vld [vmem:[%s16408_s3 + $0x1c4] ss:$20 sps:$4 sm:$0xff]  }
 0x173   : > { %1773 = vmatprep.mubr.bf16.mxu0 %v12805_v47  ;;  %1826 = vmatprep.mubr.bf16.mxu1 %v12805_v47  ;;  %v11188_v18 = vld [vmem:[%s16408_s3 + $0x7c] ss:$20 sps:$4 sm:$0xff]   ;;  %v11186_v20 = vld [vmem:[%s16408_s3 + $0x78] ss:$20 sps:$4 sm:$0xff]   ;;  %v11192_v24 = vld [vmem:[%s16408_s3 + $0xa0] ss:$20 sps:$4 sm:$0xff]  }
 0x174   : > { %1774 = vmatmul.mubr.bf16.gmra.mrb[12].mxu0 %v12798_v44  ;;  %1827 = vmatmul.mubr.bf16.gmra.mrb[12].mxu1 %v12798_v44  ;;  %v11194_v22 = vld [vmem:[%s16408_s3 + $0xa4] ss:$20 sps:$4 sm:$0xff]   ;;  %v11197_v23 = vld [vmem:[%s16408_s3 + $0x1ec] ss:$20 sps:$4 sm:$0xff]   ;;  %v11195_v25 = vld [vmem:[%s16408_s3 + $0x1e8] ss:$20 sps:$4 sm:$0xff]  }
 0x175   : > { %10338 = vmatpush3.bf16.msra.mxu0 %v11142_v42  ;;  %2360 = vmatpush1.bf16.msra.mxu1 %v11139_v41  ;;  %v11200_v26 = vld [vmem:[%s16408_s3 + $0xcc] ss:$20 sps:$4 sm:$0xff]   ;;  %v11203_v27 = vld [vmem:[%s16408_s3 + $0x214] ss:$20 sps:$4 sm:$0xff]   ;;  %v11201_v29 = vld [vmem:[%s16408_s3 + $0x210] ss:$20 sps:$4 sm:$0xff]  }
 0x176   : > { %1869 = vmatprep.mubr.bf16.mxu0 %v1215_v7  ;;  %10339 = vmatprep.subr.bf16.mxu0 %v11143_v45  ;;  %v11173_v7 = vld [vmem:[%s16408_s3 + $0x14c] ss:$20 sps:$4 sm:$0xff]   ;;  %v11198_v28 = vld [vmem:[%s16408_s3 + $0xc8] ss:$20 sps:$4 sm:$0xff]   ;;  %v11204_v32 = vld [vmem:[%s16408_s3 + $0xf0] ss:$20 sps:$4 sm:$0xff]  }
 0x177   : > { %2361 = vmatprep.subr.bf16.mxu1 %v11146_v48  ;;  %2387 = vmatprep.mubr.bf16.mxu1 %v12768_v9  ;;  %v11206_v30 = vld [vmem:[%s16408_s3 + $0xf4] ss:$20 sps:$4 sm:$0xff]   ;;  %v11209_v31 = vld [vmem:[%s16408_s3 + $0x23c] ss:$20 sps:$4 sm:$0xff]   ;;  %v11207_v33 = vld [vmem:[%s16408_s3 + $0x238] ss:$20 sps:$4 sm:$0xff]  }
 0x178   : > { %v11212_v34 = vld [vmem:[%s16408_s3 + $0x11c] ss:$20 sps:$4 sm:$0xff]   ;;  %v11215_v36 = vld [vmem:[%s16408_s3 + $0x264] ss:$20 sps:$4 sm:$0xff]   ;;  %v11213_v42 = vld [vmem:[%s16408_s3 + $0x260] ss:$20 sps:$4 sm:$0xff]  }
 0x179   : > { %10340 = vmatpush3.bf16.msra.mxu0 %v11147_v51  ;;  %2362 = vmatpush1.bf16.msra.mxu1 %v11144_v50  ;;  %v11210_v41 = vld [vmem:[%s16408_s3 + $0x118] ss:$20 sps:$4 sm:$0xff]   ;;  %v11216_v45 = vld [vmem:[%s16408_s3 + $0x140] ss:$20 sps:$4 sm:$0xff]   ;;  %v11221_v51 = vld [vmem:[%s16408_s3 + $0x168] ss:$20 sps:$4 sm:$0xff]  }
 0x17a   : > { %10341 = vmatprep.subr.bf16.mxu0 %v11148_v52  ;;  %2363 = vmatprep.subr.bf16.mxu1 %v11151_v53  ;;  %v11218_v43 = vld [vmem:[%s16408_s3 + $0x144] ss:$20 sps:$4 sm:$0xff]   ;;  %v11223_v48 = vld [vmem:[%s16408_s3 + $0x16c] ss:$20 sps:$4 sm:$0xff]   ;;  %v11228_v53 = vld [vmem:[%s16408_s3 + $0x194] ss:$20 sps:$4 sm:$0xff]  }
 0x17b   : > { %v11224_v50 = vld [vmem:[%s16408_s3 + $0x178] ss:$20 sps:$4 sm:$0xff]  }
 0x17c   : > { %v11225_v52 = vld [vmem:[%s16408_s3 + $0x38] ss:$20 sps:$4 sm:$0xff]  }
 0x17d   : > { %10342 = vmatpush3.bf16.msra.mxu0 %v11152_v55  ;;  %2364 = vmatpush1.bf16.msra.mxu1 %v11149_v54  ;;  %v11229_v54 = vld [vmem:[%s16408_s3 + $0x1a0] ss:$20 sps:$4 sm:$0xff]   ;;  %v11226_v55 = vld [vmem:[%s16408_s3 + $0x190] ss:$20 sps:$4 sm:$0xff]  }
 0x17e   : > { %10343 = vmatprep.subr.bf16.mxu0 %v11153_v56  ;;  %2365 = vmatprep.subr.bf16.mxu1 %v11156_v57  ;;  %v11230_v56 = vld [vmem:[%s16408_s3 + $0x60] ss:$20 sps:$4 sm:$0xff]   ;;  %v11233_v57 = vld [vmem:[%s16408_s3 + $0x1bc] ss:$20 sps:$4 sm:$0xff]  }
 0x181   : > { %10344 = vmatpush3.bf16.msra.mxu0 %v11157_v59  ;;  %2366 = vmatpush1.bf16.msra.mxu1 %v11154_v58  ;;  %v11234_v58 = vld [vmem:[%s16408_s3 + $0x1c8] ss:$20 sps:$4 sm:$0xff]   ;;  %v11231_v59 = vld [vmem:[%s16408_s3 + $0x1b8] ss:$20 sps:$4 sm:$0xff]  }
 0x182   : > { %10345 = vmatprep.subr.bf16.mxu0 %v11158_v60  ;;  %2367 = vmatprep.subr.bf16.mxu1 %v11161_v61  ;;  %v11235_v60 = vld [vmem:[%s16408_s3 + $0x88] ss:$20 sps:$4 sm:$0xff]   ;;  %v11238_v61 = vld [vmem:[%s16408_s3 + $0x1e4] ss:$20 sps:$4 sm:$0xff]  }
 0x185   : > { %10346 = vmatpush3.bf16.msra.mxu0 %v11162_v63  ;;  %2368 = vmatpush1.bf16.msra.mxu1 %v11159_v62  ;;  %v11239_v62 = vld [vmem:[%s16408_s3 + $0x1f0] ss:$20 sps:$4 sm:$0xff]   ;;  %v11236_v63 = vld [vmem:[%s16408_s3 + $0x1e0] ss:$20 sps:$4 sm:$0xff]  }
 0x186   : > { %10347 = vmatprep.subr.bf16.mxu0 %v11163_v0  ;;  %2369 = vmatprep.subr.bf16.mxu1 %v11166_v1  ;;  %v11243_v0 = vld [vmem:[%s16408_s3 + $0x20c] ss:$20 sps:$4 sm:$0xff]  }
 0x187   : > { %v11244_v1 = vld [vmem:[%s16408_s3 + $0x218] ss:$20 sps:$4 sm:$0xff]  }
 0x189   : > { %10348 = vmatpush3.bf16.msra.mxu0 %v11167_v4  ;;  %2370 = vmatpush1.bf16.msra.mxu1 %v11164_v2  ;;  %v11241_v2 = vld [vmem:[%s16408_s3 + $0x208] ss:$20 sps:$4 sm:$0xff]   ;;  %v11245_v4 = vld [vmem:[%s16408_s3 + $0xd8] ss:$20 sps:$4 sm:$0xff]  }
 0x18a   : > { %2302 = vmatprep.subr.bf16.mxu0 %v11170_v5  ;;  %2371 = vmatprep.subr.bf16.mxu1 %v11173_v7  ;;  %v11248_v5 = vld [vmem:[%s16408_s3 + $0x234] ss:$20 sps:$4 sm:$0xff]  }
 0x18b   : > { %v11249_v7 = vld [vmem:[%s16408_s3 + $0x240] ss:$20 sps:$4 sm:$0xff]  }
 0x18c   : > { %1870 = vmatmul.mubr.bf16.vlgmr.msra.gmra.mrb[16].mxu0 %v12758_v3  ;;  %v11180_v3 = vld [vmem:[%s16408_s3 + $0x50] ss:$20 sps:$4 sm:$0xff]  }
 0x18d   : > { %1877 = vmatprep.mubr.bf16.mxu0 %v12805_v47  ;;  %2303 = vmatpush1.bf16.msra.mxu0 %v11168_v8  ;;  %v11220_v47 = vld [vmem:[%s16408_s3 + $0x10] ss:$20 sps:$4 sm:$0xff]  }
 0x18e   : > { %2372 = vmatpush1.bf16.msra.mxu1 %v11171_v10  ;;  %2304 = vmatprep.subr.bf16.mxu0 %v11176_v11  ;;  %v11246_v8 = vld [vmem:[%s16408_s3 + $0x230] ss:$20 sps:$4 sm:$0xff]   ;;  %v11250_v10 = vld [vmem:[%s16408_s3 + $0x100] ss:$20 sps:$4 sm:$0xff]  }
 0x18f   : > { %2373 = vmatprep.subr.bf16.mxu1 %v11179_v12  ;;  %v11253_v11 = vld [vmem:[%s16408_s3 + $0x25c] ss:$20 sps:$4 sm:$0xff]  }
 0x190   : > { %v11254_v12 = vld [vmem:[%s16408_s3 + $0x268] ss:$20 sps:$4 sm:$0xff]  }
 0x191   : > { %2305 = vmatpush1.bf16.msra.mxu0 %v11174_v13  ;;  %v11251_v13 = vld [vmem:[%s16408_s3 + $0x258] ss:$20 sps:$4 sm:$0xff]  }
 0x192   : > { %2374 = vmatpush1.bf16.msra.mxu1 %v11177_v14  ;;  %2306 = vmatprep.subr.bf16.mxu0 %v11182_v15  ;;  %v11255_v14 = vld [vmem:[%s16408_s3 + $0x128] ss:$20 sps:$4 sm:$0xff]   ;;  %v13074_v15 = vld [vmem:[%s16406_s1 + $0x4] ss:$8 sps:$4 sm:$0xff]  }
 0x193   : > { %2375 = vmatprep.subr.bf16.mxu1 %v11185_v16  ;;  %v13084_v16 = vld [vmem:[%s16406_s1] ss:$8 sps:$4 sm:$0xff]  }
 0x194   : > { %1878 = vmatmul.mubr.bf16.gmra.mrb[20].mxu0 %v12798_v44  ;;  %v11219_v44 = vld [vmem:[%s16408_s3 + $0x150] ss:$20 sps:$4 sm:$0xff]  }
 0x195   : > { %2307 = vmatpush1.bf16.msra.mxu0 %v11180_v3  ;;  %2334 = vmatprep.mubr.bf16.mxu0 %v12768_v9  ;;  %v13088_v3 = vld [vmem:[%s12328_s27 + $0x20] sm:$0xff] }
 0x196   : > { %2376 = vmatpush1.bf16.msra.mxu1 %v11183_v17  ;;  %2308 = vmatprep.subr.bf16.mxu0 %v11188_v18  ;;  %v13091_v17 = vld [vmem:[%s12328_s27 + $0xa0] sm:$0xff]  ;;  %v13096_v18 = vld [vmem:[%s16406_s1 + $0x14] ss:$8 sps:$4 sm:$0xff]  }
 0x197   : > { %2377 = vmatprep.subr.bf16.mxu1 %v11191_v19  ;;  %v13110_v19 = vld [vmem:[%s16406_s1 + $0x24] ss:$8 sps:$4 sm:$0xff]  }
 0x199   : > { %2309 = vmatpush1.bf16.msra.mxu0 %v11186_v20  ;;  %v13118_v20 = vld [vmem:[%s16406_s1 + $0x20] ss:$8 sps:$4 sm:$0xff]  }
 0x19a   : > { %2378 = vmatpush1.bf16.msra.mxu1 %v11189_v21  ;;  %2310 = vmatprep.subr.bf16.mxu0 %v11194_v22  ;;  %v13124_v21 = vld [vmem:[%s16406_s1 + $0x34] ss:$8 sps:$4 sm:$0xff]   ;;  %v13130_v22 = vld [vmem:[%s16406_s1 + $0x30] ss:$8 sps:$4 sm:$0xff]  }
 0x19b   : > { %2379 = vmatprep.subr.bf16.mxu1 %v11197_v23  ;;  %v13142_v23 = vld [vmem:[%s16406_s1 + $0x40] ss:$8 sps:$4 sm:$0xff]  }
 0x19d   : > { %2311 = vmatpush1.bf16.msra.mxu0 %v11192_v24  ;;  %v13148_v24 = vld [vmem:[%s16406_s1 + $0x54] ss:$8 sps:$4 sm:$0xff]  }
 0x19e   : > { %2380 = vmatpush1.bf16.msra.mxu1 %v11195_v25  ;;  %2312 = vmatprep.subr.bf16.mxu0 %v11200_v26  ;;  %v13154_v25 = vld [vmem:[%s16406_s1 + $0x50] ss:$8 sps:$4 sm:$0xff]   ;;  %v13160_v26 = vld [vmem:[%s16406_s1 + $0x64] ss:$8 sps:$4 sm:$0xff]  }
 0x19f   : > { %2381 = vmatprep.subr.bf16.mxu1 %v11203_v27  ;;  %v13166_v27 = vld [vmem:[%s16406_s1 + $0x60] ss:$8 sps:$4 sm:$0xff]  }
 0x1a1   : > { %2313 = vmatpush1.bf16.msra.mxu0 %v11198_v28  ;;  %v13172_v28 = vld [vmem:[%s16406_s1 + $0x74] ss:$8 sps:$4 sm:$0xff]  }
 0x1a2   : > { %2382 = vmatpush1.bf16.msra.mxu1 %v11201_v29  ;;  %2314 = vmatprep.subr.bf16.mxu0 %v11206_v30  ;;  %v13178_v29 = vld [vmem:[%s16406_s1 + $0x70] ss:$8 sps:$4 sm:$0xff]   ;;  %v13184_v30 = vld [vmem:[%s16406_s1 + $0x84] ss:$8 sps:$4 sm:$0xff]  }
 0x1a3   : > { %2383 = vmatprep.subr.bf16.mxu1 %v11209_v31  ;;  %v13190_v31 = vld [vmem:[%s16406_s1 + $0x80] ss:$8 sps:$4 sm:$0xff]  }
 0x1a5   : > { %2315 = vmatpush1.bf16.msra.mxu0 %v11204_v32  ;;  %v13196_v32 = vld [vmem:[%s16406_s1 + $0x94] ss:$8 sps:$4 sm:$0xff]  }
 0x1a6   : > { %2384 = vmatpush1.bf16.msra.mxu1 %v11207_v33  ;;  %2316 = vmatprep.subr.bf16.mxu0 %v11212_v34  ;;  %v13202_v33 = vld [vmem:[%s16406_s1 + $0x90] ss:$8 sps:$4 sm:$0xff]   ;;  %v13208_v34 = vld [vmem:[%s16406_s1 + $0xa4] ss:$8 sps:$4 sm:$0xff]  }
 0x1a7   : > { %2385 = vmatprep.subr.bf16.mxu1 %v11215_v36  ;;  %v13214_v36 = vld [vmem:[%s16406_s1 + $0xa0] ss:$8 sps:$4 sm:$0xff]  }
 0x1a9   : > { %2317 = vmatpush1.bf16.msra.mxu0 %v11210_v41  ;;  %v13220_v41 = vld [vmem:[%s16406_s1 + $0xb4] ss:$8 sps:$4 sm:$0xff]  }
 0x1aa   : > { %2386 = vmatpush1.bf16.msra.mxu1 %v11213_v42  ;;  %2318 = vmatprep.subr.bf16.mxu0 %v11218_v43  ;;  %v13226_v42 = vld [vmem:[%s16406_s1 + $0xb0] ss:$8 sps:$4 sm:$0xff]   ;;  %v13232_v43 = vld [vmem:[%s16406_s1 + $0xc4] ss:$8 sps:$4 sm:$0xff]  }
 0x1ab   : > { %10361 = vmatprep.subr.bf16.mxu1 %v11219_v44  ;;  %v13238_v44 = vld [vmem:[%s16406_s1 + $0xc0] ss:$8 sps:$4 sm:$0xff]  }
 0x1ad   : > { %2388 = vmatmul.mubr.bf16.vlgmr.msra.gmra.mrb[8].mxu1 %v12766_v6  ;;  %2319 = vmatpush1.bf16.msra.mxu0 %v11216_v45  ;;  %v13244_v45 = vld [vmem:[%s16406_s1 + $0xd4] ss:$8 sps:$4 sm:$0xff]  }
 0x1ae   : > { %10362 = vmatpush3.bf16.msra.mxu1 %v11220_v47  ;;  %2320 = vmatprep.subr.bf16.mxu0 %v11223_v48  ;;  %v13250_v47 = vld [vmem:[%s16406_s1 + $0xd0] ss:$8 sps:$4 sm:$0xff]   ;;  %v13256_v48 = vld [vmem:[%s16406_s1 + $0xe4] ss:$8 sps:$4 sm:$0xff]  }
 0x1af   : > { %10363 = vmatprep.subr.bf16.mxu1 %v11224_v50  ;;  %2397 = vmatprep.mubr.bf16.mxu1 %v12810_v49  ;;  %v13262_v50 = vld [vmem:[%s16406_s1 + $0xe0] ss:$8 sps:$4 sm:$0xff]  }
 0x1b1   : > { %2321 = vmatpush1.bf16.msra.mxu0 %v11221_v51  ;;  %v13268_v51 = vld [vmem:[%s16406_s1 + $0xf4] ss:$8 sps:$4 sm:$0xff]  }
 0x1b2   : > { %10364 = vmatpush3.bf16.msra.mxu1 %v11225_v52  ;;  %2322 = vmatprep.subr.bf16.mxu0 %v11228_v53  ;;  %v2461_v52 = vld [vmem:[%s12328_s27 + $0x120] sm:$0xff] }
 0x1b3   : > { %10365 = vmatprep.subr.bf16.mxu1 %v11229_v54  ;;  %v2463_v53 = vld [vmem:[%s12328_s27 + $0x1a0] sm:$0xff]  ;;  %v9134_v54 = vcombine.low %v13088_v3, %v13091_v17 }
 0x1b5   : > { %2398 = vmatmul.mubr.bf16.gmra.mrb[12].mxu1 %v12803_v46  ;;  %2323 = vmatpush1.bf16.msra.mxu0 %v11226_v55  ;;  %v13278_v55 = vld [vmem:[%s16406_s1 + $0xf0] ss:$8 sps:$4 sm:$0xff]  }
 0x1b6   : > { %10366 = vmatpush3.bf16.msra.mxu1 %v11230_v56  ;;  %2440 = vmatprep.mubr.bf16.mxu1 %v12768_v9  ;;  %v11240_v9 = vld [vmem:[%s16408_s3 + $0xb0] ss:$20 sps:$4 sm:$0xff]   ;;  %v9139_v56 = vcombine.high %v2461_v52, %v2463_v53 }
 0x1b7   : > { %2324 = vmatprep.subr.bf16.mxu0 %v11233_v57  ;;  %10367 = vmatprep.subr.bf16.mxu1 %v11234_v58  ;;  %v13284_v57 = vld [vmem:[%s16406_s1 + $0x104] ss:$8 sps:$4 sm:$0xff]   ;;  %v13290_v58 = vld [vmem:[%s16406_s1 + $0x100] ss:$8 sps:$4 sm:$0xff]  }
 0x1b9   : > { %2325 = vmatpush1.bf16.msra.mxu0 %v11231_v59  ;;  %v13296_v59 = vld [vmem:[%s16406_s1 + $0x114] ss:$8 sps:$4 sm:$0xff]  }
 0x1ba   : > { %10368 = vmatpush3.bf16.msra.mxu1 %v11235_v60  ;;  %2326 = vmatprep.subr.bf16.mxu0 %v11238_v61  ;;  %v13300_v60 = vld [vmem:[%s12328_s27 + $0x28] sm:$0xff] }
 0x1bb   : > { %10369 = vmatprep.subr.bf16.mxu1 %v11239_v62  ;;  %v13303_v61 = vld [vmem:[%s12328_s27 + $0xa8] sm:$0xff]  ;;  %v9138_v62 = vcombine.low %v2461_v52, %v2463_v53  ;;  %v13406_v53 = vld [vmem:[%s16406_s1 + $0x194] ss:$8 sps:$4 sm:$0xff]  }
 0x1bc   : > { %v11258_v52 = vld [vmem:[%s16408_s3 + $0x50c] ss:$20 sps:$4 sm:$0xff]   ;;  %16498 = vst [vmem:[#allocation13_spill] sm:$0xff] %v13406_v53 }
 0x1bd   : > { %2327 = vmatpush1.bf16.msra.mxu0 %v11236_v63  ;;  %v13308_v63 = vld [vmem:[%s16406_s1 + $0x110] ss:$8 sps:$4 sm:$0xff]  }
 0x1be   : > { %10370 = vmatpush3.bf16.msra.mxu1 %v11240_v9  ;;  %2328 = vmatprep.subr.bf16.mxu0 %v11243_v0  ;;  %v9137_v9 = vcombine.high %v13300_v60, %v13303_v61  ;;  %v13316_v0 = vld [vmem:[%s16406_s1 + $0x124] ss:$8 sps:$4 sm:$0xff]  }
 0x1bf   : > { %10371 = vmatprep.subr.bf16.mxu1 %v11244_v1  ;;  %v13322_v1 = vld [vmem:[%s16406_s1 + $0x120] ss:$8 sps:$4 sm:$0xff]  }
 0x1c1   : > { %2329 = vmatpush1.bf16.msra.mxu0 %v11241_v2  ;;  %v13328_v2 = vld [vmem:[%s16406_s1 + $0x134] ss:$8 sps:$4 sm:$0xff]  }
 0x1c2   : > { %10372 = vmatpush3.bf16.msra.mxu1 %v11245_v4  ;;  %2330 = vmatprep.subr.bf16.mxu0 %v11248_v5  ;;  %v13334_v4 = vld [vmem:[%s16406_s1 + $0x130] ss:$8 sps:$4 sm:$0xff]   ;;  %v13340_v5 = vld [vmem:[%s16406_s1 + $0x144] ss:$8 sps:$4 sm:$0xff]  }
 0x1c3   : > { %10373 = vmatprep.subr.bf16.mxu1 %v11249_v7  ;;  %v13346_v7 = vld [vmem:[%s16406_s1 + $0x140] ss:$8 sps:$4 sm:$0xff]  }
 0x1c5   : > { %2331 = vmatpush1.bf16.msra.mxu0 %v11246_v8  ;;  %v13352_v8 = vld [vmem:[%s16406_s1 + $0x154] ss:$8 sps:$4 sm:$0xff]  }
 0x1c6   : > { %10374 = vmatpush3.bf16.msra.mxu1 %v11250_v10  ;;  %2332 = vmatprep.subr.bf16.mxu0 %v11253_v11  ;;  %v13358_v10 = vld [vmem:[%s16406_s1 + $0x150] ss:$8 sps:$4 sm:$0xff]   ;;  %v13364_v11 = vld [vmem:[%s16406_s1 + $0x164] ss:$8 sps:$4 sm:$0xff]  }
 0x1c7   : > { %10375 = vmatprep.subr.bf16.mxu1 %v11254_v12  ;;  %16491 = vst [vmem:[#allocation6_spill] sm:$0xff] %v13358_v10  ;;  %16492 = vst [vmem:[#allocation7_spill] sm:$0xff] %v13364_v11  ;;  %v13370_v12 = vld [vmem:[%s16406_s1 + $0x160] ss:$8 sps:$4 sm:$0xff]  }
 0x1c8   : > { %16493 = vst [vmem:[#allocation8_spill] sm:$0xff] %v13370_v12 }
 0x1c9   : > { %2333 = vmatpush1.bf16.msra.mxu0 %v11251_v13  ;;  %v13376_v13 = vld [vmem:[%s16406_s1 + $0x174] ss:$8 sps:$4 sm:$0xff]  }
 0x1ca   : > { %10376 = vmatpush3.bf16.msra.mxu1 %v11255_v14  ;;  %2505 = vmatprep.subr.bf16.mxu0 %v13074_v15  ;;  %16494 = vst [vmem:[#allocation9_spill] sm:$0xff] %v13376_v13  ;;  %v13382_v14 = vld [vmem:[%s16406_s1 + $0x170] ss:$8 sps:$4 sm:$0xff]  }
 0x1cb   : > { %16495 = vst [vmem:[#allocation10_spill] sm:$0xff] %v13382_v14  ;;  %3189 = vmatprep.subr.bf16.mxu1 %v11258_v52  ;;  %v11268_v52 = vld [vmem:[%s16408_s3 + $0x558] ss:$20 sps:$4 sm:$0xff]  }
 0x1cc   : > { %2335 = vmatmul.mubr.bf16.vlgmr.msra.gmra.mrb[8].mxu0 %v12766_v6 }
 0x1cd   : > { %2441 = vmatmul.mubr.bf16.vlgmr.msra.gmra.mrb[16].mxu1 %v12766_v6  ;;  %2344 = vmatprep.mubr.bf16.mxu0 %v12810_v49  ;;  %v9135_v6 = vcombine.high %v13088_v3, %v13091_v17  ;;  %v13388_v3 = vld [vmem:[%s16406_s1 + $0x184] ss:$8 sps:$4 sm:$0xff]   ;;  %v13394_v17 = vld [vmem:[%s16406_s1 + $0x180] ss:$8 sps:$4 sm:$0xff]  }
 0x1ce   : > { %2448 = vmatprep.mubr.bf16.mxu1 %v12810_v49  ;;  %2506 = vmatpush1.bf16.msra.mxu0 %v13084_v16  ;;  %v13104_v49 = vld [vmem:[%s16406_s1 + $0x10] ss:$8 sps:$4 sm:$0xff]   ;;  %16496 = vst [vmem:[#allocation11_spill] sm:$0xff] %v13388_v3  ;;  %16497 = vst [vmem:[#allocation12_spill] sm:$0xff] %v13394_v17 }
 0x1cf   : > { %2507 = vmatprep.subr.bf16.mxu0 %v13096_v18 }
 0x1d2   : > { %2508 = vmatpush1.bf16.msra.mxu0 %v13104_v49 }
 0x1d3   : > { %2509 = vmatprep.subr.bf16.mxu0 %v13110_v19 }
 0x1d4   : > { %2345 = vmatmul.mubr.bf16.gmra.mrb[12].mxu0 %v12803_v46 }
 0x1d5   : > { %2449 = vmatmul.mubr.bf16.gmra.mrb[20].mxu1 %v12803_v46  ;;  %2537 = vmatprep.mubr.bf16.mxu0 %v9135_v6  ;;  %v13136_v46 = vld [vmem:[%s16406_s1 + $0x44] ss:$8 sps:$4 sm:$0xff]   ;;  %v11256_v6 = vld [vmem:[%s16408_s3 + $0x508] ss:$20 sps:$4 sm:$0xff]  }
 0x1d6   : > { %2510 = vmatpush1.bf16.msra.mxu0 %v13118_v20  ;;  %3190 = vmatpush1.bf16.msra.mxu1 %v11256_v6  ;;  %v13427_v6 = vld [vmem:[%s16406_s1 + $0x1a4] ss:$8 sps:$4 sm:$0xff]  }
 0x1d7   : > { %2511 = vmatprep.subr.bf16.mxu0 %v13124_v21  ;;  %16500 = vst [vmem:[#allocation15_spill] sm:$0xff] %v13427_v6 }
 0x1da   : > { %2512 = vmatpush1.bf16.msra.mxu0 %v13130_v22 }
 0x1db   : > { %2513 = vmatprep.subr.bf16.mxu0 %v13136_v46 }
 0x1de   : > { %2514 = vmatpush1.bf16.msra.mxu0 %v13142_v23 }
 0x1df   : > { %2515 = vmatprep.subr.bf16.mxu0 %v13148_v24 }
 0x1e2   : > { %2516 = vmatpush1.bf16.msra.mxu0 %v13154_v25 }
 0x1e3   : > { %2517 = vmatprep.subr.bf16.mxu0 %v13160_v26 }
 0x1e6   : > { %2518 = vmatpush1.bf16.msra.mxu0 %v13166_v27 }
 0x1e7   : > { %2519 = vmatprep.subr.bf16.mxu0 %v13172_v28 }
 0x1ea   : > { %2520 = vmatpush1.bf16.msra.mxu0 %v13178_v29 }
 0x1eb   : > { %2521 = vmatprep.subr.bf16.mxu0 %v13184_v30 }
 0x1ee   : > { %2522 = vmatpush1.bf16.msra.mxu0 %v13190_v31 }
 0x1ef   : > { %2523 = vmatprep.subr.bf16.mxu0 %v13196_v32 }
 0x1f2   : > { %2524 = vmatpush1.bf16.msra.mxu0 %v13202_v33 }
 0x1f3   : > { %2525 = vmatprep.subr.bf16.mxu0 %v13208_v34 }
 0x1f6   : > { %2526 = vmatpush1.bf16.msra.mxu0 %v13214_v36 }
 0x1f7   : > { %2527 = vmatprep.subr.bf16.mxu0 %v13220_v41 }
 0x1fa   : > { %2528 = vmatpush1.bf16.msra.mxu0 %v13226_v42 }
 0x1fb   : > { %2529 = vmatprep.subr.bf16.mxu0 %v13232_v43 }
 0x1fe   : > { %2530 = vmatpush1.bf16.msra.mxu0 %v13238_v44 }
 0x1ff   : > { %2531 = vmatprep.subr.bf16.mxu0 %v13244_v45 }
 0x202   : > { %2532 = vmatpush1.bf16.msra.mxu0 %v13250_v47 }
 0x203   : > { %2533 = vmatprep.subr.bf16.mxu0 %v13256_v48 }
 0x206   : > { %2534 = vmatpush1.bf16.msra.mxu0 %v13262_v50 }
 0x207   : > { %2535 = vmatprep.subr.bf16.mxu0 %v13268_v51 }
 0x20a   : > { %2536 = vmatpush1.bf16.msra.mxu0 %v13278_v55 }
 0x20b   : > { %2558 = vmatprep.subr.bf16.mxu0 %v13284_v57 }
 0x20d   : > { %2538 = vmatmul.mubr.bf16.vlgmr.msra.gmra.mrb[24].mxu0 %v9134_v54  ;;  %v11264_v54 = vld [vmem:[%s16408_s3 + $0x534] ss:$20 sps:$4 sm:$0xff]  }
 0x20e   : > { %2559 = vmatpush1.bf16.msra.mxu0 %v13290_v58  ;;  %2547 = vmatprep.mubr.bf16.mxu0 %v9139_v56  ;;  %v11262_v56 = vld [vmem:[%s16408_s3 + $0x530] ss:$20 sps:$4 sm:$0xff]  }
 0x20f   : > { %2560 = vmatprep.subr.bf16.mxu0 %v13296_v59  ;;  %3191 = vmatprep.subr.bf16.mxu1 %v11264_v54  ;;  %v13436_v54 = vld [vmem:[%s16406_s1 + $0x1a0] ss:$8 sps:$4 sm:$0xff]  }
 0x210   : > { %3192 = vmatpush1.bf16.msra.mxu1 %v11262_v56  ;;  %16501 = vst [vmem:[#allocation16_spill] sm:$0xff] %v13436_v54  ;;  %v13445_v56 = vld [vmem:[%s16406_s1 + $0x1b4] ss:$8 sps:$4 sm:$0xff]  }
 0x211   : > { %16502 = vst [vmem:[#allocation17_spill] sm:$0xff] %v13445_v56 }
 0x212   : > { %2561 = vmatpush1.bf16.msra.mxu0 %v13308_v63 }
 0x213   : > { %2562 = vmatprep.subr.bf16.mxu0 %v13316_v0 }
 0x215   : > { %2548 = vmatmul.mubr.bf16.gmra.mrb[28].mxu0 %v9138_v62  ;;  %v13418_v62 = vld [vmem:[%s16406_s1 + $0x190] ss:$8 sps:$4 sm:$0xff]  }
 0x216   : > { %2563 = vmatpush1.bf16.msra.mxu0 %v13322_v1  ;;  %2590 = vmatprep.mubr.bf16.mxu0 %v9137_v9  ;;  %16499 = vst [vmem:[#allocation14_spill] sm:$0xff] %v13418_v62  ;;  %v11270_v9 = vld [vmem:[%s16408_s3 + $0x55c] ss:$20 sps:$4 sm:$0xff]  }
 0x217   : > { %2564 = vmatprep.subr.bf16.mxu0 %v13328_v2  ;;  %3193 = vmatprep.subr.bf16.mxu1 %v11270_v9  ;;  %v13454_v9 = vld [vmem:[%s16406_s1 + $0x1b0] ss:$8 sps:$4 sm:$0xff]  }
 0x218   : > { %3194 = vmatpush1.bf16.msra.mxu1 %v11268_v52  ;;  %16503 = vst [vmem:[#allocation18_spill] sm:$0xff] %v13454_v9  ;;  %v13463_v52 = vld [vmem:[%s16406_s1 + $0x1c4] ss:$8 sps:$4 sm:$0xff]  }
 0x219   : > { %3195 = vmatprep.subr.bf16.mxu1 %v11276_v38  ;;  %16504 = vst [vmem:[#allocation19_spill] sm:$0xff] %v13463_v52  ;;  %v13472_v38 = vld [vmem:[%s16406_s1 + $0x1c0] ss:$8 sps:$4 sm:$0xff]  }
 0x21a   : > { %2565 = vmatpush1.bf16.msra.mxu0 %v13334_v4  ;;  %16505 = vst [vmem:[#allocation20_spill] sm:$0xff] %v13472_v38 }
 0x21b   : > { %2566 = vmatprep.subr.bf16.mxu0 %v13340_v5 }
 0x21c   : > { %3196 = vmatpush1.bf16.msra.mxu1 %v11274_v37  ;;  %v13481_v37 = vld [vmem:[%s16406_s1 + $0x1d4] ss:$8 sps:$4 sm:$0xff]  }
 0x21d   : > { %3197 = vmatprep.subr.bf16.mxu1 %v11282_v35  ;;  %16506 = vst [vmem:[#allocation21_spill] sm:$0xff] %v13481_v37  ;;  %v13490_v35 = vld [vmem:[%s16406_s1 + $0x1d0] ss:$8 sps:$4 sm:$0xff]  }
 0x21e   : > { %2567 = vmatpush1.bf16.msra.mxu0 %v13346_v7  ;;  %16507 = vst [vmem:[#allocation22_spill] sm:$0xff] %v13490_v35 }
 0x21f   : > { %2568 = vmatprep.subr.bf16.mxu0 %v13352_v8 }
 0x222   : > { %2569 = vmatpush1.bf16.msra.mxu0 %v13358_v10 }
 0x223   : > { %2570 = vmatprep.subr.bf16.mxu0 %v13364_v11 }
 0x226   : > { %2571 = vmatpush1.bf16.msra.mxu0 %v13370_v12 }
 0x227   : > { %2572 = vmatprep.subr.bf16.mxu0 %v13376_v13  ;;  %v11348_v13 = vld [vmem:[%s16408_s3 + $0x764] ss:$20 sps:$4 sm:$0xff]  }
 0x22a   : > { %2573 = vmatpush1.bf16.msra.mxu0 %v13382_v14 }
 0x22b   : > { %2574 = vmatprep.subr.bf16.mxu0 %v13388_v3 }
 0x22e   : > { %2575 = vmatpush1.bf16.msra.mxu0 %v13394_v17  ;;  %v11303_v17 = vld [vmem:[%s16408_s3 + $0x61c] ss:$20 sps:$4 sm:$0xff]  }
 0x22f   : > { %2576 = vmatprep.subr.bf16.mxu0 %v13406_v53  ;;  %v11259_v53 = vld [vmem:[%s16408_s3 + $0x500] ss:$20 sps:$4 sm:$0xff]  }
 0x232   : > { %2577 = vmatpush1.bf16.msra.mxu0 %v13418_v62  ;;  %v13533_v62 = vld [vmem:[%s16406_s1 + $0x1f0] ss:$8 sps:$4 sm:$0xff]  }
 0x233   : > { %2578 = vmatprep.subr.bf16.mxu0 %v13427_v6  ;;  %v11261_v6 = vld [vmem:[%s16408_s3 + $0x504] ss:$20 sps:$4 sm:$0xff]   ;;  %16511 = vst [vmem:[#allocation26_spill] sm:$0xff] %v13533_v62 }
 0x236   : > { %2579 = vmatpush1.bf16.msra.mxu0 %v13436_v54  ;;  %v2464_v54 = vld [vmem:[%s12328_s27 + $0x1a8] sm:$0xff] }
 0x237   : > { %2580 = vmatprep.subr.bf16.mxu0 %v13445_v56  ;;  %v11280_v56 = vld [vmem:[%s16408_s3 + $0x5a8] ss:$20 sps:$4 sm:$0xff]  }
 0x238   : > { %3198 = vmatpush1.bf16.msra.mxu1 %v11280_v56  ;;  %v13499_v56 = vld [vmem:[%s16406_s1 + $0x1e4] ss:$8 sps:$4 sm:$0xff]  }
 0x239   : > { %16508 = vst [vmem:[#allocation23_spill] sm:$0xff] %v13499_v56 }
 0x23a   : > { %2581 = vmatpush1.bf16.msra.mxu0 %v13454_v9  ;;  %v11288_v9 = vld [vmem:[%s16408_s3 + $0x5d4] ss:$20 sps:$4 sm:$0xff]  }
 0x23b   : > { %2582 = vmatprep.subr.bf16.mxu0 %v13463_v52  ;;  %v11286_v52 = vld [vmem:[%s16408_s3 + $0x5d0] ss:$20 sps:$4 sm:$0xff]   ;;  %3199 = vmatprep.subr.bf16.mxu1 %v11288_v9  ;;  %v13508_v9 = vld [vmem:[%s16406_s1 + $0x1e0] ss:$8 sps:$4 sm:$0xff]  }
 0x23c   : > { %3200 = vmatpush1.bf16.msra.mxu1 %v11286_v52  ;;  %16509 = vst [vmem:[#allocation24_spill] sm:$0xff] %v13508_v9  ;;  %v13517_v52 = vld [vmem:[%s16406_s1 + $0x1f4] ss:$8 sps:$4 sm:$0xff]  }
 0x23d   : > { %16510 = vst [vmem:[#allocation25_spill] sm:$0xff] %v13517_v52 }
 0x23e   : > { %2583 = vmatpush1.bf16.msra.mxu0 %v13472_v38  ;;  %v11294_v38 = vld [vmem:[%s16408_s3 + $0x5fc] ss:$20 sps:$4 sm:$0xff]  }
 0x23f   : > { %2584 = vmatprep.subr.bf16.mxu0 %v13481_v37  ;;  %v11292_v37 = vld [vmem:[%s16408_s3 + $0x5f8] ss:$20 sps:$4 sm:$0xff]   ;;  %3201 = vmatprep.subr.bf16.mxu1 %v11294_v38  ;;  %v9136_v38 = vcombine.low %v13300_v60, %v13303_v61 }
 0x240   : > { %3202 = vmatpush1.bf16.msra.mxu1 %v11292_v37  ;;  %v11267_v60 = vld [vmem:[%s16408_s3 + $0x52c] ss:$20 sps:$4 sm:$0xff]   ;;  %v11304_v37 = vld [vmem:[%s16408_s3 + $0x648] ss:$20 sps:$4 sm:$0xff]  }
 0x241   : > { %v11306_v61 = vld [vmem:[%s16408_s3 + $0x64c] ss:$20 sps:$4 sm:$0xff]  }
 0x242   : > { %2585 = vmatpush1.bf16.msra.mxu0 %v13490_v35  ;;  %v11300_v35 = vld [vmem:[%s16408_s3 + $0x624] ss:$20 sps:$4 sm:$0xff]  }
 0x243   : > { %2586 = vmatprep.subr.bf16.mxu0 %v13499_v56  ;;  %v2462_v56 = vld [vmem:[%s12328_s27 + $0x128] sm:$0xff]  ;;  %3203 = vmatprep.subr.bf16.mxu1 %v11300_v35 }
 0x244   : > { %v11312_v35 = vld [vmem:[%s16408_s3 + $0x674] ss:$20 sps:$4 sm:$0xff]  }
 0x246   : > { %2587 = vmatpush1.bf16.msra.mxu0 %v13508_v9  ;;  %v11298_v9 = vld [vmem:[%s16408_s3 + $0x620] ss:$20 sps:$4 sm:$0xff]  }
 0x247   : > { %2588 = vmatprep.subr.bf16.mxu0 %v13517_v52  ;;  %v9141_v52 = vcombine.high %v2462_v56, %v2464_v54  ;;  %3204 = vmatpush1.bf16.msra.mxu1 %v11298_v9  ;;  %v9140_v9 = vcombine.low %v2462_v56, %v2464_v54  ;;  %v11279_v54 = vld [vmem:[%s16408_s3 + $0x57c] ss:$20 sps:$4 sm:$0xff]   ;;  %v11316_v56 = vld [vmem:[%s16408_s3 + $0x698] ss:$20 sps:$4 sm:$0xff]  }
 0x248   : > { %3205 = vmatprep.subr.bf16.mxu1 %v11306_v61  ;;  %v11277_v61 = vld [vmem:[%s16408_s3 + $0x578] ss:$20 sps:$4 sm:$0xff]  }
 0x24a   : > { %2589 = vmatpush1.bf16.msra.mxu0 %v13533_v62 }
 0x24b   : > { %3136 = vmatprep.subr.bf16.mxu0 %v11261_v6  ;;  %v11265_v6 = vld [vmem:[%s16408_s3 + $0x528] ss:$20 sps:$4 sm:$0xff]   ;;  %3206 = vmatpush1.bf16.msra.mxu1 %v11304_v37  ;;  %v11324_v37 = vld [vmem:[%s16408_s3 + $0x6c4] ss:$20 sps:$4 sm:$0xff]  }
 0x24c   : > { %3207 = vmatprep.subr.bf16.mxu1 %v11312_v35  ;;  %v11322_v35 = vld [vmem:[%s16408_s3 + $0x6c0] ss:$20 sps:$4 sm:$0xff]  }
 0x24d   : > { %2591 = vmatmul.mubr.bf16.vlgmr.msra.gmra.mrb[24].mxu0 %v9136_v38  ;;  %v11273_v38 = vld [vmem:[%s16408_s3 + $0x554] ss:$20 sps:$4 sm:$0xff]  }
 0x24e   : > { %2600 = vmatprep.mubr.bf16.mxu0 %v9141_v52  ;;  %3137 = vmatpush1.bf16.msra.mxu0 %v11259_v53  ;;  %v11310_v53 = vld [vmem:[%s16408_s3 + $0x670] ss:$20 sps:$4 sm:$0xff]  }
 0x24f   : > { %3138 = vmatprep.subr.bf16.mxu0 %v11267_v60  ;;  %v11271_v52 = vld [vmem:[%s16408_s3 + $0x550] ss:$20 sps:$4 sm:$0xff]   ;;  %3208 = vmatpush1.bf16.msra.mxu1 %v11310_v53  ;;  %v11291_v53 = vld [vmem:[%s16408_s3 + $0x5cc] ss:$20 sps:$4 sm:$0xff]  }
 0x250   : > { %v11318_v60 = vld [vmem:[%s16408_s3 + $0x69c] ss:$20 sps:$4 sm:$0xff]  }
 0x251   : > { %3209 = vmatprep.subr.bf16.mxu1 %v11318_v60  ;;  %v11289_v60 = vld [vmem:[%s16408_s3 + $0x5c8] ss:$20 sps:$4 sm:$0xff]  }
 0x252   : > { %3139 = vmatpush1.bf16.msra.mxu0 %v11265_v6  ;;  %v11285_v6 = vld [vmem:[%s16408_s3 + $0x5a4] ss:$20 sps:$4 sm:$0xff]  }
 0x253   : > { %3140 = vmatprep.subr.bf16.mxu0 %v11273_v38  ;;  %3210 = vmatpush1.bf16.msra.mxu1 %v11316_v56  ;;  %v11283_v38 = vld [vmem:[%s16408_s3 + $0x5a0] ss:$20 sps:$4 sm:$0xff]  }
 0x254   : > { %3211 = vmatprep.subr.bf16.mxu1 %v11324_v37 }
 0x255   : > { %2601 = vmatmul.mubr.bf16.gmra.mrb[28].mxu0 %v9140_v9  ;;  %v11330_v9 = vld [vmem:[%s16408_s3 + $0x6ec] ss:$20 sps:$4 sm:$0xff]  }
 0x256   : > { %3141 = vmatpush1.bf16.msra.mxu0 %v11271_v52  ;;  %v11328_v52 = vld [vmem:[%s16408_s3 + $0x6e8] ss:$20 sps:$4 sm:$0xff]  }
 0x257   : > { %3142 = vmatprep.subr.bf16.mxu0 %v11279_v54  ;;  %3212 = vmatpush1.bf16.msra.mxu1 %v11322_v35  ;;  %v11336_v54 = vld [vmem:[%s16408_s3 + $0x714] ss:$20 sps:$4 sm:$0xff]  }
 0x258   : > { %3213 = vmatprep.subr.bf16.mxu1 %v11330_v9  ;;  %v11295_v9 = vld [vmem:[%s16408_s3 + $0x5f0] ss:$20 sps:$4 sm:$0xff]  }
 0x25a   : > { %3143 = vmatpush1.bf16.msra.mxu0 %v11277_v61  ;;  %v11297_v61 = vld [vmem:[%s16408_s3 + $0x5f4] ss:$20 sps:$4 sm:$0xff]  }
 0x25b   : > { %3144 = vmatprep.subr.bf16.mxu0 %v11285_v6  ;;  %3214 = vmatpush1.bf16.msra.mxu1 %v11328_v52  ;;  %v11301_v52 = vld [vmem:[%s16408_s3 + $0x618] ss:$20 sps:$4 sm:$0xff]  }
 0x25c   : > { %3215 = vmatprep.subr.bf16.mxu1 %v11336_v54 }
 0x25e   : > { %3145 = vmatpush1.bf16.msra.mxu0 %v11283_v38  ;;  %v11334_v38 = vld [vmem:[%s16408_s3 + $0x710] ss:$20 sps:$4 sm:$0xff]  }
 0x25f   : > { %v10349_v56 = vpop.f32.mrb[16].mxu0  ;;  %3146 = vmatprep.subr.bf16.mxu0 %v11291_v53  ;;  %3216 = vmatpush1.bf16.msra.mxu1 %v11334_v38 }
 0x260   : > { %v10350_v37 = vpop.f32.mrb[17].mxu0 }
 0x261   : > { %v10351_v6 = vadd.f32 %v10350_v37, %v10349_v56  ;;  %v10352_v35 = vpop.f32.mrb[18].mxu0 }
 0x262   : > { %v10353_v62 = vpop.f32.mrb[19].mxu0  ;;  %3147 = vmatpush1.bf16.msra.mxu0 %v11289_v60  ;;  %v11309_v60 = vld [vmem:[%s16408_s3 + $0x644] ss:$20 sps:$4 sm:$0xff]  }
 0x263   : > { %v10354_v53 = vadd.f32 %v10353_v62, %v10352_v35  ;;  %3148 = vmatprep.subr.bf16.mxu0 %v11297_v61  ;;  %v11307_v35 = vld [vmem:[%s16408_s3 + $0x640] ss:$20 sps:$4 sm:$0xff]  }
 0x266   : > { %3149 = vmatpush1.bf16.msra.mxu0 %v11295_v9  ;;  %v11315_v9 = vld [vmem:[%s16408_s3 + $0x66c] ss:$20 sps:$4 sm:$0xff]  }
 0x267   : > { %v10355_v56 = vpop.f32.mrb[20].mxu0  ;;  %3150 = vmatprep.subr.bf16.mxu0 %v11303_v17  ;;  %v11313_v17 = vld [vmem:[%s16408_s3 + $0x668] ss:$20 sps:$4 sm:$0xff]  }
 0x268   : > { %v10356_v37 = vpop.f32.mrb[21].mxu0 }
 0x269   : > { %v10357_v54 = vadd.f32 %v10356_v37, %v10355_v56  ;;  %v10358_v62 = vpop.f32.mrb[22].mxu0  ;;  %v11319_v56 = vld [vmem:[%s16408_s3 + $0x690] ss:$20 sps:$4 sm:$0xff]   ;;  %v11325_v37 = vld [vmem:[%s16408_s3 + $0x6b8] ss:$20 sps:$4 sm:$0xff]  }
 0x26a   : > { %v10359_v61 = vpop.f32.mrb[23].mxu0  ;;  %3151 = vmatpush1.bf16.msra.mxu0 %v11301_v52  ;;  %v11321_v52 = vld [vmem:[%s16408_s3 + $0x694] ss:$20 sps:$4 sm:$0xff]  }
 0x26b   : > { %v10360_v38 = vadd.f32 %v10359_v61, %v10358_v62  ;;  %3152 = vmatprep.subr.bf16.mxu0 %v11309_v60  ;;  %v11327_v60 = vld [vmem:[%s16408_s3 + $0x6bc] ss:$20 sps:$4 sm:$0xff]   ;;  %v11333_v62 = vld [vmem:[%s16408_s3 + $0x6e4] ss:$20 sps:$4 sm:$0xff]   ;;  %v11331_v61 = vld [vmem:[%s16408_s3 + $0x6e0] ss:$20 sps:$4 sm:$0xff]  }
 0x26e   : > { %3153 = vmatpush1.bf16.msra.mxu0 %v11307_v35  ;;  %v11339_v35 = vld [vmem:[%s16408_s3 + $0x70c] ss:$20 sps:$4 sm:$0xff]  }
 0x26f   : > { %3154 = vmatprep.subr.bf16.mxu0 %v11315_v9  ;;  %v11337_v9 = vld [vmem:[%s16408_s3 + $0x708] ss:$20 sps:$4 sm:$0xff]  }
 0x272   : > { %3155 = vmatpush1.bf16.msra.mxu0 %v11313_v17 }
 0x273   : > { %3156 = vmatprep.subr.bf16.mxu0 %v11321_v52  ;;  %v11342_v52 = vld [vmem:[%s16408_s3 + $0x73c] ss:$20 sps:$4 sm:$0xff]  }
 0x274   : > { %3217 = vmatprep.subr.bf16.mxu1 %v11342_v52  ;;  %v11351_v52 = vld [vmem:[%s16408_s3 + $0x75c] ss:$20 sps:$4 sm:$0xff]  }
 0x276   : > { %3157 = vmatpush1.bf16.msra.mxu0 %v11319_v56 }
 0x277   : > { %3158 = vmatprep.subr.bf16.mxu0 %v11327_v60  ;;  %v11340_v60 = vld [vmem:[%s16408_s3 + $0x738] ss:$20 sps:$4 sm:$0xff]  }
 0x278   : > { %3218 = vmatpush1.bf16.msra.mxu1 %v11340_v60 }
 0x279   : > { %3219 = vmatprep.subr.bf16.mxu1 %v11348_v13 }
 0x27a   : > { %3159 = vmatpush1.bf16.msra.mxu0 %v11325_v37  ;;  %v11345_v37 = vld [vmem:[%s16408_s3 + $0x734] ss:$20 sps:$4 sm:$0xff]  }
 0x27b   : > { %3160 = vmatprep.subr.bf16.mxu0 %v11333_v62 }
 0x27e   : > { %3161 = vmatpush1.bf16.msra.mxu0 %v11331_v61 }
 0x27f   : > { %3162 = vmatprep.subr.bf16.mxu0 %v11339_v35  ;;  %v11343_v35 = vld [vmem:[%s16408_s3 + $0x730] ss:$20 sps:$4 sm:$0xff]  }
 0x282   : > { %3163 = vmatpush1.bf16.msra.mxu0 %v11337_v9 }
 0x283   : > { %3164 = vmatprep.subr.bf16.mxu0 %v11345_v37  ;;  %v11352_v37 = vld [vmem:[%s16408_s3 + $0x650] ss:$20 sps:$4 sm:$0xff]  }
 0x286   : > { %3165 = vmatpush1.bf16.msra.mxu0 %v11343_v35 }
 0x287   : > { %3166 = vmatprep.subr.bf16.mxu0 %v11351_v52 }
 0x2a0   : > { %v10377_v17 = vpop.f32.mrb[16].mxu1 }
 0x2a1   : > { %v10378_v56 = vpop.f32.mrb[17].mxu1 }
 0x2a2   : > { %v10379_v62 = vadd.f32 %v10378_v56, %v10377_v17  ;;  %v10380_v61 = vpop.f32.mrb[18].mxu1  ;;  %v11346_v17 = vld [vmem:[%s16408_s3 + $0x760] ss:$20 sps:$4 sm:$0xff]  }
 0x2a3   : > { %v10381_v9 = vpop.f32.mrb[19].mxu1  ;;  %3220 = vmatpush1.bf16.msra.mxu1 %v11346_v17 }
 0x2a4   : > { %v13665_v3 = vadd.f32 %v10379_v62, %v10351_v6  ;;  %v10382_v14 = vadd.f32 %v10381_v9, %v10380_v61  ;;  %v11349_v6 = vld [vmem:[%s16408_s3 + $0x758] ss:$20 sps:$4 sm:$0xff]   ;;  %10389 = vmatprep.subr.bf16.mxu1 %v11352_v37 }
 0x2a5   : > { %3167 = vmatpush1.bf16.msra.mxu0 %v11349_v6 }
 0x2a6   : > { %16512 = vst [vmem:[#allocation27_spill] sm:$0xff] %v13665_v3  ;;  %v13676_v56 = vadd.f32 %v10382_v14, %v10354_v53 }
 0x2a8   : > { %16513 = vst [vmem:[#allocation28_spill] sm:$0xff] %v13676_v56  ;;  %v10383_v60 = vpop.f32.mrb[20].mxu1 }
 0x2a9   : > { %v10384_v62 = vpop.f32.mrb[21].mxu1 }
 0x2aa   : > { %v10385_v61 = vadd.f32 %v10384_v62, %v10383_v60  ;;  %v10386_v35 = vpop.f32.mrb[22].mxu1 }
 0x2ab   : > { %v10387_v9 = vpop.f32.mrb[23].mxu1 }
 0x2ac   : > { %v13684_v14 = vadd.f32 %v10385_v61, %v10357_v54  ;;  %v10388_v13 = vadd.f32 %v10387_v9, %v10386_v35 }
 0x2ae   : > { %v13686_v53 = vadd.f32 %v10388_v13, %v10360_v38 }
 0x320   : > { %v2592_v56 = vpop.f32.mrb[24].mxu0 }
 0x321   : > { %v10703_v52 = vadd.f32 %v2592_v56, %v12739_v39  ;;  %v2594_v17 = vpop.f32.mrb[25].mxu0  ;;  %v11353_v56 = vld [vmem:[%s16408_s3 + $0x510] ss:$20 sps:$4 sm:$0xff]  }
 0x322   : > { %v10704_v6 = vadd.f32 %v2594_v17, %v12742_v40  ;;  %v2596_v3 = vpop.f32.mrb[26].mxu0 }
 0x323   : > { %v10705_v12 = vadd.f32 %v2596_v3, %v12739_v39  ;;  %v2598_v11 = vpop.f32.mrb[27].mxu0  ;;  %v2611_v62 = vmax.f32 %v10703_v52, 0.0  ;;  %v11354_v3 = vld [vmem:[%s16408_s3 + $0x678] ss:$20 sps:$4 sm:$0xff]  }
 0x324   : > { %v10706_v60 = vadd.f32 %v2598_v11, %v12742_v40  ;;  %v2612_v10 = vmax.f32 %v10704_v6, 0.0  ;;  %v11355_v6 = vld [vmem:[%s16408_s3 + $0x538] ss:$20 sps:$4 sm:$0xff]  }
 0x325   : > { %v2613_v37 = vmax.f32 %v10705_v12, 0.0 }
 0x326   : > { %v2614_v54 = vmax.f32 %v10706_v60, 0.0 }
 0x327   : > { %v2619_v61 = vpack.c.bf16 %v2613_v37, %v2611_v62  ;;  %v11356_v37 = vld [vmem:[%s16408_s3 + $0x6a0] ss:$20 sps:$4 sm:$0xff]  }
 0x328   : > { %v2620_v35 = vpack.c.bf16 %v2614_v54, %v2612_v10  ;;  %v2602_v38 = vpop.f32.mrb[28].mxu0 }
 0x329   : > { %v10707_v9 = vadd.f32 %v2602_v38, %v12739_v39  ;;  %v2604_v13 = vpop.f32.mrb[29].mxu0 }
 0x32a   : > { %v10708_v11 = vadd.f32 %v2604_v13, %v12742_v40  ;;  %v2606_v52 = vpop.f32.mrb[30].mxu0  ;;  %3168 = vmatprep.mubr.bf16.mxu0 %v2620_v35  ;;  %3221 = vmatprep.mubr.bf16.mxu1 %v2620_v35 }
 0x32b   : > { %v10709_v12 = vadd.f32 %v2606_v52, %v12739_v39  ;;  %v2608_v10 = vpop.f32.mrb[31].mxu0  ;;  %3169 = vmatmul.mubr.bf16.vlgmr.msra.gmra.mrb[8].mxu0 %v2619_v61  ;;  %3222 = vmatmul.mubr.bf16.vlgmr.msra.gmra.mrb[8].mxu1 %v2619_v61  ;;  %v2615_v60 = vmax.f32 %v10707_v9, 0.0  ;;  %v11358_v9 = vld [vmem:[%s16408_s3 + $0x6c8] ss:$20 sps:$4 sm:$0xff]  }
 0x32c   : > { %v10710_v17 = vadd.f32 %v2608_v10, %v12742_v40  ;;  %10390 = vmatpush3.bf16.msra.mxu1 %v11353_v56  ;;  %v2616_v54 = vmax.f32 %v10708_v11, 0.0  ;;  %v11357_v56 = vld [vmem:[%s16408_s3 + $0x560] ss:$20 sps:$4 sm:$0xff]   ;;  %v11360_v11 = vld [vmem:[%s16408_s3 + $0x6f0] ss:$20 sps:$4 sm:$0xff]  }
 0x32d   : > { %v2617_v62 = vmax.f32 %v10709_v12, 0.0  ;;  %10391 = vmatprep.subr.bf16.mxu1 %v11354_v3  ;;  %v11359_v3 = vld [vmem:[%s16408_s3 + $0x588] ss:$20 sps:$4 sm:$0xff]   ;;  %v11361_v12 = vld [vmem:[%s16408_s3 + $0x5b0] ss:$20 sps:$4 sm:$0xff]  }
 0x32e   : > { %v2618_v38 = vmax.f32 %v10710_v17, 0.0  ;;  %v11362_v10 = vld [vmem:[%s16408_s3 + $0x718] ss:$20 sps:$4 sm:$0xff]   ;;  %v11364_v17 = vld [vmem:[%s16408_s3 + $0x740] ss:$20 sps:$4 sm:$0xff]  }
 0x32f   : > { %v2621_v13 = vpack.c.bf16 %v2617_v62, %v2615_v60  ;;  %v11366_v60 = vld [vmem:[%s16408_s3 + $0x768] ss:$20 sps:$4 sm:$0xff]  }
 0x330   : > { %v2622_v52 = vpack.c.bf16 %v2618_v38, %v2616_v54  ;;  %10392 = vmatpush3.bf16.msra.mxu1 %v11355_v6  ;;  %v11365_v6 = vld [vmem:[%s16408_s3 + $0x600] ss:$20 sps:$4 sm:$0xff]   ;;  %v11367_v62 = vld [vmem:[%s16408_s3 + $0x628] ss:$20 sps:$4 sm:$0xff]  }
 0x331   : > { %10393 = vmatprep.subr.bf16.mxu1 %v11356_v37  ;;  %v3311_v37 = vld [vmem:[%s12328_s27 + $0x30] sm:$0xff] }
 0x332   : > { %3178 = vmatprep.mubr.bf16.mxu0 %v2622_v52  ;;  %3231 = vmatprep.mubr.bf16.mxu1 %v2622_v52  ;;  %v3313_v54 = vld [vmem:[%s12328_s27 + $0xb0] sm:$0xff] }
 0x333   : > { %3179 = vmatmul.mubr.bf16.gmra.mrb[12].mxu0 %v2621_v13  ;;  %3232 = vmatmul.mubr.bf16.gmra.mrb[12].mxu1 %v2621_v13  ;;  %v9319_v38 = vcombine.high %v3311_v37, %v3313_v54 }
 0x334   : > { %10394 = vmatpush3.bf16.msra.mxu1 %v11357_v56  ;;  %3274 = vmatprep.mubr.bf16.mxu1 %v2620_v35  ;;  %v11363_v35 = vld [vmem:[%s16408_s3 + $0x5d8] ss:$20 sps:$4 sm:$0xff]  }
 0x335   : > { %10395 = vmatprep.subr.bf16.mxu1 %v11358_v9  ;;  %v11410_v9 = vld [vmem:[%s16408_s3 + $0x898] ss:$20 sps:$4 sm:$0xff]  }
 0x338   : > { %10396 = vmatpush3.bf16.msra.mxu1 %v11359_v3  ;;  %v16534_v3 = vld [vmem:[#allocation26_spill] sm:$0xff] }
 0x339   : > { %10397 = vmatprep.subr.bf16.mxu1 %v11360_v11 }
 0x33c   : > { %10398 = vmatpush3.bf16.msra.mxu1 %v11361_v12  ;;  %v11371_v12 = vld [vmem:[%s16408_s3 + $0x788] ss:$20 sps:$4 sm:$0xff]  }
 0x33d   : > { %10399 = vmatprep.subr.bf16.mxu1 %v11362_v10  ;;  %v11379_v10 = vld [vmem:[%s16408_s3 + $0x7b4] ss:$20 sps:$4 sm:$0xff]  }
 0x340   : > { %10400 = vmatpush3.bf16.msra.mxu1 %v11363_v35  ;;  %v11418_v35 = vld [vmem:[%s16408_s3 + $0x8c4] ss:$20 sps:$4 sm:$0xff]  }
 0x341   : > { %10401 = vmatprep.subr.bf16.mxu1 %v11364_v17  ;;  %v11416_v17 = vld [vmem:[%s16408_s3 + $0x8c0] ss:$20 sps:$4 sm:$0xff]  }
 0x344   : > { %10402 = vmatpush3.bf16.msra.mxu1 %v11365_v6  ;;  %v11377_v6 = vld [vmem:[%s16408_s3 + $0x7b0] ss:$20 sps:$4 sm:$0xff]  }
 0x345   : > { %10403 = vmatprep.subr.bf16.mxu1 %v11366_v60  ;;  %v11424_v60 = vld [vmem:[%s16408_s3 + $0x8ec] ss:$20 sps:$4 sm:$0xff]  }
 0x348   : > { %10404 = vmatpush3.bf16.msra.mxu1 %v11367_v62  ;;  %v11385_v62 = vld [vmem:[%s16408_s3 + $0x7dc] ss:$20 sps:$4 sm:$0xff]  }
 0x349   : > { %3359 = vmatprep.subr.bf16.mxu1 %v13074_v15  ;;  %v3315_v15 = vld [vmem:[%s12328_s27 + $0x130] sm:$0xff] }
 0x34b   : > { %3275 = vmatmul.mubr.bf16.vlgmr.msra.gmra.mrb[24].mxu1 %v2619_v61  ;;  %v3316_v61 = vld [vmem:[%s12328_s27 + $0x138] sm:$0xff] }
 0x34c   : > { %3282 = vmatprep.mubr.bf16.mxu1 %v2622_v52  ;;  %3360 = vmatpush1.bf16.msra.mxu1 %v13084_v16  ;;  %v3317_v16 = vld [vmem:[%s12328_s27 + $0x1b0] sm:$0xff]  ;;  %v11373_v52 = vld [vmem:[%s16408_s3 + $0x78c] ss:$20 sps:$4 sm:$0xff]  }
 0x34d   : > { %3361 = vmatprep.subr.bf16.mxu1 %v13096_v18  ;;  %v9318_v18 = vcombine.low %v3311_v37, %v3313_v54  ;;  %v11422_v54 = vld [vmem:[%s16408_s3 + $0x8e8] ss:$20 sps:$4 sm:$0xff]  }
 0x350   : > { %3362 = vmatpush1.bf16.msra.mxu1 %v13104_v49  ;;  %v9323_v49 = vcombine.high %v3315_v15, %v3317_v16 }
 0x351   : > { %3363 = vmatprep.subr.bf16.mxu1 %v13110_v19  ;;  %v13781_v19 = vld [vmem:[%s12328_s27 + $0x38] sm:$0xff] }
 0x353   : > { %3283 = vmatmul.mubr.bf16.gmra.mrb[28].mxu1 %v2621_v13  ;;  %v3318_v13 = vld [vmem:[%s12328_s27 + $0x1b8] sm:$0xff] }
 0x354   : > { %3364 = vmatpush1.bf16.msra.mxu1 %v13118_v20  ;;  %3391 = vmatprep.mubr.bf16.mxu1 %v9319_v38  ;;  %v13784_v20 = vld [vmem:[%s12328_s27 + $0xb8] sm:$0xff]  ;;  %v9325_v11 = vcombine.high %v3316_v61, %v3318_v13  ;;  %v9324_v37 = vcombine.low %v3316_v61, %v3318_v13 }
 0x355   : > { %3365 = vmatprep.subr.bf16.mxu1 %v13124_v21  ;;  %v9322_v21 = vcombine.low %v3315_v15, %v3317_v16  ;;  %v9320_v56 = vcombine.low %v13781_v19, %v13784_v20  ;;  %v11383_v38 = vld [vmem:[%s16408_s3 + $0x7d8] ss:$20 sps:$4 sm:$0xff]   ;;  %v11430_v15 = vld [vmem:[%s16408_s3 + $0x914] ss:$20 sps:$4 sm:$0xff]  }
 0x356   : > { %v11391_v16 = vld [vmem:[%s16408_s3 + $0x804] ss:$20 sps:$4 sm:$0xff]  }
 0x357   : > { %v11458_v61 = vld [vmem:[%s16408_s3 + $0x9d8] ss:$20 sps:$4 sm:$0xff]  }
 0x358   : > { %3366 = vmatpush1.bf16.msra.mxu1 %v13130_v22  ;;  %v9321_v22 = vcombine.high %v13781_v19, %v13784_v20  ;;  %v11436_v19 = vld [vmem:[%s16408_s3 + $0x93c] ss:$20 sps:$4 sm:$0xff]   ;;  %v11397_v20 = vld [vmem:[%s16408_s3 + $0x82c] ss:$20 sps:$4 sm:$0xff]   ;;  %v11463_v13 = vld [vmem:[%s16408_s3 + $0x9e4] ss:$20 sps:$4 sm:$0xff]  }
 0x359   : > { %3367 = vmatprep.subr.bf16.mxu1 %v13136_v46  ;;  %v16514_v46 = vld [vmem:[#allocation6_spill] sm:$0xff] }
 0x35c   : > { %3368 = vmatpush1.bf16.msra.mxu1 %v13142_v23  ;;  %v16515_v23 = vld [vmem:[#allocation7_spill] sm:$0xff] }
 0x35d   : > { %3369 = vmatprep.subr.bf16.mxu1 %v13148_v24  ;;  %v16516_v24 = vld [vmem:[#allocation8_spill] sm:$0xff] }
 0x360   : > { %3370 = vmatpush1.bf16.msra.mxu1 %v13154_v25  ;;  %v16517_v25 = vld [vmem:[#allocation9_spill] sm:$0xff] }
 0x361   : > { %3371 = vmatprep.subr.bf16.mxu1 %v13160_v26  ;;  %v16518_v26 = vld [vmem:[#allocation10_spill] sm:$0xff] }
 0x364   : > { %3372 = vmatpush1.bf16.msra.mxu1 %v13166_v27  ;;  %v16519_v27 = vld [vmem:[#allocation11_spill] sm:$0xff] }
 0x365   : > { %3373 = vmatprep.subr.bf16.mxu1 %v13172_v28  ;;  %v16520_v28 = vld [vmem:[#allocation12_spill] sm:$0xff] }
 0x368   : > { %3374 = vmatpush1.bf16.msra.mxu1 %v13178_v29  ;;  %v11368_v29 = vld [vmem:[%s16408_s3 + $0x780] ss:$20 sps:$4 sm:$0xff]  }
 0x369   : > { %3375 = vmatprep.subr.bf16.mxu1 %v13184_v30  ;;  %v11370_v30 = vld [vmem:[%s16408_s3 + $0x784] ss:$20 sps:$4 sm:$0xff]  }
 0x36a   : > { %3990 = vmatprep.subr.bf16.mxu0 %v11370_v30  ;;  %v11415_v30 = vld [vmem:[%s16408_s3 + $0x8a4] ss:$20 sps:$4 sm:$0xff]  }
 0x36b   : > { %3991 = vmatpush1.bf16.msra.mxu0 %v11368_v29  ;;  %v11407_v29 = vld [vmem:[%s16408_s3 + $0x878] ss:$20 sps:$4 sm:$0xff]  }
 0x36c   : > { %3376 = vmatpush1.bf16.msra.mxu1 %v13190_v31  ;;  %v16521_v31 = vld [vmem:[#allocation13_spill] sm:$0xff] }
 0x36d   : > { %3377 = vmatprep.subr.bf16.mxu1 %v13196_v32  ;;  %v11376_v32 = vld [vmem:[%s16408_s3 + $0x7ac] ss:$20 sps:$4 sm:$0xff]  }
 0x36e   : > { %3992 = vmatprep.subr.bf16.mxu0 %v11376_v32  ;;  %v11421_v32 = vld [vmem:[%s16408_s3 + $0x8cc] ss:$20 sps:$4 sm:$0xff]  }
 0x370   : > { %3378 = vmatpush1.bf16.msra.mxu1 %v13202_v33  ;;  %v11374_v33 = vld [vmem:[%s16408_s3 + $0x7a8] ss:$20 sps:$4 sm:$0xff]  }
 0x371   : > { %3379 = vmatprep.subr.bf16.mxu1 %v13208_v34  ;;  %v16522_v34 = vld [vmem:[#allocation14_spill] sm:$0xff]  ;;  %3993 = vmatpush1.bf16.msra.mxu0 %v11374_v33  ;;  %v11419_v33 = vld [vmem:[%s16408_s3 + $0x8c8] ss:$20 sps:$4 sm:$0xff]  }
 0x374   : > { %3380 = vmatpush1.bf16.msra.mxu1 %v13214_v36  ;;  %v11382_v36 = vld [vmem:[%s16408_s3 + $0x7d4] ss:$20 sps:$4 sm:$0xff]  }
 0x375   : > { %3381 = vmatprep.subr.bf16.mxu1 %v13220_v41  ;;  %v16523_v41 = vld [vmem:[#allocation15_spill] sm:$0xff]  ;;  %3994 = vmatprep.subr.bf16.mxu0 %v11382_v36  ;;  %v11425_v36 = vld [vmem:[%s16408_s3 + $0x8f0] ss:$20 sps:$4 sm:$0xff]  }
 0x378   : > { %3382 = vmatpush1.bf16.msra.mxu1 %v13226_v42  ;;  %v11380_v42 = vld [vmem:[%s16408_s3 + $0x7d0] ss:$20 sps:$4 sm:$0xff]  }
 0x379   : > { %3383 = vmatprep.subr.bf16.mxu1 %v13232_v43  ;;  %v16524_v43 = vld [vmem:[#allocation16_spill] sm:$0xff]  ;;  %3995 = vmatpush1.bf16.msra.mxu0 %v11380_v42  ;;  %v11431_v42 = vld [vmem:[%s16408_s3 + $0x918] ss:$20 sps:$4 sm:$0xff]  }
 0x37c   : > { %3384 = vmatpush1.bf16.msra.mxu1 %v13238_v44  ;;  %v11388_v44 = vld [vmem:[%s16408_s3 + $0x7fc] ss:$20 sps:$4 sm:$0xff]  }
 0x37d   : > { %3385 = vmatprep.subr.bf16.mxu1 %v13244_v45  ;;  %v16525_v45 = vld [vmem:[#allocation17_spill] sm:$0xff]  ;;  %3996 = vmatprep.subr.bf16.mxu0 %v11388_v44  ;;  %v11437_v44 = vld [vmem:[%s16408_s3 + $0x940] ss:$20 sps:$4 sm:$0xff]  }
 0x380   : > { %3386 = vmatpush1.bf16.msra.mxu1 %v13250_v47  ;;  %v11386_v47 = vld [vmem:[%s16408_s3 + $0x7f8] ss:$20 sps:$4 sm:$0xff]  }
 0x381   : > { %3387 = vmatprep.subr.bf16.mxu1 %v13256_v48  ;;  %v16526_v48 = vld [vmem:[#allocation18_spill] sm:$0xff]  ;;  %3997 = vmatpush1.bf16.msra.mxu0 %v11386_v47  ;;  %v11443_v47 = vld [vmem:[%s16408_s3 + $0x968] ss:$20 sps:$4 sm:$0xff]  }
 0x384   : > { %3388 = vmatpush1.bf16.msra.mxu1 %v13262_v50  ;;  %v11394_v50 = vld [vmem:[%s16408_s3 + $0x824] ss:$20 sps:$4 sm:$0xff]  }
 0x385   : > { %3389 = vmatprep.subr.bf16.mxu1 %v13268_v51  ;;  %v16527_v51 = vld [vmem:[#allocation19_spill] sm:$0xff]  ;;  %3998 = vmatprep.subr.bf16.mxu0 %v11394_v50  ;;  %v11449_v50 = vld [vmem:[%s16408_s3 + $0x990] ss:$20 sps:$4 sm:$0xff]  }
 0x388   : > { %3390 = vmatpush1.bf16.msra.mxu1 %v13278_v55  ;;  %v11392_v55 = vld [vmem:[%s16408_s3 + $0x820] ss:$20 sps:$4 sm:$0xff]  }
 0x389   : > { %3412 = vmatprep.subr.bf16.mxu1 %v13284_v57  ;;  %v16528_v57 = vld [vmem:[#allocation20_spill] sm:$0xff]  ;;  %3999 = vmatpush1.bf16.msra.mxu0 %v11392_v55 }
 0x38a   : > { %v11454_v55 = vld [vmem:[%s16408_s3 + $0x9b4] ss:$20 sps:$4 sm:$0xff]  }
 0x38b   : > { %3392 = vmatmul.mubr.bf16.vlgmr.msra.gmra.mrb[32].mxu1 %v9318_v18  ;;  %v11428_v18 = vld [vmem:[%s16408_s3 + $0x910] ss:$20 sps:$4 sm:$0xff]  }
 0x38c   : > { %3413 = vmatpush1.bf16.msra.mxu1 %v13290_v58  ;;  %3401 = vmatprep.mubr.bf16.mxu1 %v9323_v49  ;;  %v11400_v58 = vld [vmem:[%s16408_s3 + $0x84c] ss:$20 sps:$4 sm:$0xff]  }
 0x38d   : > { %3414 = vmatprep.subr.bf16.mxu1 %v13296_v59  ;;  %v16529_v59 = vld [vmem:[#allocation21_spill] sm:$0xff]  ;;  %4000 = vmatprep.subr.bf16.mxu0 %v11400_v58  ;;  %v11389_v49 = vld [vmem:[%s16408_s3 + $0x800] ss:$20 sps:$4 sm:$0xff]   ;;  %v11452_v58 = vld [vmem:[%s16408_s3 + $0x9b0] ss:$20 sps:$4 sm:$0xff]  }
 0x390   : > { %3415 = vmatpush1.bf16.msra.mxu1 %v13308_v63  ;;  %v11398_v63 = vld [vmem:[%s16408_s3 + $0x848] ss:$20 sps:$4 sm:$0xff]  }
 0x391   : > { %3416 = vmatprep.subr.bf16.mxu1 %v13316_v0  ;;  %v16530_v0 = vld [vmem:[#allocation22_spill] sm:$0xff]  ;;  %4001 = vmatpush1.bf16.msra.mxu0 %v11398_v63 }
 0x393   : > { %3402 = vmatmul.mubr.bf16.gmra.mrb[36].mxu1 %v9322_v21  ;;  %v11434_v21 = vld [vmem:[%s16408_s3 + $0x938] ss:$20 sps:$4 sm:$0xff]  }
 0x394   : > { %3417 = vmatpush1.bf16.msra.mxu1 %v13322_v1  ;;  %3444 = vmatprep.mubr.bf16.mxu1 %v9321_v22  ;;  %v11406_v1 = vld [vmem:[%s16408_s3 + $0x874] ss:$20 sps:$4 sm:$0xff]  }
 0x395   : > { %3418 = vmatprep.subr.bf16.mxu1 %v13328_v2  ;;  %v16531_v2 = vld [vmem:[#allocation23_spill] sm:$0xff]  ;;  %4002 = vmatprep.subr.bf16.mxu0 %v11406_v1 }
 0x396   : > { %v11395_v22 = vld [vmem:[%s16408_s3 + $0x828] ss:$20 sps:$4 sm:$0xff]   ;;  %v11455_v1 = vld [vmem:[%s16408_s3 + $0x9b8] ss:$20 sps:$4 sm:$0xff]  }
 0x398   : > { %3419 = vmatpush1.bf16.msra.mxu1 %v13334_v4  ;;  %v11404_v4 = vld [vmem:[%s16408_s3 + $0x870] ss:$20 sps:$4 sm:$0xff]  }
 0x399   : > { %3420 = vmatprep.subr.bf16.mxu1 %v13340_v5  ;;  %v16532_v5 = vld [vmem:[#allocation24_spill] sm:$0xff]  ;;  %4003 = vmatpush1.bf16.msra.mxu0 %v11404_v4  ;;  %v16535_v4 = vld [vmem:[#allocation27_spill] sm:$0xff] }
 0x39c   : > { %3421 = vmatpush1.bf16.msra.mxu1 %v13346_v7  ;;  %v11412_v7 = vld [vmem:[%s16408_s3 + $0x89c] ss:$20 sps:$4 sm:$0xff]  }
 0x39d   : > { %3422 = vmatprep.subr.bf16.mxu1 %v13352_v8  ;;  %v16533_v8 = vld [vmem:[#allocation25_spill] sm:$0xff]  ;;  %4004 = vmatprep.subr.bf16.mxu0 %v11412_v7 }
 0x39e   : > { %4005 = vmatpush1.bf16.msra.mxu0 %v11410_v9  ;;  %v11461_v9 = vld [vmem:[%s16408_s3 + $0x9e0] ss:$20 sps:$4 sm:$0xff]  }
 0x39f   : > { %4006 = vmatprep.subr.bf16.mxu0 %v11418_v35 }
 0x3a0   : > { %3423 = vmatpush1.bf16.msra.mxu1 %v16514_v46  ;;  %v11442_v46 = vld [vmem:[%s16408_s3 + $0x964] ss:$20 sps:$4 sm:$0xff]  }
 0x3a1   : > { %3424 = vmatprep.subr.bf16.mxu1 %v16515_v23  ;;  %v11403_v23 = vld [vmem:[%s16408_s3 + $0x854] ss:$20 sps:$4 sm:$0xff]  }
 0x3a2   : > { %4007 = vmatpush1.bf16.msra.mxu0 %v11416_v17 }
 0x3a3   : > { %4008 = vmatprep.subr.bf16.mxu0 %v11424_v60 }
 0x3a4   : > { %3425 = vmatpush1.bf16.msra.mxu1 %v16516_v24  ;;  %v11440_v24 = vld [vmem:[%s16408_s3 + $0x960] ss:$20 sps:$4 sm:$0xff]  }
 0x3a5   : > { %3426 = vmatprep.subr.bf16.mxu1 %v16517_v25  ;;  %v11401_v25 = vld [vmem:[%s16408_s3 + $0x850] ss:$20 sps:$4 sm:$0xff]  }
 0x3a6   : > { %4009 = vmatpush1.bf16.msra.mxu0 %v11422_v54 }
 0x3a7   : > { %4010 = vmatprep.subr.bf16.mxu0 %v11430_v15 }
 0x3a8   : > { %3427 = vmatpush1.bf16.msra.mxu1 %v16518_v26  ;;  %v11448_v26 = vld [vmem:[%s16408_s3 + $0x98c] ss:$20 sps:$4 sm:$0xff]  }
 0x3a9   : > { %3428 = vmatprep.subr.bf16.mxu1 %v16519_v27  ;;  %v11409_v27 = vld [vmem:[%s16408_s3 + $0x87c] ss:$20 sps:$4 sm:$0xff]  }
 0x3aa   : > { %4011 = vmatpush1.bf16.msra.mxu0 %v11428_v18 }
 0x3ab   : > { %4012 = vmatprep.subr.bf16.mxu0 %v11436_v19 }
 0x3ac   : > { %3429 = vmatpush1.bf16.msra.mxu1 %v16520_v28  ;;  %v11446_v28 = vld [vmem:[%s16408_s3 + $0x988] ss:$20 sps:$4 sm:$0xff]  }
 0x3ad   : > { %3430 = vmatprep.subr.bf16.mxu1 %v16521_v31  ;;  %v11413_v31 = vld [vmem:[%s16408_s3 + $0x8a0] ss:$20 sps:$4 sm:$0xff]  }
 0x3ae   : > { %4013 = vmatpush1.bf16.msra.mxu0 %v11434_v21 }
 0x3af   : > { %4014 = vmatprep.subr.bf16.mxu0 %v11442_v46 }
 0x3b0   : > { %3431 = vmatpush1.bf16.msra.mxu1 %v16522_v34  ;;  %v11427_v34 = vld [vmem:[%s16408_s3 + $0x8f4] ss:$20 sps:$4 sm:$0xff]  }
 0x3b1   : > { %3432 = vmatprep.subr.bf16.mxu1 %v16523_v41  ;;  %v11433_v41 = vld [vmem:[%s16408_s3 + $0x91c] ss:$20 sps:$4 sm:$0xff]  }
 0x3b2   : > { %4015 = vmatpush1.bf16.msra.mxu0 %v11440_v24  ;;  %v11465_v24 = vld [vmem:[%s16408_s3 + $0x790] ss:$20 sps:$4 sm:$0xff]  }
 0x3b3   : > { %4016 = vmatprep.subr.bf16.mxu0 %v11448_v26 }
 0x3b4   : > { %3433 = vmatpush1.bf16.msra.mxu1 %v16524_v43  ;;  %v11439_v43 = vld [vmem:[%s16408_s3 + $0x944] ss:$20 sps:$4 sm:$0xff]  }
 0x3b5   : > { %3434 = vmatprep.subr.bf16.mxu1 %v16525_v45  ;;  %v11445_v45 = vld [vmem:[%s16408_s3 + $0x96c] ss:$20 sps:$4 sm:$0xff]  }
 0x3b6   : > { %4017 = vmatpush1.bf16.msra.mxu0 %v11446_v28 }
 0x3b7   : > { %4018 = vmatprep.subr.bf16.mxu0 %v11454_v55  ;;  %v11473_v55 = vld [vmem:[%s16408_s3 + $0x830] ss:$20 sps:$4 sm:$0xff]  }
 0x3b8   : > { %3435 = vmatpush1.bf16.msra.mxu1 %v16526_v48  ;;  %v11451_v48 = vld [vmem:[%s16408_s3 + $0x994] ss:$20 sps:$4 sm:$0xff]  }
 0x3b9   : > { %3436 = vmatprep.subr.bf16.mxu1 %v16527_v51 }
 0x3ba   : > { %4019 = vmatpush1.bf16.msra.mxu0 %v11452_v58  ;;  %v11475_v58 = vld [vmem:[%s16408_s3 + $0x858] ss:$20 sps:$4 sm:$0xff]  }
 0x3bc   : > { %3437 = vmatpush1.bf16.msra.mxu1 %v16528_v57 }
 0x3bd   : > { %3438 = vmatprep.subr.bf16.mxu1 %v16529_v59  ;;  %v11457_v59 = vld [vmem:[%s16408_s3 + $0x9bc] ss:$20 sps:$4 sm:$0xff]  }
 0x3c0   : > { %3439 = vmatpush1.bf16.msra.mxu1 %v16530_v0 }
 0x3c1   : > { %3440 = vmatprep.subr.bf16.mxu1 %v16531_v2 }
 0x3c4   : > { %3441 = vmatpush1.bf16.msra.mxu1 %v16532_v5 }
 0x3c5   : > { %3442 = vmatprep.subr.bf16.mxu1 %v16533_v8  ;;  %v11460_v8 = vld [vmem:[%s16408_s3 + $0x9dc] ss:$20 sps:$4 sm:$0xff]  }
 0x3c6   : > { %4020 = vmatprep.subr.bf16.mxu0 %v11460_v8  ;;  %v14100_v8 = vld [vmem:[%s12328_s27 + $0x40] sm:$0xff] }
 0x3c7   : > { %4021 = vmatpush1.bf16.msra.mxu0 %v11458_v61  ;;  %v14103_v61 = vld [vmem:[%s12328_s27 + $0xc0] sm:$0xff] }
 0x3c8   : > { %3443 = vmatpush1.bf16.msra.mxu1 %v16534_v3 }
 0x3c9   : > { %4043 = vmatprep.subr.bf16.mxu1 %v11373_v52  ;;  %v16536_v52 = vld [vmem:[#allocation28_spill] sm:$0xff] }
 0x3cb   : > { %3445 = vmatmul.mubr.bf16.vlgmr.msra.gmra.mrb[32].mxu1 %v9320_v56 }
 0x3cc   : > { %3454 = vmatprep.mubr.bf16.mxu1 %v9325_v11  ;;  %4044 = vmatpush1.bf16.msra.mxu1 %v11371_v12  ;;  %v11464_v11 = vld [vmem:[%s16408_s3 + $0x8d0] ss:$20 sps:$4 sm:$0xff]  }
 0x3cd   : > { %4045 = vmatprep.subr.bf16.mxu1 %v11379_v10  ;;  %10417 = vmatprep.subr.bf16.mxu0 %v11464_v11  ;;  %v14128_v11 = vld [vmem:[%s16406_s1 + $0x34] ss:$8 sps:$4 sm:$0xff]  }
 0x3d0   : > { %4046 = vmatpush1.bf16.msra.mxu1 %v11377_v6 }
 0x3d1   : > { %4047 = vmatprep.subr.bf16.mxu1 %v11385_v62 }
 0x3d3   : > { %3455 = vmatmul.mubr.bf16.gmra.mrb[36].mxu1 %v9324_v37 }
 0x3d4   : > { %4048 = vmatpush1.bf16.msra.mxu1 %v11383_v38 }
 0x3d5   : > { %4049 = vmatprep.subr.bf16.mxu1 %v11391_v16 }
 0x3d8   : > { %4050 = vmatpush1.bf16.msra.mxu1 %v11389_v49 }
 0x3d9   : > { %4051 = vmatprep.subr.bf16.mxu1 %v11397_v20 }
 0x3dc   : > { %4052 = vmatpush1.bf16.msra.mxu1 %v11395_v22 }
 0x3dd   : > { %4053 = vmatprep.subr.bf16.mxu1 %v11403_v23 }
 0x3e0   : > { %4054 = vmatpush1.bf16.msra.mxu1 %v11401_v25 }
 0x3e1   : > { %4055 = vmatprep.subr.bf16.mxu1 %v11409_v27  ;;  %v11466_v27 = vld [vmem:[%s16408_s3 + $0x8f8] ss:$20 sps:$4 sm:$0xff]  }
 0x3e4   : > { %4056 = vmatpush1.bf16.msra.mxu1 %v11407_v29 }
 0x3e5   : > { %4057 = vmatprep.subr.bf16.mxu1 %v11415_v30 }
 0x3e8   : > { %4058 = vmatpush1.bf16.msra.mxu1 %v11413_v31 }
 0x3e9   : > { %4059 = vmatprep.subr.bf16.mxu1 %v11421_v32 }
 0x3ec   : > { %4060 = vmatpush1.bf16.msra.mxu1 %v11419_v33  ;;  %v11467_v33 = vld [vmem:[%s16408_s3 + $0x7b8] ss:$20 sps:$4 sm:$0xff]  }
 0x3ed   : > { %4061 = vmatprep.subr.bf16.mxu1 %v11427_v34 }
 0x3f0   : > { %4062 = vmatpush1.bf16.msra.mxu1 %v11425_v36 }
 0x3f1   : > { %4063 = vmatprep.subr.bf16.mxu1 %v11433_v41  ;;  %v11468_v41 = vld [vmem:[%s16408_s3 + $0x920] ss:$20 sps:$4 sm:$0xff]  }
 0x3f4   : > { %4064 = vmatpush1.bf16.msra.mxu1 %v11431_v42 }
 0x3f5   : > { %4065 = vmatprep.subr.bf16.mxu1 %v11439_v43 }
 0x3f8   : > { %4066 = vmatpush1.bf16.msra.mxu1 %v11437_v44 }
 0x3f9   : > { %4067 = vmatprep.subr.bf16.mxu1 %v11445_v45 }
 0x3fc   : > { %4068 = vmatpush1.bf16.msra.mxu1 %v11443_v47  ;;  %v11469_v47 = vld [vmem:[%s16408_s3 + $0x7e0] ss:$20 sps:$4 sm:$0xff]  }
 0x3fd   : > { %4069 = vmatprep.subr.bf16.mxu1 %v11451_v48  ;;  %v11470_v48 = vld [vmem:[%s16408_s3 + $0x948] ss:$20 sps:$4 sm:$0xff]  }
 0x400   : > { %4070 = vmatpush1.bf16.msra.mxu1 %v11449_v50  ;;  %v11471_v50 = vld [vmem:[%s16408_s3 + $0x808] ss:$20 sps:$4 sm:$0xff]  }
 0x401   : > { %4071 = vmatprep.subr.bf16.mxu1 %v11457_v59  ;;  %v11476_v59 = vld [vmem:[%s16408_s3 + $0x9c0] ss:$20 sps:$4 sm:$0xff]  }
 0x404   : > { %4072 = vmatpush1.bf16.msra.mxu1 %v11455_v1  ;;  %v11479_v1 = vld [vmem:[%s16408_s3 + $0x8a8] ss:$20 sps:$4 sm:$0xff]  }
 0x405   : > { %4073 = vmatprep.subr.bf16.mxu1 %v11463_v13  ;;  %v14108_v13 = vld [vmem:[%s16406_s1 + $0x10] ss:$8 sps:$4 sm:$0xff]  }
 0x408   : > { %4074 = vmatpush1.bf16.msra.mxu1 %v11461_v9  ;;  %v14116_v9 = vld [vmem:[%s16406_s1 + $0x24] ss:$8 sps:$4 sm:$0xff]  }
 0x41e   : > { %v10405_v51 = vpop.f32.mrb[24].mxu1 }
 0x41f   : > { %v10406_v57 = vpop.f32.mrb[25].mxu1 }
 0x420   : > { %v10407_v63 = vadd.f32 %v10406_v57, %v10405_v51  ;;  %v10408_v0 = vpop.f32.mrb[26].mxu1  ;;  %v11472_v51 = vld [vmem:[%s16408_s3 + $0x970] ss:$20 sps:$4 sm:$0xff]   ;;  %v11474_v57 = vld [vmem:[%s16408_s3 + $0x998] ss:$20 sps:$4 sm:$0xff]  }
 0x421   : > { %v10409_v2 = vpop.f32.mrb[27].mxu1 }
 0x422   : > { %v14002_v5 = vadd.f32 %v10407_v63, %v16535_v4  ;;  %v10410_v7 = vadd.f32 %v10409_v2, %v10408_v0  ;;  %v11477_v63 = vld [vmem:[%s16408_s3 + $0x880] ss:$20 sps:$4 sm:$0xff]   ;;  %v11478_v0 = vld [vmem:[%s16408_s3 + $0x9e8] ss:$20 sps:$4 sm:$0xff]   ;;  %v14084_v2 = vld [vmem:[%s16406_s1 + $0x4] ss:$8 sps:$4 sm:$0xff]  }
 0x423   : > { %v14090_v4 = vld [vmem:[%s16406_s1] ss:$8 sps:$4 sm:$0xff]  }
 0x424   : > { %v14014_v56 = vadd.f32 %v10410_v7, %v16536_v52  ;;  %v14096_v7 = vld [vmem:[%s16406_s1 + $0x14] ss:$8 sps:$4 sm:$0xff]   ;;  %v9503_v52 = vcombine.high %v14100_v8, %v14103_v61 }
 0x426   : > { %v10411_v3 = vpop.f32.mrb[28].mxu1 }
 0x427   : > { %v10412_v12 = vpop.f32.mrb[29].mxu1 }
 0x428   : > { %v10413_v10 = vadd.f32 %v10412_v12, %v10411_v3  ;;  %v10414_v35 = vpop.f32.mrb[30].mxu1  ;;  %v14122_v3 = vld [vmem:[%s16406_s1 + $0x20] ss:$8 sps:$4 sm:$0xff]   ;;  %v14134_v12 = vld [vmem:[%s16406_s1 + $0x30] ss:$8 sps:$4 sm:$0xff]  }
 0x429   : > { %v10415_v17 = vpop.f32.mrb[31].mxu1 }
 0x42a   : > { %v14023_v6 = vadd.f32 %v10413_v10, %v13684_v14  ;;  %v10416_v60 = vadd.f32 %v10415_v17, %v10414_v35  ;;  %v14140_v10 = vld [vmem:[%s16406_s1 + $0x44] ss:$8 sps:$4 sm:$0xff]   ;;  %v14146_v35 = vld [vmem:[%s16406_s1 + $0x40] ss:$8 sps:$4 sm:$0xff]   ;;  %v14152_v17 = vld [vmem:[%s16406_s1 + $0x54] ss:$8 sps:$4 sm:$0xff]  }
 0x42c   : > { %v14026_v62 = vadd.f32 %v10416_v60, %v13686_v53  ;;  %v14158_v60 = vld [vmem:[%s16406_s1 + $0x50] ss:$8 sps:$4 sm:$0xff]  }
 0x49e   : > { %v3446_v37 = vpop.f32.mrb[32].mxu1 }
 0x49f   : > { %v10711_v54 = vadd.f32 %v3446_v37, %v12739_v39  ;;  %v3448_v38 = vpop.f32.mrb[33].mxu1  ;;  %v14164_v37 = vld [vmem:[%s16406_s1 + $0x64] ss:$8 sps:$4 sm:$0xff]  }
 0x4a0   : > { %v10712_v15 = vadd.f32 %v3448_v38, %v12742_v40  ;;  %v3450_v16 = vpop.f32.mrb[34].mxu1  ;;  %v14176_v38 = vld [vmem:[%s16406_s1 + $0x74] ss:$8 sps:$4 sm:$0xff]  }
 0x4a1   : > { %v10713_v18 = vadd.f32 %v3450_v16, %v12739_v39  ;;  %v3452_v49 = vpop.f32.mrb[35].mxu1  ;;  %v3465_v20 = vmax.f32 %v10711_v54, 0.0  ;;  %v14170_v54 = vld [vmem:[%s16406_s1 + $0x60] ss:$8 sps:$4 sm:$0xff]   ;;  %v14188_v16 = vld [vmem:[%s16406_s1 + $0x84] ss:$8 sps:$4 sm:$0xff]  }
 0x4a2   : > { %v10714_v19 = vadd.f32 %v3452_v49, %v12742_v40  ;;  %v3466_v14 = vmax.f32 %v10712_v15, 0.0  ;;  %v14182_v15 = vld [vmem:[%s16406_s1 + $0x70] ss:$8 sps:$4 sm:$0xff]   ;;  %v14200_v49 = vld [vmem:[%s16406_s1 + $0x94] ss:$8 sps:$4 sm:$0xff]  }
 0x4a3   : > { %v3467_v21 = vmax.f32 %v10713_v18, 0.0  ;;  %v14194_v18 = vld [vmem:[%s16406_s1 + $0x80] ss:$8 sps:$4 sm:$0xff]  }
 0x4a4   : > { %v3468_v22 = vmax.f32 %v10714_v19, 0.0  ;;  %v14206_v19 = vld [vmem:[%s16406_s1 + $0x90] ss:$8 sps:$4 sm:$0xff]  }
 0x4a5   : > { %v3473_v46 = vpack.c.bf16 %v3467_v21, %v3465_v20  ;;  %v14212_v20 = vld [vmem:[%s16406_s1 + $0xa4] ss:$8 sps:$4 sm:$0xff]   ;;  %v14218_v21 = vld [vmem:[%s16406_s1 + $0xa0] ss:$8 sps:$4 sm:$0xff]  }
 0x4a6   : > { %v3474_v23 = vpack.c.bf16 %v3468_v22, %v3466_v14  ;;  %v3456_v53 = vpop.f32.mrb[36].mxu1  ;;  %v14224_v14 = vld [vmem:[%s16406_s1 + $0xb4] ss:$8 sps:$4 sm:$0xff]   ;;  %v14230_v22 = vld [vmem:[%s16406_s1 + $0xb0] ss:$8 sps:$4 sm:$0xff]  }
 0x4a7   : > { %v10715_v25 = vadd.f32 %v3456_v53, %v12739_v39  ;;  %v3458_v26 = vpop.f32.mrb[37].mxu1  ;;  %v14248_v53 = vld [vmem:[%s16406_s1 + $0xd4] ss:$8 sps:$4 sm:$0xff]  }
 0x4a8   : > { %v10716_v28 = vadd.f32 %v3458_v26, %v12742_v40  ;;  %v3460_v29 = vpop.f32.mrb[38].mxu1  ;;  %4022 = vmatprep.mubr.bf16.mxu0 %v3474_v23  ;;  %4075 = vmatprep.mubr.bf16.mxu1 %v3474_v23  ;;  %v14266_v26 = vld [vmem:[%s16406_s1 + $0xe0] ss:$8 sps:$4 sm:$0xff]  }
 0x4a9   : > { %v10717_v30 = vadd.f32 %v3460_v29, %v12739_v39  ;;  %v3462_v31 = vpop.f32.mrb[39].mxu1  ;;  %4023 = vmatmul.mubr.bf16.vlgmr.msra.gmra.mrb[8].mxu0 %v3473_v46  ;;  %4076 = vmatmul.mubr.bf16.vlgmr.msra.gmra.mrb[8].mxu1 %v3473_v46  ;;  %v3469_v34 = vmax.f32 %v10715_v25, 0.0  ;;  %v14260_v25 = vld [vmem:[%s16406_s1 + $0xe4] ss:$8 sps:$4 sm:$0xff]  }
 0x4aa   : > { %v10718_v32 = vadd.f32 %v3462_v31, %v12742_v40  ;;  %10418 = vmatpush3.bf16.msra.mxu0 %v11465_v24  ;;  %v3470_v42 = vmax.f32 %v10716_v28, 0.0  ;;  %v14254_v24 = vld [vmem:[%s16406_s1 + $0xd0] ss:$8 sps:$4 sm:$0xff]   ;;  %v4169_v28 = vld [vmem:[%s12328_s27 + $0x140] sm:$0xff] }
 0x4ab   : > { %v3471_v36 = vmax.f32 %v10717_v30, 0.0  ;;  %10419 = vmatprep.subr.bf16.mxu0 %v11466_v27  ;;  %v14272_v27 = vld [vmem:[%s16406_s1 + $0xf4] ss:$8 sps:$4 sm:$0xff]   ;;  %v4171_v29 = vld [vmem:[%s12328_s27 + $0x1c0] sm:$0xff]  ;;  %v9502_v30 = vcombine.low %v14100_v8, %v14103_v61  ;;  %v14282_v31 = vld [vmem:[%s16406_s1 + $0xf0] ss:$8 sps:$4 sm:$0xff]  }
 0x4ac   : > { %v3472_v43 = vmax.f32 %v10718_v32, 0.0  ;;  %v9507_v32 = vcombine.high %v4169_v28, %v4171_v29  ;;  %v14386_v8 = vld [vmem:[%s16406_s1 + $0x170] ss:$8 sps:$4 sm:$0xff]   ;;  %v14392_v61 = vld [vmem:[%s16406_s1 + $0x184] ss:$8 sps:$4 sm:$0xff]  }
 0x4ad   : > { %v3475_v44 = vpack.c.bf16 %v3471_v36, %v3469_v34  ;;  %v14294_v34 = vld [vmem:[%s16406_s1 + $0x100] ss:$8 sps:$4 sm:$0xff]   ;;  %v14300_v36 = vld [vmem:[%s16406_s1 + $0x114] ss:$8 sps:$4 sm:$0xff]   ;;  %16540 = vst [vmem:[#allocation9_spill] sm:$0xff] %v14386_v8  ;;  %16541 = vst [vmem:[#allocation10_spill] sm:$0xff] %v14392_v61 }
 0x4ae   : > { %v3476_v45 = vpack.c.bf16 %v3472_v43, %v3470_v42  ;;  %10420 = vmatpush3.bf16.msra.mxu0 %v11467_v33  ;;  %v14288_v33 = vld [vmem:[%s16406_s1 + $0x104] ss:$8 sps:$4 sm:$0xff]   ;;  %v9506_v43 = vcombine.low %v4169_v28, %v4171_v29  ;;  %v11480_v28 = vld [vmem:[%s16408_s3 + $0xa08] ss:$20 sps:$4 sm:$0xff]  }
 0x4af   : > { %10421 = vmatprep.subr.bf16.mxu0 %v11468_v41  ;;  %v14304_v41 = vld [vmem:[%s12328_s27 + $0x48] sm:$0xff] }
 0x4b0   : > { %4032 = vmatprep.mubr.bf16.mxu0 %v3476_v45  ;;  %4085 = vmatprep.mubr.bf16.mxu1 %v3476_v45  ;;  %v14307_v42 = vld [vmem:[%s12328_s27 + $0xc8] sm:$0xff] }
 0x4b1   : > { %4033 = vmatmul.mubr.bf16.gmra.mrb[12].mxu0 %v3475_v44  ;;  %4086 = vmatmul.mubr.bf16.gmra.mrb[12].mxu1 %v3475_v44  ;;  %v11482_v29 = vld [vmem:[%s16408_s3 + $0xa0c] ss:$20 sps:$4 sm:$0xff]  }
 0x4b2   : > { %10422 = vmatpush3.bf16.msra.mxu0 %v11469_v47  ;;  %4128 = vmatprep.mubr.bf16.mxu0 %v3474_v23  ;;  %v14242_v23 = vld [vmem:[%s16406_s1 + $0xc0] ss:$8 sps:$4 sm:$0xff]   ;;  %v14320_v47 = vld [vmem:[%s16406_s1 + $0x124] ss:$8 sps:$4 sm:$0xff]  }
 0x4b3   : > { %10423 = vmatprep.subr.bf16.mxu0 %v11470_v48  ;;  %v14326_v48 = vld [vmem:[%s16406_s1 + $0x120] ss:$8 sps:$4 sm:$0xff]   ;;  %4897 = vmatprep.subr.bf16.mxu1 %v11482_v29  ;;  %v11492_v29 = vld [vmem:[%s16408_s3 + $0xa58] ss:$20 sps:$4 sm:$0xff]  }
 0x4b4   : > { %4898 = vmatpush1.bf16.msra.mxu1 %v11480_v28  ;;  %v14431_v28 = vld [vmem:[%s16406_s1 + $0x1a4] ss:$8 sps:$4 sm:$0xff]  }
 0x4b5   : > { %16545 = vst [vmem:[#allocation14_spill] sm:$0xff] %v14431_v28 }
 0x4b6   : > { %10424 = vmatpush3.bf16.msra.mxu0 %v11471_v50  ;;  %v14332_v50 = vld [vmem:[%s16406_s1 + $0x134] ss:$8 sps:$4 sm:$0xff]  }
 0x4b7   : > { %10425 = vmatprep.subr.bf16.mxu0 %v11472_v51  ;;  %v14338_v51 = vld [vmem:[%s16406_s1 + $0x130] ss:$8 sps:$4 sm:$0xff]  }
 0x4ba   : > { %10426 = vmatpush3.bf16.msra.mxu0 %v11473_v55  ;;  %v14344_v55 = vld [vmem:[%s16406_s1 + $0x144] ss:$8 sps:$4 sm:$0xff]  }
 0x4bb   : > { %10427 = vmatprep.subr.bf16.mxu0 %v11474_v57  ;;  %v14350_v57 = vld [vmem:[%s16406_s1 + $0x140] ss:$8 sps:$4 sm:$0xff]  }
 0x4be   : > { %10428 = vmatpush3.bf16.msra.mxu0 %v11475_v58  ;;  %v14356_v58 = vld [vmem:[%s16406_s1 + $0x154] ss:$8 sps:$4 sm:$0xff]  }
 0x4bf   : > { %10429 = vmatprep.subr.bf16.mxu0 %v11476_v59  ;;  %v14362_v59 = vld [vmem:[%s16406_s1 + $0x150] ss:$8 sps:$4 sm:$0xff]  }
 0x4c2   : > { %10430 = vmatpush3.bf16.msra.mxu0 %v11477_v63  ;;  %v14368_v63 = vld [vmem:[%s16406_s1 + $0x164] ss:$8 sps:$4 sm:$0xff]  }
 0x4c3   : > { %10431 = vmatprep.subr.bf16.mxu0 %v11478_v0  ;;  %16537 = vst [vmem:[#allocation6_spill] sm:$0xff] %v14368_v63  ;;  %v14374_v0 = vld [vmem:[%s16406_s1 + $0x160] ss:$8 sps:$4 sm:$0xff]  }
 0x4c4   : > { %16538 = vst [vmem:[#allocation7_spill] sm:$0xff] %v14374_v0 }
 0x4c6   : > { %10432 = vmatpush3.bf16.msra.mxu0 %v11479_v1  ;;  %v14380_v1 = vld [vmem:[%s16406_s1 + $0x174] ss:$8 sps:$4 sm:$0xff]  }
 0x4c7   : > { %4213 = vmatprep.subr.bf16.mxu0 %v14084_v2  ;;  %16539 = vst [vmem:[#allocation8_spill] sm:$0xff] %v14380_v1 }
 0x4c9   : > { %4129 = vmatmul.mubr.bf16.vlgmr.msra.gmra.mrb[32].mxu0 %v3473_v46  ;;  %v14236_v46 = vld [vmem:[%s16406_s1 + $0xc4] ss:$8 sps:$4 sm:$0xff]  }
 0x4ca   : > { %4136 = vmatprep.mubr.bf16.mxu0 %v3476_v45  ;;  %4214 = vmatpush1.bf16.msra.mxu0 %v14090_v4  ;;  %v9505_v45 = vcombine.high %v14304_v41, %v14307_v42 }
 0x4cb   : > { %4215 = vmatprep.subr.bf16.mxu0 %v14096_v7 }
 0x4ce   : > { %4216 = vmatpush1.bf16.msra.mxu0 %v14108_v13 }
 0x4cf   : > { %4217 = vmatprep.subr.bf16.mxu0 %v14116_v9 }
 0x4d1   : > { %4137 = vmatmul.mubr.bf16.gmra.mrb[36].mxu0 %v3475_v44  ;;  %v14312_v44 = vld [vmem:[%s16406_s1 + $0x110] ss:$8 sps:$4 sm:$0xff]  }
 0x4d2   : > { %4218 = vmatpush1.bf16.msra.mxu0 %v14122_v3  ;;  %4245 = vmatprep.mubr.bf16.mxu0 %v9503_v52  ;;  %v14398_v52 = vld [vmem:[%s16406_s1 + $0x180] ss:$8 sps:$4 sm:$0xff]  }
 0x4d3   : > { %4219 = vmatprep.subr.bf16.mxu0 %v14128_v11  ;;  %16542 = vst [vmem:[#allocation11_spill] sm:$0xff] %v14398_v52 }
 0x4d6   : > { %4220 = vmatpush1.bf16.msra.mxu0 %v14134_v12 }
 0x4d7   : > { %4221 = vmatprep.subr.bf16.mxu0 %v14140_v10 }
 0x4da   : > { %4222 = vmatpush1.bf16.msra.mxu0 %v14146_v35 }
 0x4db   : > { %4223 = vmatprep.subr.bf16.mxu0 %v14152_v17 }
 0x4de   : > { %4224 = vmatpush1.bf16.msra.mxu0 %v14158_v60 }
 0x4df   : > { %4225 = vmatprep.subr.bf16.mxu0 %v14164_v37 }
 0x4e2   : > { %4226 = vmatpush1.bf16.msra.mxu0 %v14170_v54 }
 0x4e3   : > { %4227 = vmatprep.subr.bf16.mxu0 %v14176_v38 }
 0x4e6   : > { %4228 = vmatpush1.bf16.msra.mxu0 %v14182_v15 }
 0x4e7   : > { %4229 = vmatprep.subr.bf16.mxu0 %v14188_v16 }
 0x4ea   : > { %4230 = vmatpush1.bf16.msra.mxu0 %v14194_v18 }
 0x4eb   : > { %4231 = vmatprep.subr.bf16.mxu0 %v14200_v49 }
 0x4ee   : > { %4232 = vmatpush1.bf16.msra.mxu0 %v14206_v19 }
 0x4ef   : > { %4233 = vmatprep.subr.bf16.mxu0 %v14212_v20 }
 0x4f2   : > { %4234 = vmatpush1.bf16.msra.mxu0 %v14218_v21 }
 0x4f3   : > { %4235 = vmatprep.subr.bf16.mxu0 %v14224_v14 }
 0x4f6   : > { %4236 = vmatpush1.bf16.msra.mxu0 %v14230_v22 }
 0x4f7   : > { %4237 = vmatprep.subr.bf16.mxu0 %v14236_v46 }
 0x4fa   : > { %4238 = vmatpush1.bf16.msra.mxu0 %v14242_v23 }
 0x4fb   : > { %4239 = vmatprep.subr.bf16.mxu0 %v14248_v53 }
 0x4fe   : > { %4240 = vmatpush1.bf16.msra.mxu0 %v14254_v24 }
 0x4ff   : > { %4241 = vmatprep.subr.bf16.mxu0 %v14260_v25 }
 0x502   : > { %4242 = vmatpush1.bf16.msra.mxu0 %v14266_v26 }
 0x503   : > { %4243 = vmatprep.subr.bf16.mxu0 %v14272_v27 }
 0x506   : > { %4244 = vmatpush1.bf16.msra.mxu0 %v14282_v31 }
 0x507   : > { %4266 = vmatprep.subr.bf16.mxu0 %v14288_v33 }
 0x509   : > { %4246 = vmatmul.mubr.bf16.vlgmr.msra.gmra.mrb[40].mxu0 %v9502_v30  ;;  %v14410_v30 = vld [vmem:[%s16406_s1 + $0x194] ss:$8 sps:$4 sm:$0xff]  }
 0x50a   : > { %4267 = vmatpush1.bf16.msra.mxu0 %v14294_v34  ;;  %4255 = vmatprep.mubr.bf16.mxu0 %v9507_v32  ;;  %16543 = vst [vmem:[#allocation12_spill] sm:$0xff] %v14410_v30  ;;  %v11488_v32 = vld [vmem:[%s16408_s3 + $0xa34] ss:$20 sps:$4 sm:$0xff]  }
 0x50b   : > { %4268 = vmatprep.subr.bf16.mxu0 %v14300_v36  ;;  %4899 = vmatprep.subr.bf16.mxu1 %v11488_v32  ;;  %v14440_v32 = vld [vmem:[%s16406_s1 + $0x1a0] ss:$8 sps:$4 sm:$0xff]  }
 0x50c   : > { %16546 = vst [vmem:[#allocation15_spill] sm:$0xff] %v14440_v32 }
 0x50e   : > { %4269 = vmatpush1.bf16.msra.mxu0 %v14312_v44 }
 0x50f   : > { %4270 = vmatprep.subr.bf16.mxu0 %v14320_v47 }
 0x511   : > { %4256 = vmatmul.mubr.bf16.gmra.mrb[44].mxu0 %v9506_v43  ;;  %v11486_v43 = vld [vmem:[%s16408_s3 + $0xa30] ss:$20 sps:$4 sm:$0xff]  }
 0x512   : > { %4271 = vmatpush1.bf16.msra.mxu0 %v14326_v48  ;;  %4298 = vmatprep.mubr.bf16.mxu0 %v9505_v45  ;;  %v14422_v45 = vld [vmem:[%s16406_s1 + $0x190] ss:$8 sps:$4 sm:$0xff]  }
 0x513   : > { %4272 = vmatprep.subr.bf16.mxu0 %v14332_v50  ;;  %16544 = vst [vmem:[#allocation13_spill] sm:$0xff] %v14422_v45  ;;  %4900 = vmatpush1.bf16.msra.mxu1 %v11486_v43  ;;  %v14449_v43 = vld [vmem:[%s16406_s1 + $0x1b4] ss:$8 sps:$4 sm:$0xff]  }
 0x514   : > { %16547 = vst [vmem:[#allocation16_spill] sm:$0xff] %v14449_v43 }
 0x516   : > { %4273 = vmatpush1.bf16.msra.mxu0 %v14338_v51 }
 0x517   : > { %4274 = vmatprep.subr.bf16.mxu0 %v14344_v55 }
 0x51a   : > { %4275 = vmatpush1.bf16.msra.mxu0 %v14350_v57 }
 0x51b   : > { %4276 = vmatprep.subr.bf16.mxu0 %v14356_v58 }
 0x51e   : > { %4277 = vmatpush1.bf16.msra.mxu0 %v14362_v59 }
 0x51f   : > { %4278 = vmatprep.subr.bf16.mxu0 %v14368_v63 }
 0x522   : > { %4279 = vmatpush1.bf16.msra.mxu0 %v14374_v0 }
 0x523   : > { %4280 = vmatprep.subr.bf16.mxu0 %v14380_v1  ;;  %v11483_v1 = vld [vmem:[%s16408_s3 + $0xa00] ss:$20 sps:$4 sm:$0xff]  }
 0x526   : > { %4281 = vmatpush1.bf16.msra.mxu0 %v14386_v8  ;;  %v14537_v8 = vld [vmem:[%s16406_s1 + $0x1f0] ss:$8 sps:$4 sm:$0xff]  }
 0x527   : > { %4282 = vmatprep.subr.bf16.mxu0 %v14392_v61  ;;  %v11485_v61 = vld [vmem:[%s16408_s3 + $0xa04] ss:$20 sps:$4 sm:$0xff]   ;;  %16556 = vst [vmem:[#allocation25_spill] sm:$0xff] %v14537_v8 }
 0x52a   : > { %4283 = vmatpush1.bf16.msra.mxu0 %v14398_v52  ;;  %v4172_v52 = vld [vmem:[%s12328_s27 + $0x1c8] sm:$0xff] }
 0x52b   : > { %4284 = vmatprep.subr.bf16.mxu0 %v14410_v30  ;;  %v11494_v30 = vld [vmem:[%s16408_s3 + $0xa5c] ss:$20 sps:$4 sm:$0xff]  }
 0x52c   : > { %4901 = vmatprep.subr.bf16.mxu1 %v11494_v30  ;;  %v14458_v30 = vld [vmem:[%s16406_s1 + $0x1b0] ss:$8 sps:$4 sm:$0xff]  }
 0x52d   : > { %4902 = vmatpush1.bf16.msra.mxu1 %v11492_v29  ;;  %16548 = vst [vmem:[#allocation17_spill] sm:$0xff] %v14458_v30  ;;  %v14467_v29 = vld [vmem:[%s16406_s1 + $0x1c4] ss:$8 sps:$4 sm:$0xff]  }
 0x52e   : > { %4285 = vmatpush1.bf16.msra.mxu0 %v14422_v45  ;;  %v11500_v45 = vld [vmem:[%s16408_s3 + $0xa84] ss:$20 sps:$4 sm:$0xff]   ;;  %16549 = vst [vmem:[#allocation18_spill] sm:$0xff] %v14467_v29 }
 0x52f   : > { %4286 = vmatprep.subr.bf16.mxu0 %v14431_v28  ;;  %v11498_v28 = vld [vmem:[%s16408_s3 + $0xa80] ss:$20 sps:$4 sm:$0xff]   ;;  %4903 = vmatprep.subr.bf16.mxu1 %v11500_v45 }
 0x530   : > { %v14476_v45 = vld [vmem:[%s16406_s1 + $0x1c0] ss:$8 sps:$4 sm:$0xff]  }
 0x531   : > { %4904 = vmatpush1.bf16.msra.mxu1 %v11498_v28  ;;  %16550 = vst [vmem:[#allocation19_spill] sm:$0xff] %v14476_v45  ;;  %v14485_v28 = vld [vmem:[%s16406_s1 + $0x1d4] ss:$8 sps:$4 sm:$0xff]  }
 0x532   : > { %4287 = vmatpush1.bf16.msra.mxu0 %v14440_v32  ;;  %v11506_v32 = vld [vmem:[%s16408_s3 + $0xaac] ss:$20 sps:$4 sm:$0xff]   ;;  %16551 = vst [vmem:[#allocation20_spill] sm:$0xff] %v14485_v28 }
 0x533   : > { %4288 = vmatprep.subr.bf16.mxu0 %v14449_v43  ;;  %v11504_v43 = vld [vmem:[%s16408_s3 + $0xaa8] ss:$20 sps:$4 sm:$0xff]   ;;  %4905 = vmatprep.subr.bf16.mxu1 %v11506_v32  ;;  %v14494_v32 = vld [vmem:[%s16406_s1 + $0x1d0] ss:$8 sps:$4 sm:$0xff]  }
 0x534   : > { %16552 = vst [vmem:[#allocation21_spill] sm:$0xff] %v14494_v32 }
 0x535   : > { %4906 = vmatpush1.bf16.msra.mxu1 %v11504_v43  ;;  %v14503_v43 = vld [vmem:[%s16406_s1 + $0x1e4] ss:$8 sps:$4 sm:$0xff]  }
 0x536   : > { %4289 = vmatpush1.bf16.msra.mxu0 %v14458_v30  ;;  %v11512_v30 = vld [vmem:[%s16408_s3 + $0xad4] ss:$20 sps:$4 sm:$0xff]   ;;  %16553 = vst [vmem:[#allocation22_spill] sm:$0xff] %v14503_v43 }
 0x537   : > { %4290 = vmatprep.subr.bf16.mxu0 %v14467_v29  ;;  %v11510_v29 = vld [vmem:[%s16408_s3 + $0xad0] ss:$20 sps:$4 sm:$0xff]   ;;  %4907 = vmatprep.subr.bf16.mxu1 %v11512_v30  ;;  %v14512_v30 = vld [vmem:[%s16406_s1 + $0x1e0] ss:$8 sps:$4 sm:$0xff]  }
 0x538   : > { %16554 = vst [vmem:[#allocation23_spill] sm:$0xff] %v14512_v30 }
 0x539   : > { %4908 = vmatpush1.bf16.msra.mxu1 %v11510_v29  ;;  %v14521_v29 = vld [vmem:[%s16406_s1 + $0x1f4] ss:$8 sps:$4 sm:$0xff]  }
 0x53a   : > { %4291 = vmatpush1.bf16.msra.mxu0 %v14476_v45  ;;  %v11518_v45 = vld [vmem:[%s16408_s3 + $0xafc] ss:$20 sps:$4 sm:$0xff]   ;;  %16555 = vst [vmem:[#allocation24_spill] sm:$0xff] %v14521_v29 }
 0x53b   : > { %4292 = vmatprep.subr.bf16.mxu0 %v14485_v28  ;;  %v11516_v28 = vld [vmem:[%s16408_s3 + $0xaf8] ss:$20 sps:$4 sm:$0xff]   ;;  %4909 = vmatprep.subr.bf16.mxu1 %v11518_v45  ;;  %v9504_v45 = vcombine.low %v14304_v41, %v14307_v42 }
 0x53c   : > { %v11491_v41 = vld [vmem:[%s16408_s3 + $0xa2c] ss:$20 sps:$4 sm:$0xff]  }
 0x53d   : > { %4910 = vmatpush1.bf16.msra.mxu1 %v11516_v28  ;;  %v11530_v42 = vld [vmem:[%s16408_s3 + $0xb4c] ss:$20 sps:$4 sm:$0xff]   ;;  %v11528_v28 = vld [vmem:[%s16408_s3 + $0xb48] ss:$20 sps:$4 sm:$0xff]  }
 0x53e   : > { %4293 = vmatpush1.bf16.msra.mxu0 %v14494_v32  ;;  %v11524_v32 = vld [vmem:[%s16408_s3 + $0xb24] ss:$20 sps:$4 sm:$0xff]  }
 0x53f   : > { %4294 = vmatprep.subr.bf16.mxu0 %v14503_v43  ;;  %v4170_v43 = vld [vmem:[%s12328_s27 + $0x148] sm:$0xff]  ;;  %4911 = vmatprep.subr.bf16.mxu1 %v11524_v32 }
 0x540   : > { %v11536_v32 = vld [vmem:[%s16408_s3 + $0xb74] ss:$20 sps:$4 sm:$0xff]  }
 0x542   : > { %4295 = vmatpush1.bf16.msra.mxu0 %v14512_v30  ;;  %v11522_v30 = vld [vmem:[%s16408_s3 + $0xb20] ss:$20 sps:$4 sm:$0xff]  }
 0x543   : > { %4296 = vmatprep.subr.bf16.mxu0 %v14521_v29  ;;  %v9509_v29 = vcombine.high %v4170_v43, %v4172_v52  ;;  %4912 = vmatpush1.bf16.msra.mxu1 %v11522_v30  ;;  %v9508_v30 = vcombine.low %v4170_v43, %v4172_v52  ;;  %v11503_v52 = vld [vmem:[%s16408_s3 + $0xa7c] ss:$20 sps:$4 sm:$0xff]   ;;  %v11540_v43 = vld [vmem:[%s16408_s3 + $0xb98] ss:$20 sps:$4 sm:$0xff]  }
 0x544   : > { %4913 = vmatprep.subr.bf16.mxu1 %v11530_v42  ;;  %v11501_v42 = vld [vmem:[%s16408_s3 + $0xa78] ss:$20 sps:$4 sm:$0xff]  }
 0x546   : > { %4297 = vmatpush1.bf16.msra.mxu0 %v14537_v8  ;;  %v11572_v8 = vld [vmem:[%s16408_s3 + $0xc64] ss:$20 sps:$4 sm:$0xff]  }
 0x547   : > { %4844 = vmatprep.subr.bf16.mxu0 %v11485_v61  ;;  %v11489_v61 = vld [vmem:[%s16408_s3 + $0xa28] ss:$20 sps:$4 sm:$0xff]   ;;  %4914 = vmatpush1.bf16.msra.mxu1 %v11528_v28  ;;  %v11548_v28 = vld [vmem:[%s16408_s3 + $0xbc4] ss:$20 sps:$4 sm:$0xff]  }
 0x548   : > { %4915 = vmatprep.subr.bf16.mxu1 %v11536_v32  ;;  %v11546_v32 = vld [vmem:[%s16408_s3 + $0xbc0] ss:$20 sps:$4 sm:$0xff]  }
 0x549   : > { %4299 = vmatmul.mubr.bf16.vlgmr.msra.gmra.mrb[40].mxu0 %v9504_v45  ;;  %v11497_v45 = vld [vmem:[%s16408_s3 + $0xa54] ss:$20 sps:$4 sm:$0xff]  }
 0x54a   : > { %4308 = vmatprep.mubr.bf16.mxu0 %v9509_v29  ;;  %4845 = vmatpush1.bf16.msra.mxu0 %v11483_v1  ;;  %v11534_v1 = vld [vmem:[%s16408_s3 + $0xb70] ss:$20 sps:$4 sm:$0xff]  }
 0x54b   : > { %4846 = vmatprep.subr.bf16.mxu0 %v11491_v41  ;;  %v11495_v29 = vld [vmem:[%s16408_s3 + $0xa50] ss:$20 sps:$4 sm:$0xff]   ;;  %4916 = vmatpush1.bf16.msra.mxu1 %v11534_v1  ;;  %v11515_v1 = vld [vmem:[%s16408_s3 + $0xacc] ss:$20 sps:$4 sm:$0xff]  }
 0x54c   : > { %v11542_v41 = vld [vmem:[%s16408_s3 + $0xb9c] ss:$20 sps:$4 sm:$0xff]  }
 0x54d   : > { %4917 = vmatprep.subr.bf16.mxu1 %v11542_v41  ;;  %v11513_v41 = vld [vmem:[%s16408_s3 + $0xac8] ss:$20 sps:$4 sm:$0xff]  }
 0x54e   : > { %4847 = vmatpush1.bf16.msra.mxu0 %v11489_v61  ;;  %v11509_v61 = vld [vmem:[%s16408_s3 + $0xaa4] ss:$20 sps:$4 sm:$0xff]  }
 0x54f   : > { %4848 = vmatprep.subr.bf16.mxu0 %v11497_v45  ;;  %4918 = vmatpush1.bf16.msra.mxu1 %v11540_v43  ;;  %v11507_v45 = vld [vmem:[%s16408_s3 + $0xaa0] ss:$20 sps:$4 sm:$0xff]  }
 0x550   : > { %4919 = vmatprep.subr.bf16.mxu1 %v11548_v28  ;;  %v11521_v43 = vld [vmem:[%s16408_s3 + $0xaf4] ss:$20 sps:$4 sm:$0xff]   ;;  %v11519_v28 = vld [vmem:[%s16408_s3 + $0xaf0] ss:$20 sps:$4 sm:$0xff]  }
 0x551   : > { %4309 = vmatmul.mubr.bf16.gmra.mrb[44].mxu0 %v9508_v30  ;;  %v11554_v30 = vld [vmem:[%s16408_s3 + $0xbec] ss:$20 sps:$4 sm:$0xff]  }
 0x552   : > { %4849 = vmatpush1.bf16.msra.mxu0 %v11495_v29  ;;  %v11552_v29 = vld [vmem:[%s16408_s3 + $0xbe8] ss:$20 sps:$4 sm:$0xff]  }
 0x553   : > { %4850 = vmatprep.subr.bf16.mxu0 %v11503_v52  ;;  %4920 = vmatpush1.bf16.msra.mxu1 %v11546_v32  ;;  %v11560_v52 = vld [vmem:[%s16408_s3 + $0xc14] ss:$20 sps:$4 sm:$0xff]   ;;  %v11525_v32 = vld [vmem:[%s16408_s3 + $0xb18] ss:$20 sps:$4 sm:$0xff]  }
 0x554   : > { %4921 = vmatprep.subr.bf16.mxu1 %v11554_v30  ;;  %v11531_v30 = vld [vmem:[%s16408_s3 + $0xb40] ss:$20 sps:$4 sm:$0xff]  }
 0x556   : > { %4851 = vmatpush1.bf16.msra.mxu0 %v11501_v42  ;;  %v11558_v42 = vld [vmem:[%s16408_s3 + $0xc10] ss:$20 sps:$4 sm:$0xff]  }
 0x557   : > { %4852 = vmatprep.subr.bf16.mxu0 %v11509_v61  ;;  %4922 = vmatpush1.bf16.msra.mxu1 %v11552_v29  ;;  %v11527_v61 = vld [vmem:[%s16408_s3 + $0xb1c] ss:$20 sps:$4 sm:$0xff]  }
 0x558   : > { %4923 = vmatprep.subr.bf16.mxu1 %v11560_v52  ;;  %v11537_v29 = vld [vmem:[%s16408_s3 + $0xb68] ss:$20 sps:$4 sm:$0xff]   ;;  %v11543_v52 = vld [vmem:[%s16408_s3 + $0xb90] ss:$20 sps:$4 sm:$0xff]  }
 0x55a   : > { %4853 = vmatpush1.bf16.msra.mxu0 %v11507_v45  ;;  %v11533_v45 = vld [vmem:[%s16408_s3 + $0xb44] ss:$20 sps:$4 sm:$0xff]  }
 0x55b   : > { %4854 = vmatprep.subr.bf16.mxu0 %v11515_v1  ;;  %4924 = vmatpush1.bf16.msra.mxu1 %v11558_v42  ;;  %v11539_v1 = vld [vmem:[%s16408_s3 + $0xb6c] ss:$20 sps:$4 sm:$0xff]  }
 0x55c   : > { %v11549_v42 = vld [vmem:[%s16408_s3 + $0xbb8] ss:$20 sps:$4 sm:$0xff]  }
 0x55e   : > { %4855 = vmatpush1.bf16.msra.mxu0 %v11513_v41  ;;  %v11545_v41 = vld [vmem:[%s16408_s3 + $0xb94] ss:$20 sps:$4 sm:$0xff]  }
 0x55f   : > { %4856 = vmatprep.subr.bf16.mxu0 %v11521_v43  ;;  %v11551_v43 = vld [vmem:[%s16408_s3 + $0xbbc] ss:$20 sps:$4 sm:$0xff]  }
 0x562   : > { %4857 = vmatpush1.bf16.msra.mxu0 %v11519_v28  ;;  %v11557_v28 = vld [vmem:[%s16408_s3 + $0xbe4] ss:$20 sps:$4 sm:$0xff]  }
 0x563   : > { %4858 = vmatprep.subr.bf16.mxu0 %v11527_v61  ;;  %v11555_v61 = vld [vmem:[%s16408_s3 + $0xbe0] ss:$20 sps:$4 sm:$0xff]  }
 0x566   : > { %4859 = vmatpush1.bf16.msra.mxu0 %v11525_v32  ;;  %v11563_v32 = vld [vmem:[%s16408_s3 + $0xc0c] ss:$20 sps:$4 sm:$0xff]  }
 0x567   : > { %4860 = vmatprep.subr.bf16.mxu0 %v11533_v45  ;;  %v11561_v45 = vld [vmem:[%s16408_s3 + $0xc08] ss:$20 sps:$4 sm:$0xff]  }
 0x56a   : > { %4861 = vmatpush1.bf16.msra.mxu0 %v11531_v30 }
 0x56b   : > { %4862 = vmatprep.subr.bf16.mxu0 %v11539_v1  ;;  %v11566_v1 = vld [vmem:[%s16408_s3 + $0xc3c] ss:$20 sps:$4 sm:$0xff]  }
 0x56c   : > { %4925 = vmatprep.subr.bf16.mxu1 %v11566_v1  ;;  %v11575_v1 = vld [vmem:[%s16408_s3 + $0xc5c] ss:$20 sps:$4 sm:$0xff]  }
 0x56e   : > { %4863 = vmatpush1.bf16.msra.mxu0 %v11537_v29 }
 0x56f   : > { %4864 = vmatprep.subr.bf16.mxu0 %v11545_v41  ;;  %v11564_v41 = vld [vmem:[%s16408_s3 + $0xc38] ss:$20 sps:$4 sm:$0xff]  }
 0x570   : > { %4926 = vmatpush1.bf16.msra.mxu1 %v11564_v41 }
 0x571   : > { %4927 = vmatprep.subr.bf16.mxu1 %v11572_v8 }
 0x572   : > { %4865 = vmatpush1.bf16.msra.mxu0 %v11543_v52  ;;  %v11569_v52 = vld [vmem:[%s16408_s3 + $0xc34] ss:$20 sps:$4 sm:$0xff]  }
 0x573   : > { %4866 = vmatprep.subr.bf16.mxu0 %v11551_v43 }
 0x576   : > { %4867 = vmatpush1.bf16.msra.mxu0 %v11549_v42 }
 0x577   : > { %4868 = vmatprep.subr.bf16.mxu0 %v11557_v28  ;;  %v11567_v28 = vld [vmem:[%s16408_s3 + $0xc30] ss:$20 sps:$4 sm:$0xff]  }
 0x57a   : > { %4869 = vmatpush1.bf16.msra.mxu0 %v11555_v61 }
 0x57b   : > { %4870 = vmatprep.subr.bf16.mxu0 %v11563_v32 }
 0x57e   : > { %4871 = vmatpush1.bf16.msra.mxu0 %v11561_v45 }
 0x57f   : > { %4872 = vmatprep.subr.bf16.mxu0 %v11569_v52  ;;  %v11576_v52 = vld [vmem:[%s16408_s3 + $0xb50] ss:$20 sps:$4 sm:$0xff]  }
 0x582   : > { %4873 = vmatpush1.bf16.msra.mxu0 %v11567_v28 }
 0x583   : > { %4874 = vmatprep.subr.bf16.mxu0 %v11575_v1 }
 0x59c   : > { %v10433_v30 = vpop.f32.mrb[32].mxu0 }
 0x59d   : > { %v10434_v29 = vpop.f32.mrb[33].mxu0 }
 0x59e   : > { %v10435_v43 = vadd.f32 %v10434_v29, %v10433_v30  ;;  %v10436_v42 = vpop.f32.mrb[34].mxu0  ;;  %v11570_v30 = vld [vmem:[%s16408_s3 + $0xc60] ss:$20 sps:$4 sm:$0xff]  }
 0x59f   : > { %v10437_v61 = vpop.f32.mrb[35].mxu0  ;;  %4928 = vmatpush1.bf16.msra.mxu1 %v11570_v30 }
 0x5a0   : > { %v14670_v32 = vadd.f32 %v10435_v43, %v14002_v5  ;;  %v10438_v45 = vadd.f32 %v10437_v61, %v10436_v42  ;;  %v11573_v5 = vld [vmem:[%s16408_s3 + $0xc58] ss:$20 sps:$4 sm:$0xff]   ;;  %10445 = vmatprep.subr.bf16.mxu1 %v11576_v52 }
 0x5a1   : > { %4875 = vmatpush1.bf16.msra.mxu0 %v11573_v5 }
 0x5a2   : > { %16557 = vst [vmem:[#allocation26_spill] sm:$0xff] %v14670_v32  ;;  %v14682_v29 = vadd.f32 %v10438_v45, %v14014_v56 }
 0x5a4   : > { %16558 = vst [vmem:[#allocation27_spill] sm:$0xff] %v14682_v29  ;;  %v10439_v41 = vpop.f32.mrb[36].mxu0 }
 0x5a5   : > { %v10440_v43 = vpop.f32.mrb[37].mxu0 }
 0x5a6   : > { %v10441_v42 = vadd.f32 %v10440_v43, %v10439_v41  ;;  %v10442_v28 = vpop.f32.mrb[38].mxu0 }
 0x5a7   : > { %v10443_v61 = vpop.f32.mrb[39].mxu0 }
 0x5a8   : > { %v14691_v56 = vadd.f32 %v10441_v42, %v14023_v6  ;;  %v10444_v8 = vadd.f32 %v10443_v61, %v10442_v28 }
 0x5aa   : > { %v14694_v45 = vadd.f32 %v10444_v8, %v14026_v62  ;;  %v11577_v8 = vld [vmem:[%s16408_s3 + $0xa10] ss:$20 sps:$4 sm:$0xff]  }
 0x61c   : > { %v4300_v1 = vpop.f32.mrb[40].mxu0 }
 0x61d   : > { %v10719_v30 = vadd.f32 %v4300_v1, %v12739_v39  ;;  %v4302_v5 = vpop.f32.mrb[41].mxu0 }
 0x61e   : > { %v10720_v29 = vadd.f32 %v4302_v5, %v12742_v40  ;;  %v4304_v32 = vpop.f32.mrb[42].mxu0 }
 0x61f   : > { %v10721_v0 = vadd.f32 %v4304_v32, %v12739_v39  ;;  %v4306_v41 = vpop.f32.mrb[43].mxu0  ;;  %v4319_v43 = vmax.f32 %v10719_v30, 0.0  ;;  %v11578_v32 = vld [vmem:[%s16408_s3 + $0xb78] ss:$20 sps:$4 sm:$0xff]  }
 0x620   : > { %v10722_v52 = vadd.f32 %v4306_v41, %v12742_v40  ;;  %v4320_v6 = vmax.f32 %v10720_v29, 0.0 }
 0x621   : > { %v4321_v63 = vmax.f32 %v10721_v0, 0.0 }
 0x622   : > { %v4322_v42 = vmax.f32 %v10722_v52, 0.0  ;;  %v11579_v52 = vld [vmem:[%s16408_s3 + $0xa38] ss:$20 sps:$4 sm:$0xff]  }
 0x623   : > { %v4327_v28 = vpack.c.bf16 %v4321_v63, %v4319_v43 }
 0x624   : > { %v4328_v61 = vpack.c.bf16 %v4322_v42, %v4320_v6  ;;  %v4310_v62 = vpop.f32.mrb[44].mxu0  ;;  %v11580_v42 = vld [vmem:[%s16408_s3 + $0xba0] ss:$20 sps:$4 sm:$0xff]  }
 0x625   : > { %v10723_v1 = vadd.f32 %v4310_v62, %v12739_v39  ;;  %v4312_v5 = vpop.f32.mrb[45].mxu0 }
 0x626   : > { %v10724_v41 = vadd.f32 %v4312_v5, %v12742_v40  ;;  %v4314_v30 = vpop.f32.mrb[46].mxu0  ;;  %4876 = vmatprep.mubr.bf16.mxu0 %v4328_v61  ;;  %4929 = vmatprep.mubr.bf16.mxu1 %v4328_v61 }
 0x627   : > { %v10725_v63 = vadd.f32 %v4314_v30, %v12739_v39  ;;  %v4316_v0 = vpop.f32.mrb[47].mxu0  ;;  %4877 = vmatmul.mubr.bf16.vlgmr.msra.gmra.mrb[8].mxu0 %v4327_v28  ;;  %4930 = vmatmul.mubr.bf16.vlgmr.msra.gmra.mrb[8].mxu1 %v4327_v28  ;;  %v4323_v43 = vmax.f32 %v10723_v1, 0.0  ;;  %v11582_v1 = vld [vmem:[%s16408_s3 + $0xbc8] ss:$20 sps:$4 sm:$0xff]  }
 0x628   : > { %v10726_v29 = vadd.f32 %v4316_v0, %v12742_v40  ;;  %10446 = vmatpush3.bf16.msra.mxu1 %v11577_v8  ;;  %v4324_v62 = vmax.f32 %v10724_v41, 0.0  ;;  %v11581_v8 = vld [vmem:[%s16408_s3 + $0xa60] ss:$20 sps:$4 sm:$0xff]   ;;  %v11584_v41 = vld [vmem:[%s16408_s3 + $0xbf0] ss:$20 sps:$4 sm:$0xff]  }
 0x629   : > { %v4325_v6 = vmax.f32 %v10725_v63, 0.0  ;;  %10447 = vmatprep.subr.bf16.mxu1 %v11578_v32  ;;  %v11583_v32 = vld [vmem:[%s16408_s3 + $0xa88] ss:$20 sps:$4 sm:$0xff]   ;;  %v11585_v63 = vld [vmem:[%s16408_s3 + $0xab0] ss:$20 sps:$4 sm:$0xff]  }
 0x62a   : > { %v4326_v5 = vmax.f32 %v10726_v29, 0.0  ;;  %v11586_v0 = vld [vmem:[%s16408_s3 + $0xc18] ss:$20 sps:$4 sm:$0xff]   ;;  %v11588_v29 = vld [vmem:[%s16408_s3 + $0xc40] ss:$20 sps:$4 sm:$0xff]  }
 0x62b   : > { %v4329_v30 = vpack.c.bf16 %v4325_v6, %v4323_v43  ;;  %v11590_v43 = vld [vmem:[%s16408_s3 + $0xc68] ss:$20 sps:$4 sm:$0xff]  }
 0x62c   : > { %v4330_v39 = vpack.c.bf16 %v4326_v5, %v4324_v62  ;;  %10448 = vmatpush3.bf16.msra.mxu1 %v11579_v52  ;;  %v11589_v52 = vld [vmem:[%s16408_s3 + $0xb00] ss:$20 sps:$4 sm:$0xff]   ;;  %v11591_v6 = vld [vmem:[%s16408_s3 + $0xb28] ss:$20 sps:$4 sm:$0xff]  }
 0x62d   : > { %10449 = vmatprep.subr.bf16.mxu1 %v11580_v42  ;;  %v5019_v42 = vld [vmem:[%s12328_s27 + $0x50] sm:$0xff] }
 0x62e   : > { %4886 = vmatprep.mubr.bf16.mxu0 %v4330_v39  ;;  %4939 = vmatprep.mubr.bf16.mxu1 %v4330_v39  ;;  %v5021_v62 = vld [vmem:[%s12328_s27 + $0xd0] sm:$0xff] }
 0x62f   : > { %4887 = vmatmul.mubr.bf16.gmra.mrb[12].mxu0 %v4329_v30  ;;  %4940 = vmatmul.mubr.bf16.gmra.mrb[12].mxu1 %v4329_v30  ;;  %v9687_v5 = vcombine.high %v5019_v42, %v5021_v62 }
 0x630   : > { %10450 = vmatpush3.bf16.msra.mxu1 %v11581_v8  ;;  %4982 = vmatprep.mubr.bf16.mxu1 %v4328_v61  ;;  %v11587_v61 = vld [vmem:[%s16408_s3 + $0xad8] ss:$20 sps:$4 sm:$0xff]  }
 0x631   : > { %10451 = vmatprep.subr.bf16.mxu1 %v11582_v1  ;;  %v16578_v8 = vld [vmem:[#allocation25_spill] sm:$0xff] }
 0x634   : > { %10452 = vmatpush3.bf16.msra.mxu1 %v11583_v32  ;;  %v11595_v32 = vld [vmem:[%s16408_s3 + $0xc88] ss:$20 sps:$4 sm:$0xff]  }
 0x635   : > { %10453 = vmatprep.subr.bf16.mxu1 %v11584_v41  ;;  %v11603_v41 = vld [vmem:[%s16408_s3 + $0xcb4] ss:$20 sps:$4 sm:$0xff]  }
 0x638   : > { %10454 = vmatpush3.bf16.msra.mxu1 %v11585_v63  ;;  %v11642_v63 = vld [vmem:[%s16408_s3 + $0xdc4] ss:$20 sps:$4 sm:$0xff]  }
 0x639   : > { %10455 = vmatprep.subr.bf16.mxu1 %v11586_v0  ;;  %v11640_v0 = vld [vmem:[%s16408_s3 + $0xdc0] ss:$20 sps:$4 sm:$0xff]  }
 0x63c   : > { %10456 = vmatpush3.bf16.msra.mxu1 %v11587_v61  ;;  %v11601_v61 = vld [vmem:[%s16408_s3 + $0xcb0] ss:$20 sps:$4 sm:$0xff]  }
 0x63d   : > { %10457 = vmatprep.subr.bf16.mxu1 %v11588_v29  ;;  %v11648_v29 = vld [vmem:[%s16408_s3 + $0xdec] ss:$20 sps:$4 sm:$0xff]  }
 0x640   : > { %10458 = vmatpush3.bf16.msra.mxu1 %v11589_v52  ;;  %v11609_v52 = vld [vmem:[%s16408_s3 + $0xcdc] ss:$20 sps:$4 sm:$0xff]  }
 0x641   : > { %10459 = vmatprep.subr.bf16.mxu1 %v11590_v43 }
 0x644   : > { %10460 = vmatpush3.bf16.msra.mxu1 %v11591_v6  ;;  %v11646_v6 = vld [vmem:[%s16408_s3 + $0xde8] ss:$20 sps:$4 sm:$0xff]  }
 0x645   : > { %5067 = vmatprep.subr.bf16.mxu1 %v14084_v2  ;;  %v5025_v2 = vld [vmem:[%s12328_s27 + $0x1d0] sm:$0xff] }
 0x647   : > { %4983 = vmatmul.mubr.bf16.vlgmr.msra.gmra.mrb[40].mxu1 %v4327_v28 }
 0x648   : > { %4990 = vmatprep.mubr.bf16.mxu1 %v4330_v39  ;;  %5068 = vmatpush1.bf16.msra.mxu1 %v14090_v4  ;;  %v5023_v39 = vld [vmem:[%s12328_s27 + $0x150] sm:$0xff]  ;;  %v9686_v4 = vcombine.low %v5019_v42, %v5021_v62  ;;  %v11607_v42 = vld [vmem:[%s16408_s3 + $0xcd8] ss:$20 sps:$4 sm:$0xff]  }
 0x649   : > { %5069 = vmatprep.subr.bf16.mxu1 %v14096_v7  ;;  %v9691_v7 = vcombine.high %v5023_v39, %v5025_v2  ;;  %v11654_v62 = vld [vmem:[%s16408_s3 + $0xe14] ss:$20 sps:$4 sm:$0xff]  }
 0x64c   : > { %5070 = vmatpush1.bf16.msra.mxu1 %v14108_v13  ;;  %v14789_v13 = vld [vmem:[%s12328_s27 + $0x58] sm:$0xff] }
 0x64d   : > { %5071 = vmatprep.subr.bf16.mxu1 %v14116_v9  ;;  %v14792_v9 = vld [vmem:[%s12328_s27 + $0xd8] sm:$0xff] }
 0x64e   : > { %v9688_v28 = vcombine.low %v14789_v13, %v14792_v9 }
 0x64f   : > { %4991 = vmatmul.mubr.bf16.gmra.mrb[44].mxu1 %v4329_v30  ;;  %v11634_v30 = vld [vmem:[%s16408_s3 + $0xd98] ss:$20 sps:$4 sm:$0xff]  }
 0x650   : > { %5072 = vmatpush1.bf16.msra.mxu1 %v14122_v3  ;;  %5099 = vmatprep.mubr.bf16.mxu1 %v9687_v5  ;;  %v9690_v3 = vcombine.low %v5023_v39, %v5025_v2  ;;  %v11615_v5 = vld [vmem:[%s16408_s3 + $0xd04] ss:$20 sps:$4 sm:$0xff]   ;;  %v11613_v2 = vld [vmem:[%s16408_s3 + $0xd00] ss:$20 sps:$4 sm:$0xff]  }
 0x651   : > { %5073 = vmatprep.subr.bf16.mxu1 %v14128_v11  ;;  %v9689_v11 = vcombine.high %v14789_v13, %v14792_v9  ;;  %v11652_v39 = vld [vmem:[%s16408_s3 + $0xe10] ss:$20 sps:$4 sm:$0xff]   ;;  %v11658_v13 = vld [vmem:[%s16408_s3 + $0xe38] ss:$20 sps:$4 sm:$0xff]   ;;  %v11619_v9 = vld [vmem:[%s16408_s3 + $0xd28] ss:$20 sps:$4 sm:$0xff]  }
 0x654   : > { %5074 = vmatpush1.bf16.msra.mxu1 %v14134_v12  ;;  %v16559_v12 = vld [vmem:[#allocation6_spill] sm:$0xff] }
 0x655   : > { %5075 = vmatprep.subr.bf16.mxu1 %v14140_v10  ;;  %v16560_v10 = vld [vmem:[#allocation7_spill] sm:$0xff] }
 0x658   : > { %5076 = vmatpush1.bf16.msra.mxu1 %v14146_v35  ;;  %v16561_v35 = vld [vmem:[#allocation8_spill] sm:$0xff] }
 0x659   : > { %5077 = vmatprep.subr.bf16.mxu1 %v14152_v17  ;;  %v16562_v17 = vld [vmem:[#allocation9_spill] sm:$0xff] }
 0x65c   : > { %5078 = vmatpush1.bf16.msra.mxu1 %v14158_v60  ;;  %v16563_v60 = vld [vmem:[#allocation10_spill] sm:$0xff] }
 0x65d   : > { %5079 = vmatprep.subr.bf16.mxu1 %v14164_v37  ;;  %v16564_v37 = vld [vmem:[#allocation11_spill] sm:$0xff] }
 0x660   : > { %5080 = vmatpush1.bf16.msra.mxu1 %v14170_v54  ;;  %v11592_v54 = vld [vmem:[%s16408_s3 + $0xc80] ss:$20 sps:$4 sm:$0xff]  }
 0x661   : > { %5081 = vmatprep.subr.bf16.mxu1 %v14176_v38  ;;  %v11594_v38 = vld [vmem:[%s16408_s3 + $0xc84] ss:$20 sps:$4 sm:$0xff]  }
 0x662   : > { %5698 = vmatprep.subr.bf16.mxu0 %v11594_v38  ;;  %v11637_v38 = vld [vmem:[%s16408_s3 + $0xda0] ss:$20 sps:$4 sm:$0xff]  }
 0x663   : > { %5699 = vmatpush1.bf16.msra.mxu0 %v11592_v54  ;;  %v11639_v54 = vld [vmem:[%s16408_s3 + $0xda4] ss:$20 sps:$4 sm:$0xff]  }
 0x664   : > { %5082 = vmatpush1.bf16.msra.mxu1 %v14182_v15  ;;  %v16565_v15 = vld [vmem:[#allocation12_spill] sm:$0xff] }
 0x665   : > { %5083 = vmatprep.subr.bf16.mxu1 %v14188_v16  ;;  %v11600_v16 = vld [vmem:[%s16408_s3 + $0xcac] ss:$20 sps:$4 sm:$0xff]  }
 0x666   : > { %5700 = vmatprep.subr.bf16.mxu0 %v11600_v16  ;;  %v11643_v16 = vld [vmem:[%s16408_s3 + $0xdc8] ss:$20 sps:$4 sm:$0xff]  }
 0x668   : > { %5084 = vmatpush1.bf16.msra.mxu1 %v14194_v18  ;;  %v11598_v18 = vld [vmem:[%s16408_s3 + $0xca8] ss:$20 sps:$4 sm:$0xff]  }
 0x669   : > { %5085 = vmatprep.subr.bf16.mxu1 %v14200_v49  ;;  %v16566_v49 = vld [vmem:[#allocation13_spill] sm:$0xff]  ;;  %5701 = vmatpush1.bf16.msra.mxu0 %v11598_v18  ;;  %v11651_v18 = vld [vmem:[%s16408_s3 + $0xdf4] ss:$20 sps:$4 sm:$0xff]  }
 0x66c   : > { %5086 = vmatpush1.bf16.msra.mxu1 %v14206_v19  ;;  %v11606_v19 = vld [vmem:[%s16408_s3 + $0xcd4] ss:$20 sps:$4 sm:$0xff]  }
 0x66d   : > { %5087 = vmatprep.subr.bf16.mxu1 %v14212_v20  ;;  %v16567_v20 = vld [vmem:[#allocation14_spill] sm:$0xff]  ;;  %5702 = vmatprep.subr.bf16.mxu0 %v11606_v19  ;;  %v11657_v19 = vld [vmem:[%s16408_s3 + $0xe1c] ss:$20 sps:$4 sm:$0xff]  }
 0x670   : > { %5088 = vmatpush1.bf16.msra.mxu1 %v14218_v21  ;;  %v11604_v21 = vld [vmem:[%s16408_s3 + $0xcd0] ss:$20 sps:$4 sm:$0xff]  }
 0x671   : > { %5089 = vmatprep.subr.bf16.mxu1 %v14224_v14  ;;  %v16568_v14 = vld [vmem:[#allocation15_spill] sm:$0xff]  ;;  %5703 = vmatpush1.bf16.msra.mxu0 %v11604_v21  ;;  %v11663_v21 = vld [vmem:[%s16408_s3 + $0xe44] ss:$20 sps:$4 sm:$0xff]  }
 0x674   : > { %5090 = vmatpush1.bf16.msra.mxu1 %v14230_v22  ;;  %v11612_v22 = vld [vmem:[%s16408_s3 + $0xcfc] ss:$20 sps:$4 sm:$0xff]  }
 0x675   : > { %5091 = vmatprep.subr.bf16.mxu1 %v14236_v46  ;;  %v16569_v46 = vld [vmem:[#allocation16_spill] sm:$0xff]  ;;  %5704 = vmatprep.subr.bf16.mxu0 %v11612_v22  ;;  %v11669_v22 = vld [vmem:[%s16408_s3 + $0xe6c] ss:$20 sps:$4 sm:$0xff]  }
 0x678   : > { %5092 = vmatpush1.bf16.msra.mxu1 %v14242_v23  ;;  %v11610_v23 = vld [vmem:[%s16408_s3 + $0xcf8] ss:$20 sps:$4 sm:$0xff]  }
 0x679   : > { %5093 = vmatprep.subr.bf16.mxu1 %v14248_v53  ;;  %v16570_v53 = vld [vmem:[#allocation17_spill] sm:$0xff]  ;;  %5705 = vmatpush1.bf16.msra.mxu0 %v11610_v23  ;;  %v11675_v23 = vld [vmem:[%s16408_s3 + $0xe94] ss:$20 sps:$4 sm:$0xff]  }
 0x67c   : > { %5094 = vmatpush1.bf16.msra.mxu1 %v14254_v24  ;;  %v11618_v24 = vld [vmem:[%s16408_s3 + $0xd24] ss:$20 sps:$4 sm:$0xff]  }
 0x67d   : > { %5095 = vmatprep.subr.bf16.mxu1 %v14260_v25  ;;  %v16571_v25 = vld [vmem:[#allocation18_spill] sm:$0xff]  ;;  %5706 = vmatprep.subr.bf16.mxu0 %v11618_v24 }
 0x680   : > { %5096 = vmatpush1.bf16.msra.mxu1 %v14266_v26  ;;  %v11616_v26 = vld [vmem:[%s16408_s3 + $0xd20] ss:$20 sps:$4 sm:$0xff]  }
 0x681   : > { %5097 = vmatprep.subr.bf16.mxu1 %v14272_v27  ;;  %v16572_v27 = vld [vmem:[#allocation19_spill] sm:$0xff]  ;;  %5707 = vmatpush1.bf16.msra.mxu0 %v11616_v26 }
 0x684   : > { %5098 = vmatpush1.bf16.msra.mxu1 %v14282_v31  ;;  %v11624_v31 = vld [vmem:[%s16408_s3 + $0xd4c] ss:$20 sps:$4 sm:$0xff]  }
 0x685   : > { %5120 = vmatprep.subr.bf16.mxu1 %v14288_v33  ;;  %v16573_v33 = vld [vmem:[#allocation20_spill] sm:$0xff]  ;;  %5708 = vmatprep.subr.bf16.mxu0 %v11624_v31 }
 0x686   : > { %v11681_v31 = vld [vmem:[%s16408_s3 + $0xebc] ss:$20 sps:$4 sm:$0xff]  }
 0x687   : > { %5100 = vmatmul.mubr.bf16.vlgmr.msra.gmra.mrb[48].mxu1 %v9686_v4  ;;  %v11660_v4 = vld [vmem:[%s16408_s3 + $0xe3c] ss:$20 sps:$4 sm:$0xff]  }
 0x688   : > { %5121 = vmatpush1.bf16.msra.mxu1 %v14294_v34  ;;  %5109 = vmatprep.mubr.bf16.mxu1 %v9691_v7  ;;  %v11622_v34 = vld [vmem:[%s16408_s3 + $0xd48] ss:$20 sps:$4 sm:$0xff]   ;;  %v11621_v7 = vld [vmem:[%s16408_s3 + $0xd2c] ss:$20 sps:$4 sm:$0xff]  }
 0x689   : > { %5122 = vmatprep.subr.bf16.mxu1 %v14300_v36  ;;  %v16574_v36 = vld [vmem:[#allocation21_spill] sm:$0xff]  ;;  %5709 = vmatpush1.bf16.msra.mxu0 %v11622_v34 }
 0x68c   : > { %5123 = vmatpush1.bf16.msra.mxu1 %v14312_v44  ;;  %v11630_v44 = vld [vmem:[%s16408_s3 + $0xd74] ss:$20 sps:$4 sm:$0xff]  }
 0x68d   : > { %5124 = vmatprep.subr.bf16.mxu1 %v14320_v47  ;;  %v16575_v47 = vld [vmem:[#allocation22_spill] sm:$0xff]  ;;  %5710 = vmatprep.subr.bf16.mxu0 %v11630_v44 }
 0x68f   : > { %5110 = vmatmul.mubr.bf16.gmra.mrb[52].mxu1 %v9690_v3  ;;  %v11666_v3 = vld [vmem:[%s16408_s3 + $0xe64] ss:$20 sps:$4 sm:$0xff]  }
 0x690   : > { %5125 = vmatpush1.bf16.msra.mxu1 %v14326_v48  ;;  %5152 = vmatprep.mubr.bf16.mxu1 %v9689_v11  ;;  %v11628_v48 = vld [vmem:[%s16408_s3 + $0xd70] ss:$20 sps:$4 sm:$0xff]   ;;  %v11627_v11 = vld [vmem:[%s16408_s3 + $0xd54] ss:$20 sps:$4 sm:$0xff]  }
 0x691   : > { %5126 = vmatprep.subr.bf16.mxu1 %v14332_v50  ;;  %v16576_v50 = vld [vmem:[#allocation23_spill] sm:$0xff]  ;;  %5711 = vmatpush1.bf16.msra.mxu0 %v11628_v48 }
 0x694   : > { %5127 = vmatpush1.bf16.msra.mxu1 %v14338_v51  ;;  %v11636_v51 = vld [vmem:[%s16408_s3 + $0xd9c] ss:$20 sps:$4 sm:$0xff]  }
 0x695   : > { %5128 = vmatprep.subr.bf16.mxu1 %v14344_v55  ;;  %v16577_v55 = vld [vmem:[#allocation24_spill] sm:$0xff]  ;;  %5712 = vmatprep.subr.bf16.mxu0 %v11636_v51 }
 0x696   : > { %5713 = vmatpush1.bf16.msra.mxu0 %v11634_v30  ;;  %v11684_v51 = vld [vmem:[%s16408_s3 + $0xedc] ss:$20 sps:$4 sm:$0xff]  }
 0x697   : > { %5714 = vmatprep.subr.bf16.mxu0 %v11642_v63 }
 0x698   : > { %5129 = vmatpush1.bf16.msra.mxu1 %v14350_v57  ;;  %v5024_v57 = vld [vmem:[%s12328_s27 + $0x158] sm:$0xff] }
 0x699   : > { %5130 = vmatprep.subr.bf16.mxu1 %v14356_v58  ;;  %v5026_v58 = vld [vmem:[%s12328_s27 + $0x1d8] sm:$0xff] }
 0x69a   : > { %v9693_v1 = vcombine.high %v5024_v57, %v5026_v58  ;;  %v9692_v43 = vcombine.low %v5024_v57, %v5026_v58  ;;  %5715 = vmatpush1.bf16.msra.mxu0 %v11640_v0  ;;  %v11687_v57 = vld [vmem:[%s16408_s3 + $0xee4] ss:$20 sps:$4 sm:$0xff]   ;;  %v16580_v58 = vld [vmem:[#allocation27_spill] sm:$0xff] }
 0x69b   : > { %5716 = vmatprep.subr.bf16.mxu0 %v11648_v29 }
 0x69c   : > { %5131 = vmatpush1.bf16.msra.mxu1 %v14362_v59  ;;  %v11597_v59 = vld [vmem:[%s16408_s3 + $0xc8c] ss:$20 sps:$4 sm:$0xff]  }
 0x69d   : > { %5132 = vmatprep.subr.bf16.mxu1 %v16559_v12  ;;  %v11664_v12 = vld [vmem:[%s16408_s3 + $0xe60] ss:$20 sps:$4 sm:$0xff]  }
 0x69e   : > { %5717 = vmatpush1.bf16.msra.mxu0 %v11646_v6 }
 0x69f   : > { %5718 = vmatprep.subr.bf16.mxu0 %v11654_v62 }
 0x6a0   : > { %5133 = vmatpush1.bf16.msra.mxu1 %v16560_v10  ;;  %v11625_v10 = vld [vmem:[%s16408_s3 + $0xd50] ss:$20 sps:$4 sm:$0xff]  }
 0x6a1   : > { %5134 = vmatprep.subr.bf16.mxu1 %v16561_v35  ;;  %v11672_v35 = vld [vmem:[%s16408_s3 + $0xe8c] ss:$20 sps:$4 sm:$0xff]  }
 0x6a2   : > { %5719 = vmatpush1.bf16.msra.mxu0 %v11652_v39 }
 0x6a3   : > { %5720 = vmatprep.subr.bf16.mxu0 %v11660_v4 }
 0x6a4   : > { %5135 = vmatpush1.bf16.msra.mxu1 %v16562_v17  ;;  %v11633_v17 = vld [vmem:[%s16408_s3 + $0xd7c] ss:$20 sps:$4 sm:$0xff]  }
 0x6a5   : > { %5136 = vmatprep.subr.bf16.mxu1 %v16563_v60  ;;  %v11670_v60 = vld [vmem:[%s16408_s3 + $0xe88] ss:$20 sps:$4 sm:$0xff]  }
 0x6a6   : > { %5721 = vmatpush1.bf16.msra.mxu0 %v11658_v13 }
 0x6a7   : > { %5722 = vmatprep.subr.bf16.mxu0 %v11666_v3 }
 0x6a8   : > { %5137 = vmatpush1.bf16.msra.mxu1 %v16564_v37  ;;  %v11631_v37 = vld [vmem:[%s16408_s3 + $0xd78] ss:$20 sps:$4 sm:$0xff]  }
 0x6a9   : > { %5138 = vmatprep.subr.bf16.mxu1 %v16565_v15  ;;  %v11645_v15 = vld [vmem:[%s16408_s3 + $0xdcc] ss:$20 sps:$4 sm:$0xff]  }
 0x6aa   : > { %5723 = vmatpush1.bf16.msra.mxu0 %v11664_v12  ;;  %v11689_v12 = vld [vmem:[%s16408_s3 + $0xc90] ss:$20 sps:$4 sm:$0xff]  }
 0x6ab   : > { %5724 = vmatprep.subr.bf16.mxu0 %v11672_v35 }
 0x6ac   : > { %5139 = vmatpush1.bf16.msra.mxu1 %v16566_v49  ;;  %v11649_v49 = vld [vmem:[%s16408_s3 + $0xdf0] ss:$20 sps:$4 sm:$0xff]  }
 0x6ad   : > { %5140 = vmatprep.subr.bf16.mxu1 %v16567_v20  ;;  %v11655_v20 = vld [vmem:[%s16408_s3 + $0xe18] ss:$20 sps:$4 sm:$0xff]  }
 0x6ae   : > { %5725 = vmatpush1.bf16.msra.mxu0 %v11670_v60 }
 0x6b0   : > { %5141 = vmatpush1.bf16.msra.mxu1 %v16568_v14  ;;  %v11661_v14 = vld [vmem:[%s16408_s3 + $0xe40] ss:$20 sps:$4 sm:$0xff]  }
 0x6b1   : > { %5142 = vmatprep.subr.bf16.mxu1 %v16569_v46  ;;  %v11667_v46 = vld [vmem:[%s16408_s3 + $0xe68] ss:$20 sps:$4 sm:$0xff]  }
 0x6b4   : > { %5143 = vmatpush1.bf16.msra.mxu1 %v16570_v53  ;;  %v11673_v53 = vld [vmem:[%s16408_s3 + $0xe90] ss:$20 sps:$4 sm:$0xff]  }
 0x6b5   : > { %5144 = vmatprep.subr.bf16.mxu1 %v16571_v25  ;;  %v11678_v25 = vld [vmem:[%s16408_s3 + $0xeb4] ss:$20 sps:$4 sm:$0xff]  }
 0x6b6   : > { %5726 = vmatprep.subr.bf16.mxu0 %v11678_v25  ;;  %v11697_v25 = vld [vmem:[%s16408_s3 + $0xd30] ss:$20 sps:$4 sm:$0xff]  }
 0x6b8   : > { %5145 = vmatpush1.bf16.msra.mxu1 %v16572_v27  ;;  %v11676_v27 = vld [vmem:[%s16408_s3 + $0xeb0] ss:$20 sps:$4 sm:$0xff]  }
 0x6b9   : > { %5146 = vmatprep.subr.bf16.mxu1 %v16573_v33  ;;  %5727 = vmatpush1.bf16.msra.mxu0 %v11676_v27  ;;  %v11699_v27 = vld [vmem:[%s16408_s3 + $0xd58] ss:$20 sps:$4 sm:$0xff]  }
 0x6ba   : > { %5728 = vmatprep.subr.bf16.mxu0 %v11684_v51  ;;  %v15108_v51 = vld [vmem:[%s12328_s27 + $0x60] sm:$0xff] }
 0x6bc   : > { %5147 = vmatpush1.bf16.msra.mxu1 %v16574_v36  ;;  %v11679_v36 = vld [vmem:[%s16408_s3 + $0xeb8] ss:$20 sps:$4 sm:$0xff]  }
 0x6bd   : > { %5148 = vmatprep.subr.bf16.mxu1 %v16575_v47  ;;  %v16579_v47 = vld [vmem:[#allocation26_spill] sm:$0xff] }
 0x6c0   : > { %5149 = vmatpush1.bf16.msra.mxu1 %v16576_v50 }
 0x6c1   : > { %5150 = vmatprep.subr.bf16.mxu1 %v16577_v55  ;;  %v11682_v55 = vld [vmem:[%s16408_s3 + $0xed8] ss:$20 sps:$4 sm:$0xff]  }
 0x6c2   : > { %5729 = vmatpush1.bf16.msra.mxu0 %v11682_v55  ;;  %v15111_v55 = vld [vmem:[%s12328_s27 + $0xe0] sm:$0xff] }
 0x6c4   : > { %5151 = vmatpush1.bf16.msra.mxu1 %v16578_v8  ;;  %v11688_v8 = vld [vmem:[%s16408_s3 + $0xdd0] ss:$20 sps:$4 sm:$0xff]  }
 0x6c5   : > { %5751 = vmatprep.subr.bf16.mxu1 %v11597_v59  ;;  %10473 = vmatprep.subr.bf16.mxu0 %v11688_v8  ;;  %v15136_v8 = vld [vmem:[%s16406_s1 + $0x34] ss:$8 sps:$4 sm:$0xff]  }
 0x6c7   : > { %5153 = vmatmul.mubr.bf16.vlgmr.msra.gmra.mrb[48].mxu1 %v9688_v28  ;;  %v11685_v28 = vld [vmem:[%s16408_s3 + $0xee0] ss:$20 sps:$4 sm:$0xff]  }
 0x6c8   : > { %5162 = vmatprep.mubr.bf16.mxu1 %v9693_v1  ;;  %5752 = vmatpush1.bf16.msra.mxu1 %v11595_v32 }
 0x6c9   : > { %5753 = vmatprep.subr.bf16.mxu1 %v11603_v41 }
 0x6cc   : > { %5754 = vmatpush1.bf16.msra.mxu1 %v11601_v61 }
 0x6cd   : > { %5755 = vmatprep.subr.bf16.mxu1 %v11609_v52 }
 0x6cf   : > { %5163 = vmatmul.mubr.bf16.gmra.mrb[52].mxu1 %v9692_v43  ;;  %v16581_v43 = vld [vmem:[#allocation5_spill] sm:$0xff] }
 0x6d0   : > { %5756 = vmatpush1.bf16.msra.mxu1 %v11607_v42 }
 0x6d1   : > { %5757 = vmatprep.subr.bf16.mxu1 %v11615_v5 }
 0x6d4   : > { %5758 = vmatpush1.bf16.msra.mxu1 %v11613_v2 }
 0x6d5   : > { %5759 = vmatprep.subr.bf16.mxu1 %v11621_v7 }
 0x6d8   : > { %5760 = vmatpush1.bf16.msra.mxu1 %v11619_v9 }
 0x6d9   : > { %5761 = vmatprep.subr.bf16.mxu1 %v11627_v11 }
 0x6dc   : > { %5762 = vmatpush1.bf16.msra.mxu1 %v11625_v10 }
 0x6dd   : > { %5763 = vmatprep.subr.bf16.mxu1 %v11633_v17  ;;  %v11690_v17 = vld [vmem:[%s16408_s3 + $0xdf8] ss:$20 sps:$4 sm:$0xff]  }
 0x6e0   : > { %5764 = vmatpush1.bf16.msra.mxu1 %v11631_v37 }
 0x6e1   : > { %5765 = vmatprep.subr.bf16.mxu1 %v11639_v54 }
 0x6e4   : > { %5766 = vmatpush1.bf16.msra.mxu1 %v11637_v38 }
 0x6e5   : > { %5767 = vmatprep.subr.bf16.mxu1 %v11645_v15 }
 0x6e8   : > { %5768 = vmatpush1.bf16.msra.mxu1 %v11643_v16  ;;  %v11691_v16 = vld [vmem:[%s16408_s3 + $0xcb8] ss:$20 sps:$4 sm:$0xff]  }
 0x6e9   : > { %5769 = vmatprep.subr.bf16.mxu1 %v11651_v18 }
 0x6ec   : > { %5770 = vmatpush1.bf16.msra.mxu1 %v11649_v49 }
 0x6ed   : > { %5771 = vmatprep.subr.bf16.mxu1 %v11657_v19  ;;  %v11692_v19 = vld [vmem:[%s16408_s3 + $0xe20] ss:$20 sps:$4 sm:$0xff]  }
 0x6f0   : > { %5772 = vmatpush1.bf16.msra.mxu1 %v11655_v20 }
 0x6f1   : > { %5773 = vmatprep.subr.bf16.mxu1 %v11663_v21 }
 0x6f4   : > { %5774 = vmatpush1.bf16.msra.mxu1 %v11661_v14 }
 0x6f5   : > { %5775 = vmatprep.subr.bf16.mxu1 %v11669_v22 }
 0x6f8   : > { %5776 = vmatpush1.bf16.msra.mxu1 %v11667_v46  ;;  %v11693_v46 = vld [vmem:[%s16408_s3 + $0xce0] ss:$20 sps:$4 sm:$0xff]  }
 0x6f9   : > { %5777 = vmatprep.subr.bf16.mxu1 %v11675_v23  ;;  %v11694_v23 = vld [vmem:[%s16408_s3 + $0xe48] ss:$20 sps:$4 sm:$0xff]  }
 0x6fc   : > { %5778 = vmatpush1.bf16.msra.mxu1 %v11673_v53  ;;  %v11695_v53 = vld [vmem:[%s16408_s3 + $0xd08] ss:$20 sps:$4 sm:$0xff]  }
 0x6fd   : > { %5779 = vmatprep.subr.bf16.mxu1 %v11681_v31  ;;  %v11700_v31 = vld [vmem:[%s16408_s3 + $0xec0] ss:$20 sps:$4 sm:$0xff]  }
 0x700   : > { %5780 = vmatpush1.bf16.msra.mxu1 %v11679_v36  ;;  %v11703_v36 = vld [vmem:[%s16408_s3 + $0xda8] ss:$20 sps:$4 sm:$0xff]  }
 0x701   : > { %5781 = vmatprep.subr.bf16.mxu1 %v11687_v57  ;;  %v15116_v57 = vld [vmem:[%s16406_s1 + $0x10] ss:$8 sps:$4 sm:$0xff]  }
 0x704   : > { %5782 = vmatpush1.bf16.msra.mxu1 %v11685_v28  ;;  %v15124_v28 = vld [vmem:[%s16406_s1 + $0x24] ss:$8 sps:$4 sm:$0xff]  }
 0x71a   : > { %v10461_v24 = vpop.f32.mrb[40].mxu1 }
 0x71b   : > { %v10462_v26 = vpop.f32.mrb[41].mxu1 }
 0x71c   : > { %v10463_v33 = vadd.f32 %v10462_v26, %v10461_v24  ;;  %v10464_v34 = vpop.f32.mrb[42].mxu1  ;;  %v11696_v24 = vld [vmem:[%s16408_s3 + $0xe70] ss:$20 sps:$4 sm:$0xff]   ;;  %v11698_v26 = vld [vmem:[%s16408_s3 + $0xe98] ss:$20 sps:$4 sm:$0xff]  }
 0x71d   : > { %v10465_v44 = vpop.f32.mrb[43].mxu1 }
 0x71e   : > { %v15010_v48 = vadd.f32 %v10463_v33, %v16579_v47  ;;  %v10466_v50 = vadd.f32 %v10465_v44, %v10464_v34  ;;  %v11701_v33 = vld [vmem:[%s16408_s3 + $0xd80] ss:$20 sps:$4 sm:$0xff]   ;;  %v11702_v34 = vld [vmem:[%s16408_s3 + $0xee8] ss:$20 sps:$4 sm:$0xff]   ;;  %v15092_v44 = vld [vmem:[%s16406_s1 + $0x4] ss:$8 sps:$4 sm:$0xff]  }
 0x71f   : > { %v15098_v47 = vld [vmem:[%s16406_s1] ss:$8 sps:$4 sm:$0xff]  }
 0x720   : > { %v15022_v59 = vadd.f32 %v10466_v50, %v16580_v58  ;;  %v15104_v50 = vld [vmem:[%s16406_s1 + $0x14] ss:$8 sps:$4 sm:$0xff]   ;;  %v9871_v58 = vcombine.high %v15108_v51, %v15111_v55 }
 0x722   : > { %v10467_v30 = vpop.f32.mrb[44].mxu1 }
 0x723   : > { %v10468_v1 = vpop.f32.mrb[45].mxu1 }
 0x724   : > { %v10469_v32 = vadd.f32 %v10468_v1, %v10467_v30  ;;  %v10470_v41 = vpop.f32.mrb[46].mxu1  ;;  %v15130_v30 = vld [vmem:[%s16406_s1 + $0x20] ss:$8 sps:$4 sm:$0xff]   ;;  %v15142_v1 = vld [vmem:[%s16406_s1 + $0x30] ss:$8 sps:$4 sm:$0xff]  }
 0x725   : > { %v10471_v63 = vpop.f32.mrb[47].mxu1 }
 0x726   : > { %v15031_v0 = vadd.f32 %v10469_v32, %v14691_v56  ;;  %v10472_v61 = vadd.f32 %v10471_v63, %v10470_v41  ;;  %v15148_v32 = vld [vmem:[%s16406_s1 + $0x44] ss:$8 sps:$4 sm:$0xff]   ;;  %v15154_v41 = vld [vmem:[%s16406_s1 + $0x40] ss:$8 sps:$4 sm:$0xff]   ;;  %v15160_v63 = vld [vmem:[%s16406_s1 + $0x54] ss:$8 sps:$4 sm:$0xff]  }
 0x728   : > { %v15034_v29 = vadd.f32 %v10472_v61, %v14694_v45  ;;  %v15166_v61 = vld [vmem:[%s16406_s1 + $0x50] ss:$8 sps:$4 sm:$0xff]  }
 0x79a   : > { %v5154_v52 = vpop.f32.mrb[48].mxu1 }
 0x79b   : > { %v10727_v6 = vadd.f32 %v5154_v52, %v16581_v43  ;;  %v5156_v42 = vpop.f32.mrb[49].mxu1  ;;  %v15172_v52 = vld [vmem:[%s16406_s1 + $0x64] ss:$8 sps:$4 sm:$0xff]  }
 0x79c   : > { %v10728_v62 = vadd.f32 %v5156_v42, %v12742_v40  ;;  %v5158_v5 = vpop.f32.mrb[50].mxu1  ;;  %v15184_v42 = vld [vmem:[%s16406_s1 + $0x74] ss:$8 sps:$4 sm:$0xff]  }
 0x79d   : > { %v10729_v39 = vadd.f32 %v5158_v5, %v16581_v43  ;;  %v5160_v2 = vpop.f32.mrb[51].mxu1  ;;  %v5173_v7 = vmax.f32 %v10727_v6, 0.0  ;;  %v15178_v6 = vld [vmem:[%s16406_s1 + $0x60] ss:$8 sps:$4 sm:$0xff]   ;;  %v15196_v5 = vld [vmem:[%s16406_s1 + $0x84] ss:$8 sps:$4 sm:$0xff]  }
 0x79e   : > { %v10730_v4 = vadd.f32 %v5160_v2, %v12742_v40  ;;  %v5174_v56 = vmax.f32 %v10728_v62, 0.0  ;;  %v15190_v62 = vld [vmem:[%s16406_s1 + $0x70] ss:$8 sps:$4 sm:$0xff]   ;;  %v15208_v2 = vld [vmem:[%s16406_s1 + $0x94] ss:$8 sps:$4 sm:$0xff]  }
 0x79f   : > { %v5175_v13 = vmax.f32 %v10729_v39, 0.0  ;;  %v15202_v39 = vld [vmem:[%s16406_s1 + $0x80] ss:$8 sps:$4 sm:$0xff]  }
 0x7a0   : > { %v5176_v9 = vmax.f32 %v10730_v4, 0.0  ;;  %v15214_v4 = vld [vmem:[%s16406_s1 + $0x90] ss:$8 sps:$4 sm:$0xff]  }
 0x7a1   : > { %v5181_v3 = vpack.c.bf16 %v5175_v13, %v5173_v7  ;;  %v15220_v7 = vld [vmem:[%s16406_s1 + $0xa4] ss:$8 sps:$4 sm:$0xff]   ;;  %v15226_v13 = vld [vmem:[%s16406_s1 + $0xa0] ss:$8 sps:$4 sm:$0xff]  }
 0x7a2   : > { %v5182_v11 = vpack.c.bf16 %v5176_v9, %v5174_v56  ;;  %v5164_v45 = vpop.f32.mrb[52].mxu1  ;;  %v15232_v56 = vld [vmem:[%s16406_s1 + $0xb4] ss:$8 sps:$4 sm:$0xff]   ;;  %v15238_v9 = vld [vmem:[%s16406_s1 + $0xb0] ss:$8 sps:$4 sm:$0xff]  }
 0x7a3   : > { %v10731_v10 = vadd.f32 %v5164_v45, %v16581_v43  ;;  %v5166_v35 = vpop.f32.mrb[53].mxu1  ;;  %v15256_v45 = vld [vmem:[%s16406_s1 + $0xd4] ss:$8 sps:$4 sm:$0xff]  }
 0x7a4   : > { %v10732_v60 = vadd.f32 %v5166_v35, %v12742_v40  ;;  %v5168_v37 = vpop.f32.mrb[54].mxu1  ;;  %5730 = vmatprep.mubr.bf16.mxu0 %v5182_v11  ;;  %5783 = vmatprep.mubr.bf16.mxu1 %v5182_v11  ;;  %v15274_v35 = vld [vmem:[%s16406_s1 + $0xe0] ss:$8 sps:$4 sm:$0xff]  }
 0x7a5   : > { %v10733_v54 = vadd.f32 %v5168_v37, %v16581_v43  ;;  %v5170_v38 = vpop.f32.mrb[55].mxu1  ;;  %5731 = vmatmul.mubr.bf16.vlgmr.msra.gmra.mrb[8].mxu0 %v5181_v3  ;;  %5784 = vmatmul.mubr.bf16.vlgmr.msra.gmra.mrb[8].mxu1 %v5181_v3  ;;  %v5177_v18 = vmax.f32 %v10731_v10, 0.0  ;;  %v15268_v10 = vld [vmem:[%s16406_s1 + $0xe4] ss:$8 sps:$4 sm:$0xff]  }
 0x7a6   : > { %v10734_v15 = vadd.f32 %v5170_v38, %v12742_v40  ;;  %10474 = vmatpush3.bf16.msra.mxu0 %v11689_v12  ;;  %v5178_v20 = vmax.f32 %v10732_v60, 0.0  ;;  %v15262_v12 = vld [vmem:[%s16406_s1 + $0xd0] ss:$8 sps:$4 sm:$0xff]   ;;  %v5877_v60 = vld [vmem:[%s12328_s27 + $0x160] sm:$0xff] }
 0x7a7   : > { %v5179_v49 = vmax.f32 %v10733_v54, 0.0  ;;  %10475 = vmatprep.subr.bf16.mxu0 %v11690_v17  ;;  %v15280_v17 = vld [vmem:[%s16406_s1 + $0xf4] ss:$8 sps:$4 sm:$0xff]   ;;  %v5879_v37 = vld [vmem:[%s12328_s27 + $0x1e0] sm:$0xff]  ;;  %v9870_v54 = vcombine.low %v15108_v51, %v15111_v55  ;;  %v15290_v38 = vld [vmem:[%s16406_s1 + $0xf0] ss:$8 sps:$4 sm:$0xff]  }
 0x7a8   : > { %v5180_v21 = vmax.f32 %v10734_v15, 0.0  ;;  %v9875_v15 = vcombine.high %v5877_v60, %v5879_v37  ;;  %v15394_v51 = vld [vmem:[%s16406_s1 + $0x170] ss:$8 sps:$4 sm:$0xff]   ;;  %v15400_v55 = vld [vmem:[%s16406_s1 + $0x184] ss:$8 sps:$4 sm:$0xff]  }
 0x7a9   : > { %v5183_v14 = vpack.c.bf16 %v5179_v49, %v5177_v18  ;;  %v15302_v18 = vld [vmem:[%s16406_s1 + $0x100] ss:$8 sps:$4 sm:$0xff]   ;;  %v15308_v49 = vld [vmem:[%s16406_s1 + $0x114] ss:$8 sps:$4 sm:$0xff]   ;;  %16585 = vst [vmem:[#allocation8_spill] sm:$0xff] %v15394_v51  ;;  %16586 = vst [vmem:[#allocation9_spill] sm:$0xff] %v15400_v55 }
 0x7aa   : > { %v5184_v22 = vpack.c.bf16 %v5180_v21, %v5178_v20  ;;  %10476 = vmatpush3.bf16.msra.mxu0 %v11691_v16  ;;  %v15296_v16 = vld [vmem:[%s16406_s1 + $0x104] ss:$8 sps:$4 sm:$0xff]   ;;  %v9874_v21 = vcombine.low %v5877_v60, %v5879_v37  ;;  %v11704_v60 = vld [vmem:[%s16408_s3 + $0xf08] ss:$20 sps:$4 sm:$0xff]  }
 0x7ab   : > { %10477 = vmatprep.subr.bf16.mxu0 %v11692_v19  ;;  %v15312_v19 = vld [vmem:[%s12328_s27 + $0x68] sm:$0xff] }
 0x7ac   : > { %5740 = vmatprep.mubr.bf16.mxu0 %v5184_v22  ;;  %5793 = vmatprep.mubr.bf16.mxu1 %v5184_v22  ;;  %v15315_v20 = vld [vmem:[%s12328_s27 + $0xe8] sm:$0xff] }
 0x7ad   : > { %5741 = vmatmul.mubr.bf16.gmra.mrb[12].mxu0 %v5183_v14  ;;  %5794 = vmatmul.mubr.bf16.gmra.mrb[12].mxu1 %v5183_v14  ;;  %v11706_v37 = vld [vmem:[%s16408_s3 + $0xf0c] ss:$20 sps:$4 sm:$0xff]  }
 0x7ae   : > { %10478 = vmatpush3.bf16.msra.mxu0 %v11693_v46  ;;  %5836 = vmatprep.mubr.bf16.mxu0 %v5182_v11  ;;  %v15250_v11 = vld [vmem:[%s16406_s1 + $0xc0] ss:$8 sps:$4 sm:$0xff]   ;;  %v15328_v46 = vld [vmem:[%s16406_s1 + $0x124] ss:$8 sps:$4 sm:$0xff]  }
 0x7af   : > { %10479 = vmatprep.subr.bf16.mxu0 %v11694_v23  ;;  %v15334_v23 = vld [vmem:[%s16406_s1 + $0x120] ss:$8 sps:$4 sm:$0xff]   ;;  %6605 = vmatprep.subr.bf16.mxu1 %v11706_v37  ;;  %v11716_v37 = vld [vmem:[%s16408_s3 + $0xf58] ss:$20 sps:$4 sm:$0xff]  }
 0x7b0   : > { %6606 = vmatpush1.bf16.msra.mxu1 %v11704_v60  ;;  %v15439_v60 = vld [vmem:[%s16406_s1 + $0x1a4] ss:$8 sps:$4 sm:$0xff]  }
 0x7b1   : > { %16590 = vst [vmem:[#allocation13_spill] sm:$0xff] %v15439_v60 }
 0x7b2   : > { %10480 = vmatpush3.bf16.msra.mxu0 %v11695_v53  ;;  %v15340_v53 = vld [vmem:[%s16406_s1 + $0x134] ss:$8 sps:$4 sm:$0xff]  }
 0x7b3   : > { %10481 = vmatprep.subr.bf16.mxu0 %v11696_v24  ;;  %v15346_v24 = vld [vmem:[%s16406_s1 + $0x130] ss:$8 sps:$4 sm:$0xff]  }
 0x7b6   : > { %10482 = vmatpush3.bf16.msra.mxu0 %v11697_v25  ;;  %v15352_v25 = vld [vmem:[%s16406_s1 + $0x144] ss:$8 sps:$4 sm:$0xff]  }
 0x7b7   : > { %10483 = vmatprep.subr.bf16.mxu0 %v11698_v26  ;;  %v15358_v26 = vld [vmem:[%s16406_s1 + $0x140] ss:$8 sps:$4 sm:$0xff]  }
 0x7ba   : > { %10484 = vmatpush3.bf16.msra.mxu0 %v11699_v27  ;;  %v15364_v27 = vld [vmem:[%s16406_s1 + $0x154] ss:$8 sps:$4 sm:$0xff]  }
 0x7bb   : > { %10485 = vmatprep.subr.bf16.mxu0 %v11700_v31  ;;  %v15370_v31 = vld [vmem:[%s16406_s1 + $0x150] ss:$8 sps:$4 sm:$0xff]  }
 0x7be   : > { %10486 = vmatpush3.bf16.msra.mxu0 %v11701_v33  ;;  %v15376_v33 = vld [vmem:[%s16406_s1 + $0x164] ss:$8 sps:$4 sm:$0xff]  }
 0x7bf   : > { %10487 = vmatprep.subr.bf16.mxu0 %v11702_v34  ;;  %16582 = vst [vmem:[#allocation28_spill] sm:$0xff] %v15376_v33  ;;  %v15382_v34 = vld [vmem:[%s16406_s1 + $0x160] ss:$8 sps:$4 sm:$0xff]  }
 0x7c0   : > { %16583 = vst [vmem:[#allocation6_spill] sm:$0xff] %v15382_v34 }
 0x7c2   : > { %10488 = vmatpush3.bf16.msra.mxu0 %v11703_v36  ;;  %v15388_v36 = vld [vmem:[%s16406_s1 + $0x174] ss:$8 sps:$4 sm:$0xff]  }
 0x7c3   : > { %5921 = vmatprep.subr.bf16.mxu0 %v15092_v44  ;;  %16584 = vst [vmem:[#allocation7_spill] sm:$0xff] %v15388_v36 }
 0x7c5   : > { %5837 = vmatmul.mubr.bf16.vlgmr.msra.gmra.mrb[48].mxu0 %v5181_v3  ;;  %v15244_v3 = vld [vmem:[%s16406_s1 + $0xc4] ss:$8 sps:$4 sm:$0xff]  }
 0x7c6   : > { %5844 = vmatprep.mubr.bf16.mxu0 %v5184_v22  ;;  %5922 = vmatpush1.bf16.msra.mxu0 %v15098_v47  ;;  %v9873_v22 = vcombine.high %v15312_v19, %v15315_v20 }
 0x7c7   : > { %5923 = vmatprep.subr.bf16.mxu0 %v15104_v50 }
 0x7ca   : > { %5924 = vmatpush1.bf16.msra.mxu0 %v15116_v57 }
 0x7cb   : > { %5925 = vmatprep.subr.bf16.mxu0 %v15124_v28 }
 0x7cd   : > { %5845 = vmatmul.mubr.bf16.gmra.mrb[52].mxu0 %v5183_v14  ;;  %v15320_v14 = vld [vmem:[%s16406_s1 + $0x110] ss:$8 sps:$4 sm:$0xff]  }
 0x7ce   : > { %5926 = vmatpush1.bf16.msra.mxu0 %v15130_v30  ;;  %5953 = vmatprep.mubr.bf16.mxu0 %v9871_v58  ;;  %v15406_v58 = vld [vmem:[%s16406_s1 + $0x180] ss:$8 sps:$4 sm:$0xff]  }
 0x7cf   : > { %5927 = vmatprep.subr.bf16.mxu0 %v15136_v8  ;;  %16587 = vst [vmem:[#allocation10_spill] sm:$0xff] %v15406_v58 }
 0x7d2   : > { %5928 = vmatpush1.bf16.msra.mxu0 %v15142_v1 }
 0x7d3   : > { %5929 = vmatprep.subr.bf16.mxu0 %v15148_v32 }
 0x7d6   : > { %5930 = vmatpush1.bf16.msra.mxu0 %v15154_v41 }
 0x7d7   : > { %5931 = vmatprep.subr.bf16.mxu0 %v15160_v63 }
 0x7da   : > { %5932 = vmatpush1.bf16.msra.mxu0 %v15166_v61 }
 0x7db   : > { %5933 = vmatprep.subr.bf16.mxu0 %v15172_v52 }
 0x7de   : > { %5934 = vmatpush1.bf16.msra.mxu0 %v15178_v6 }
 0x7df   : > { %5935 = vmatprep.subr.bf16.mxu0 %v15184_v42 }
 0x7e2   : > { %5936 = vmatpush1.bf16.msra.mxu0 %v15190_v62 }
 0x7e3   : > { %5937 = vmatprep.subr.bf16.mxu0 %v15196_v5 }
 0x7e6   : > { %5938 = vmatpush1.bf16.msra.mxu0 %v15202_v39 }
 0x7e7   : > { %5939 = vmatprep.subr.bf16.mxu0 %v15208_v2 }
 0x7ea   : > { %5940 = vmatpush1.bf16.msra.mxu0 %v15214_v4 }
 0x7eb   : > { %5941 = vmatprep.subr.bf16.mxu0 %v15220_v7 }
 0x7ee   : > { %5942 = vmatpush1.bf16.msra.mxu0 %v15226_v13 }
 0x7ef   : > { %5943 = vmatprep.subr.bf16.mxu0 %v15232_v56 }
 0x7f2   : > { %5944 = vmatpush1.bf16.msra.mxu0 %v15238_v9 }
 0x7f3   : > { %5945 = vmatprep.subr.bf16.mxu0 %v15244_v3 }
 0x7f6   : > { %5946 = vmatpush1.bf16.msra.mxu0 %v15250_v11 }
 0x7f7   : > { %5947 = vmatprep.subr.bf16.mxu0 %v15256_v45 }
 0x7fa   : > { %5948 = vmatpush1.bf16.msra.mxu0 %v15262_v12 }
 0x7fb   : > { %5949 = vmatprep.subr.bf16.mxu0 %v15268_v10 }
 0x7fe   : > { %5950 = vmatpush1.bf16.msra.mxu0 %v15274_v35 }
 0x7ff   : > { %5951 = vmatprep.subr.bf16.mxu0 %v15280_v17 }
 0x802   : > { %5952 = vmatpush1.bf16.msra.mxu0 %v15290_v38 }
 0x803   : > { %5974 = vmatprep.subr.bf16.mxu0 %v15296_v16 }
 0x805   : > { %5954 = vmatmul.mubr.bf16.vlgmr.msra.gmra.mrb[56].mxu0 %v9870_v54  ;;  %v15418_v54 = vld [vmem:[%s16406_s1 + $0x194] ss:$8 sps:$4 sm:$0xff]  }
 0x806   : > { %5975 = vmatpush1.bf16.msra.mxu0 %v15302_v18  ;;  %5963 = vmatprep.mubr.bf16.mxu0 %v9875_v15  ;;  %16588 = vst [vmem:[#allocation11_spill] sm:$0xff] %v15418_v54  ;;  %v11712_v15 = vld [vmem:[%s16408_s3 + $0xf34] ss:$20 sps:$4 sm:$0xff]  }
 0x807   : > { %5976 = vmatprep.subr.bf16.mxu0 %v15308_v49  ;;  %6607 = vmatprep.subr.bf16.mxu1 %v11712_v15  ;;  %v15448_v15 = vld [vmem:[%s16406_s1 + $0x1a0] ss:$8 sps:$4 sm:$0xff]  }
 0x808   : > { %16591 = vst [vmem:[#allocation14_spill] sm:$0xff] %v15448_v15 }
 0x80a   : > { %5977 = vmatpush1.bf16.msra.mxu0 %v15320_v14 }
 0x80b   : > { %5978 = vmatprep.subr.bf16.mxu0 %v15328_v46 }
 0x80d   : > { %5964 = vmatmul.mubr.bf16.gmra.mrb[60].mxu0 %v9874_v21  ;;  %v11710_v21 = vld [vmem:[%s16408_s3 + $0xf30] ss:$20 sps:$4 sm:$0xff]  }
 0x80e   : > { %5979 = vmatpush1.bf16.msra.mxu0 %v15334_v23  ;;  %6006 = vmatprep.mubr.bf16.mxu0 %v9873_v22  ;;  %v15430_v22 = vld [vmem:[%s16406_s1 + $0x190] ss:$8 sps:$4 sm:$0xff]  }
 0x80f   : > { %5980 = vmatprep.subr.bf16.mxu0 %v15340_v53  ;;  %16589 = vst [vmem:[#allocation12_spill] sm:$0xff] %v15430_v22  ;;  %6608 = vmatpush1.bf16.msra.mxu1 %v11710_v21  ;;  %v15457_v21 = vld [vmem:[%s16406_s1 + $0x1b4] ss:$8 sps:$4 sm:$0xff]  }
 0x810   : > { %16592 = vst [vmem:[#allocation15_spill] sm:$0xff] %v15457_v21 }
 0x812   : > { %5981 = vmatpush1.bf16.msra.mxu0 %v15346_v24 }
 0x813   : > { %5982 = vmatprep.subr.bf16.mxu0 %v15352_v25 }
 0x816   : > { %5983 = vmatpush1.bf16.msra.mxu0 %v15358_v26 }
 0x817   : > { %5984 = vmatprep.subr.bf16.mxu0 %v15364_v27 }
 0x81a   : > { %5985 = vmatpush1.bf16.msra.mxu0 %v15370_v31 }
 0x81b   : > { %5986 = vmatprep.subr.bf16.mxu0 %v15376_v33 }
 0x81e   : > { %5987 = vmatpush1.bf16.msra.mxu0 %v15382_v34 }
 0x81f   : > { %5988 = vmatprep.subr.bf16.mxu0 %v15388_v36  ;;  %v11707_v36 = vld [vmem:[%s16408_s3 + $0xf00] ss:$20 sps:$4 sm:$0xff]  }
 0x822   : > { %5989 = vmatpush1.bf16.msra.mxu0 %v15394_v51  ;;  %v15545_v51 = vld [vmem:[%s16406_s1 + $0x1f0] ss:$8 sps:$4 sm:$0xff]  }
 0x823   : > { %5990 = vmatprep.subr.bf16.mxu0 %v15400_v55  ;;  %v11709_v55 = vld [vmem:[%s16408_s3 + $0xf04] ss:$20 sps:$4 sm:$0xff]   ;;  %16601 = vst [vmem:[#allocation24_spill] sm:$0xff] %v15545_v51 }
 0x826   : > { %5991 = vmatpush1.bf16.msra.mxu0 %v15406_v58  ;;  %v5880_v58 = vld [vmem:[%s12328_s27 + $0x1e8] sm:$0xff] }
 0x827   : > { %5992 = vmatprep.subr.bf16.mxu0 %v15418_v54  ;;  %v11718_v54 = vld [vmem:[%s16408_s3 + $0xf5c] ss:$20 sps:$4 sm:$0xff]  }
 0x828   : > { %6609 = vmatprep.subr.bf16.mxu1 %v11718_v54  ;;  %v15466_v54 = vld [vmem:[%s16406_s1 + $0x1b0] ss:$8 sps:$4 sm:$0xff]  }
 0x829   : > { %6610 = vmatpush1.bf16.msra.mxu1 %v11716_v37  ;;  %16593 = vst [vmem:[#allocation16_spill] sm:$0xff] %v15466_v54  ;;  %v15475_v37 = vld [vmem:[%s16406_s1 + $0x1c4] ss:$8 sps:$4 sm:$0xff]  }
 0x82a   : > { %5993 = vmatpush1.bf16.msra.mxu0 %v15430_v22  ;;  %v11724_v22 = vld [vmem:[%s16408_s3 + $0xf84] ss:$20 sps:$4 sm:$0xff]   ;;  %16594 = vst [vmem:[#allocation17_spill] sm:$0xff] %v15475_v37 }
 0x82b   : > { %5994 = vmatprep.subr.bf16.mxu0 %v15439_v60  ;;  %v11722_v60 = vld [vmem:[%s16408_s3 + $0xf80] ss:$20 sps:$4 sm:$0xff]   ;;  %6611 = vmatprep.subr.bf16.mxu1 %v11724_v22 }
 0x82c   : > { %v15484_v22 = vld [vmem:[%s16406_s1 + $0x1c0] ss:$8 sps:$4 sm:$0xff]  }
 0x82d   : > { %6612 = vmatpush1.bf16.msra.mxu1 %v11722_v60  ;;  %16595 = vst [vmem:[#allocation18_spill] sm:$0xff] %v15484_v22  ;;  %v15493_v60 = vld [vmem:[%s16406_s1 + $0x1d4] ss:$8 sps:$4 sm:$0xff]  }
 0x82e   : > { %5995 = vmatpush1.bf16.msra.mxu0 %v15448_v15  ;;  %v11730_v15 = vld [vmem:[%s16408_s3 + $0xfac] ss:$20 sps:$4 sm:$0xff]   ;;  %16596 = vst [vmem:[#allocation19_spill] sm:$0xff] %v15493_v60 }
 0x82f   : > { %5996 = vmatprep.subr.bf16.mxu0 %v15457_v21  ;;  %v11728_v21 = vld [vmem:[%s16408_s3 + $0xfa8] ss:$20 sps:$4 sm:$0xff]   ;;  %6613 = vmatprep.subr.bf16.mxu1 %v11730_v15  ;;  %v15502_v15 = vld [vmem:[%s16406_s1 + $0x1d0] ss:$8 sps:$4 sm:$0xff]  }
 0x830   : > { %16597 = vst [vmem:[#allocation20_spill] sm:$0xff] %v15502_v15 }
 0x831   : > { %6614 = vmatpush1.bf16.msra.mxu1 %v11728_v21  ;;  %v15511_v21 = vld [vmem:[%s16406_s1 + $0x1e4] ss:$8 sps:$4 sm:$0xff]  }
 0x832   : > { %5997 = vmatpush1.bf16.msra.mxu0 %v15466_v54  ;;  %v11736_v54 = vld [vmem:[%s16408_s3 + $0xfd4] ss:$20 sps:$4 sm:$0xff]   ;;  %16598 = vst [vmem:[#allocation21_spill] sm:$0xff] %v15511_v21 }
 0x833   : > { %5998 = vmatprep.subr.bf16.mxu0 %v15475_v37  ;;  %v11734_v37 = vld [vmem:[%s16408_s3 + $0xfd0] ss:$20 sps:$4 sm:$0xff]   ;;  %6615 = vmatprep.subr.bf16.mxu1 %v11736_v54  ;;  %v15520_v54 = vld [vmem:[%s16406_s1 + $0x1e0] ss:$8 sps:$4 sm:$0xff]  }
 0x834   : > { %16599 = vst [vmem:[#allocation22_spill] sm:$0xff] %v15520_v54 }
 0x835   : > { %6616 = vmatpush1.bf16.msra.mxu1 %v11734_v37  ;;  %v15529_v37 = vld [vmem:[%s16406_s1 + $0x1f4] ss:$8 sps:$4 sm:$0xff]  }
 0x836   : > { %5999 = vmatpush1.bf16.msra.mxu0 %v15484_v22  ;;  %v11742_v22 = vld [vmem:[%s16408_s3 + $0xffc] ss:$20 sps:$4 sm:$0xff]   ;;  %16600 = vst [vmem:[#allocation23_spill] sm:$0xff] %v15529_v37 }
 0x837   : > { %6000 = vmatprep.subr.bf16.mxu0 %v15493_v60  ;;  %v11740_v60 = vld [vmem:[%s16408_s3 + $0xff8] ss:$20 sps:$4 sm:$0xff]   ;;  %6617 = vmatprep.subr.bf16.mxu1 %v11742_v22  ;;  %v9872_v22 = vcombine.low %v15312_v19, %v15315_v20 }
 0x838   : > { %v11715_v19 = vld [vmem:[%s16408_s3 + $0xf2c] ss:$20 sps:$4 sm:$0xff]  }
 0x839   : > { %6618 = vmatpush1.bf16.msra.mxu1 %v11740_v60  ;;  %v11754_v20 = vld [vmem:[%s16408_s3 + $0x104c] ss:$20 sps:$4 sm:$0xff]   ;;  %v11752_v60 = vld [vmem:[%s16408_s3 + $0x1048] ss:$20 sps:$4 sm:$0xff]  }
 0x83a   : > { %6001 = vmatpush1.bf16.msra.mxu0 %v15502_v15  ;;  %v11748_v15 = vld [vmem:[%s16408_s3 + $0x1024] ss:$20 sps:$4 sm:$0xff]  }
 0x83b   : > { %6002 = vmatprep.subr.bf16.mxu0 %v15511_v21  ;;  %v5878_v21 = vld [vmem:[%s12328_s27 + $0x168] sm:$0xff]  ;;  %6619 = vmatprep.subr.bf16.mxu1 %v11748_v15 }
 0x83c   : > { %v11760_v15 = vld [vmem:[%s16408_s3 + $0x1074] ss:$20 sps:$4 sm:$0xff]  }
 0x83e   : > { %6003 = vmatpush1.bf16.msra.mxu0 %v15520_v54  ;;  %v11746_v54 = vld [vmem:[%s16408_s3 + $0x1020] ss:$20 sps:$4 sm:$0xff]  }
 0x83f   : > { %6004 = vmatprep.subr.bf16.mxu0 %v15529_v37  ;;  %v9877_v37 = vcombine.high %v5878_v21, %v5880_v58  ;;  %6620 = vmatpush1.bf16.msra.mxu1 %v11746_v54  ;;  %v9876_v54 = vcombine.low %v5878_v21, %v5880_v58  ;;  %v11727_v58 = vld [vmem:[%s16408_s3 + $0xf7c] ss:$20 sps:$4 sm:$0xff]   ;;  %v11764_v21 = vld [vmem:[%s16408_s3 + $0x1098] ss:$20 sps:$4 sm:$0xff]  }
 0x840   : > { %6621 = vmatprep.subr.bf16.mxu1 %v11754_v20  ;;  %v11725_v20 = vld [vmem:[%s16408_s3 + $0xf78] ss:$20 sps:$4 sm:$0xff]  }
 0x842   : > { %6005 = vmatpush1.bf16.msra.mxu0 %v15545_v51  ;;  %v11796_v51 = vld [vmem:[%s16408_s3 + $0x1164] ss:$20 sps:$4 sm:$0xff]  }
 0x843   : > { %6552 = vmatprep.subr.bf16.mxu0 %v11709_v55  ;;  %v11713_v55 = vld [vmem:[%s16408_s3 + $0xf28] ss:$20 sps:$4 sm:$0xff]   ;;  %6622 = vmatpush1.bf16.msra.mxu1 %v11752_v60  ;;  %v11772_v60 = vld [vmem:[%s16408_s3 + $0x10c4] ss:$20 sps:$4 sm:$0xff]  }
 0x844   : > { %6623 = vmatprep.subr.bf16.mxu1 %v11760_v15  ;;  %v11770_v15 = vld [vmem:[%s16408_s3 + $0x10c0] ss:$20 sps:$4 sm:$0xff]  }
 0x845   : > { %6007 = vmatmul.mubr.bf16.vlgmr.msra.gmra.mrb[56].mxu0 %v9872_v22  ;;  %v11721_v22 = vld [vmem:[%s16408_s3 + $0xf54] ss:$20 sps:$4 sm:$0xff]  }
 0x846   : > { %6016 = vmatprep.mubr.bf16.mxu0 %v9877_v37  ;;  %6553 = vmatpush1.bf16.msra.mxu0 %v11707_v36  ;;  %v11758_v36 = vld [vmem:[%s16408_s3 + $0x1070] ss:$20 sps:$4 sm:$0xff]  }
 0x847   : > { %6554 = vmatprep.subr.bf16.mxu0 %v11715_v19  ;;  %v11719_v37 = vld [vmem:[%s16408_s3 + $0xf50] ss:$20 sps:$4 sm:$0xff]   ;;  %6624 = vmatpush1.bf16.msra.mxu1 %v11758_v36  ;;  %v11739_v36 = vld [vmem:[%s16408_s3 + $0xfcc] ss:$20 sps:$4 sm:$0xff]  }
 0x848   : > { %v11766_v19 = vld [vmem:[%s16408_s3 + $0x109c] ss:$20 sps:$4 sm:$0xff]  }
 0x849   : > { %6625 = vmatprep.subr.bf16.mxu1 %v11766_v19  ;;  %v11737_v19 = vld [vmem:[%s16408_s3 + $0xfc8] ss:$20 sps:$4 sm:$0xff]  }
 0x84a   : > { %6555 = vmatpush1.bf16.msra.mxu0 %v11713_v55  ;;  %v11733_v55 = vld [vmem:[%s16408_s3 + $0xfa4] ss:$20 sps:$4 sm:$0xff]  }
 0x84b   : > { %6556 = vmatprep.subr.bf16.mxu0 %v11721_v22  ;;  %6626 = vmatpush1.bf16.msra.mxu1 %v11764_v21  ;;  %v11731_v22 = vld [vmem:[%s16408_s3 + $0xfa0] ss:$20 sps:$4 sm:$0xff]  }
 0x84c   : > { %6627 = vmatprep.subr.bf16.mxu1 %v11772_v60  ;;  %v11745_v21 = vld [vmem:[%s16408_s3 + $0xff4] ss:$20 sps:$4 sm:$0xff]   ;;  %v11743_v60 = vld [vmem:[%s16408_s3 + $0xff0] ss:$20 sps:$4 sm:$0xff]  }
 0x84d   : > { %6017 = vmatmul.mubr.bf16.gmra.mrb[60].mxu0 %v9876_v54  ;;  %v11778_v54 = vld [vmem:[%s16408_s3 + $0x10ec] ss:$20 sps:$4 sm:$0xff]  }
 0x84e   : > { %6557 = vmatpush1.bf16.msra.mxu0 %v11719_v37  ;;  %v11776_v37 = vld [vmem:[%s16408_s3 + $0x10e8] ss:$20 sps:$4 sm:$0xff]  }
 0x84f   : > { %6558 = vmatprep.subr.bf16.mxu0 %v11727_v58  ;;  %6628 = vmatpush1.bf16.msra.mxu1 %v11770_v15  ;;  %v11784_v58 = vld [vmem:[%s16408_s3 + $0x1114] ss:$20 sps:$4 sm:$0xff]   ;;  %v11749_v15 = vld [vmem:[%s16408_s3 + $0x1018] ss:$20 sps:$4 sm:$0xff]  }
 0x850   : > { %6629 = vmatprep.subr.bf16.mxu1 %v11778_v54  ;;  %v11755_v54 = vld [vmem:[%s16408_s3 + $0x1040] ss:$20 sps:$4 sm:$0xff]  }
 0x852   : > { %6559 = vmatpush1.bf16.msra.mxu0 %v11725_v20  ;;  %v11782_v20 = vld [vmem:[%s16408_s3 + $0x1110] ss:$20 sps:$4 sm:$0xff]  }
 0x853   : > { %6560 = vmatprep.subr.bf16.mxu0 %v11733_v55  ;;  %6630 = vmatpush1.bf16.msra.mxu1 %v11776_v37  ;;  %v11751_v55 = vld [vmem:[%s16408_s3 + $0x101c] ss:$20 sps:$4 sm:$0xff]  }
 0x854   : > { %6631 = vmatprep.subr.bf16.mxu1 %v11784_v58  ;;  %v11761_v37 = vld [vmem:[%s16408_s3 + $0x1068] ss:$20 sps:$4 sm:$0xff]   ;;  %v11767_v58 = vld [vmem:[%s16408_s3 + $0x1090] ss:$20 sps:$4 sm:$0xff]  }
 0x856   : > { %6561 = vmatpush1.bf16.msra.mxu0 %v11731_v22  ;;  %v11757_v22 = vld [vmem:[%s16408_s3 + $0x1044] ss:$20 sps:$4 sm:$0xff]  }
 0x857   : > { %6562 = vmatprep.subr.bf16.mxu0 %v11739_v36  ;;  %6632 = vmatpush1.bf16.msra.mxu1 %v11782_v20  ;;  %v11763_v36 = vld [vmem:[%s16408_s3 + $0x106c] ss:$20 sps:$4 sm:$0xff]  }
 0x858   : > { %v11773_v20 = vld [vmem:[%s16408_s3 + $0x10b8] ss:$20 sps:$4 sm:$0xff]  }
 0x85a   : > { %6563 = vmatpush1.bf16.msra.mxu0 %v11737_v19  ;;  %v11769_v19 = vld [vmem:[%s16408_s3 + $0x1094] ss:$20 sps:$4 sm:$0xff]  }
 0x85b   : > { %6564 = vmatprep.subr.bf16.mxu0 %v11745_v21  ;;  %v11775_v21 = vld [vmem:[%s16408_s3 + $0x10bc] ss:$20 sps:$4 sm:$0xff]  }
 0x85e   : > { %6565 = vmatpush1.bf16.msra.mxu0 %v11743_v60  ;;  %v11781_v60 = vld [vmem:[%s16408_s3 + $0x10e4] ss:$20 sps:$4 sm:$0xff]  }
 0x85f   : > { %6566 = vmatprep.subr.bf16.mxu0 %v11751_v55  ;;  %v11779_v55 = vld [vmem:[%s16408_s3 + $0x10e0] ss:$20 sps:$4 sm:$0xff]  }
 0x862   : > { %6567 = vmatpush1.bf16.msra.mxu0 %v11749_v15  ;;  %v11787_v15 = vld [vmem:[%s16408_s3 + $0x110c] ss:$20 sps:$4 sm:$0xff]  }
 0x863   : > { %6568 = vmatprep.subr.bf16.mxu0 %v11757_v22  ;;  %v11785_v22 = vld [vmem:[%s16408_s3 + $0x1108] ss:$20 sps:$4 sm:$0xff]  }
 0x866   : > { %6569 = vmatpush1.bf16.msra.mxu0 %v11755_v54 }
 0x867   : > { %6570 = vmatprep.subr.bf16.mxu0 %v11763_v36  ;;  %v11790_v36 = vld [vmem:[%s16408_s3 + $0x113c] ss:$20 sps:$4 sm:$0xff]  }
 0x868   : > { %6633 = vmatprep.subr.bf16.mxu1 %v11790_v36  ;;  %v11799_v36 = vld [vmem:[%s16408_s3 + $0x115c] ss:$20 sps:$4 sm:$0xff]  }
 0x86a   : > { %6571 = vmatpush1.bf16.msra.mxu0 %v11761_v37 }
 0x86b   : > { %6572 = vmatprep.subr.bf16.mxu0 %v11769_v19  ;;  %v11788_v19 = vld [vmem:[%s16408_s3 + $0x1138] ss:$20 sps:$4 sm:$0xff]  }
 0x86c   : > { %6634 = vmatpush1.bf16.msra.mxu1 %v11788_v19 }
 0x86d   : > { %6635 = vmatprep.subr.bf16.mxu1 %v11796_v51 }
 0x86e   : > { %6573 = vmatpush1.bf16.msra.mxu0 %v11767_v58  ;;  %v11793_v58 = vld [vmem:[%s16408_s3 + $0x1134] ss:$20 sps:$4 sm:$0xff]  }
 0x86f   : > { %6574 = vmatprep.subr.bf16.mxu0 %v11775_v21 }
 0x872   : > { %6575 = vmatpush1.bf16.msra.mxu0 %v11773_v20 }
 0x873   : > { %6576 = vmatprep.subr.bf16.mxu0 %v11781_v60  ;;  %v11791_v60 = vld [vmem:[%s16408_s3 + $0x1130] ss:$20 sps:$4 sm:$0xff]  }
 0x876   : > { %6577 = vmatpush1.bf16.msra.mxu0 %v11779_v55 }
 0x877   : > { %6578 = vmatprep.subr.bf16.mxu0 %v11787_v15 }
 0x87a   : > { %6579 = vmatpush1.bf16.msra.mxu0 %v11785_v22 }
 0x87b   : > { %6580 = vmatprep.subr.bf16.mxu0 %v11793_v58  ;;  %v11800_v58 = vld [vmem:[%s16408_s3 + $0x1050] ss:$20 sps:$4 sm:$0xff]  }
 0x87e   : > { %6581 = vmatpush1.bf16.msra.mxu0 %v11791_v60 }
 0x87f   : > { %6582 = vmatprep.subr.bf16.mxu0 %v11799_v36 }
 0x898   : > { %v10489_v54 = vpop.f32.mrb[48].mxu0 }
 0x899   : > { %v10490_v37 = vpop.f32.mrb[49].mxu0 }
 0x89a   : > { %v10491_v21 = vadd.f32 %v10490_v37, %v10489_v54  ;;  %v10492_v20 = vpop.f32.mrb[50].mxu0  ;;  %v11794_v54 = vld [vmem:[%s16408_s3 + $0x1160] ss:$20 sps:$4 sm:$0xff]  }
 0x89b   : > { %v10493_v55 = vpop.f32.mrb[51].mxu0  ;;  %6636 = vmatpush1.bf16.msra.mxu1 %v11794_v54 }
 0x89c   : > { %v15678_v15 = vadd.f32 %v10491_v21, %v15010_v48  ;;  %v10494_v22 = vadd.f32 %v10493_v55, %v10492_v20  ;;  %v11797_v48 = vld [vmem:[%s16408_s3 + $0x1158] ss:$20 sps:$4 sm:$0xff]   ;;  %10501 = vmatprep.subr.bf16.mxu1 %v11800_v58 }
 0x89d   : > { %6583 = vmatpush1.bf16.msra.mxu0 %v11797_v48 }
 0x89e   : > { %16602 = vst [vmem:[#allocation25_spill] sm:$0xff] %v15678_v15  ;;  %v15690_v37 = vadd.f32 %v10494_v22, %v15022_v59 }
 0x8a0   : > { %16603 = vst [vmem:[#allocation26_spill] sm:$0xff] %v15690_v37  ;;  %v10495_v19 = vpop.f32.mrb[52].mxu0 }
 0x8a1   : > { %v10496_v21 = vpop.f32.mrb[53].mxu0 }
 0x8a2   : > { %v10497_v20 = vadd.f32 %v10496_v21, %v10495_v19  ;;  %v10498_v60 = vpop.f32.mrb[54].mxu0 }
 0x8a3   : > { %v10499_v55 = vpop.f32.mrb[55].mxu0 }
 0x8a4   : > { %v15699_v59 = vadd.f32 %v10497_v20, %v15031_v0  ;;  %v10500_v51 = vadd.f32 %v10499_v55, %v10498_v60 }
 0x8a6   : > { %v15702_v22 = vadd.f32 %v10500_v51, %v15034_v29  ;;  %v11801_v51 = vld [vmem:[%s16408_s3 + $0xf10] ss:$20 sps:$4 sm:$0xff]  }
 0x918   : > { %v6008_v36 = vpop.f32.mrb[56].mxu0 }
 0x919   : > { %v10735_v54 = vadd.f32 %v6008_v36, %v16581_v43  ;;  %v6010_v48 = vpop.f32.mrb[57].mxu0 }
 0x91a   : > { %v10736_v37 = vadd.f32 %v6010_v48, %v12742_v40  ;;  %v6012_v15 = vpop.f32.mrb[58].mxu0 }
 0x91b   : > { %v10737_v34 = vadd.f32 %v6012_v15, %v16581_v43  ;;  %v6014_v19 = vpop.f32.mrb[59].mxu0  ;;  %v6027_v21 = vmax.f32 %v10735_v54, 0.0  ;;  %v11802_v15 = vld [vmem:[%s16408_s3 + $0x1078] ss:$20 sps:$4 sm:$0xff]  }
 0x91c   : > { %v10738_v58 = vadd.f32 %v6014_v19, %v12742_v40  ;;  %v6028_v0 = vmax.f32 %v10736_v37, 0.0 }
 0x91d   : > { %v6029_v33 = vmax.f32 %v10737_v34, 0.0 }
 0x91e   : > { %v6030_v20 = vmax.f32 %v10738_v58, 0.0  ;;  %v11803_v58 = vld [vmem:[%s16408_s3 + $0xf38] ss:$20 sps:$4 sm:$0xff]  }
 0x91f   : > { %v6035_v60 = vpack.c.bf16 %v6029_v33, %v6027_v21 }
 0x920   : > { %v6036_v55 = vpack.c.bf16 %v6030_v20, %v6028_v0  ;;  %v6018_v29 = vpop.f32.mrb[60].mxu0  ;;  %v11804_v20 = vld [vmem:[%s16408_s3 + $0x10a0] ss:$20 sps:$4 sm:$0xff]  }
 0x921   : > { %v10739_v36 = vadd.f32 %v6018_v29, %v16581_v43  ;;  %v6020_v48 = vpop.f32.mrb[61].mxu0 }
 0x922   : > { %v10740_v19 = vadd.f32 %v6020_v48, %v12742_v40  ;;  %v6022_v54 = vpop.f32.mrb[62].mxu0  ;;  %6584 = vmatprep.mubr.bf16.mxu0 %v6036_v55  ;;  %6637 = vmatprep.mubr.bf16.mxu1 %v6036_v55 }
 0x923   : > { %v10741_v33 = vadd.f32 %v6022_v54, %v16581_v43  ;;  %v6024_v34 = vpop.f32.mrb[63].mxu0  ;;  %6585 = vmatmul.mubr.bf16.vlgmr.msra.gmra.mrb[8].mxu0 %v6035_v60  ;;  %6638 = vmatmul.mubr.bf16.vlgmr.msra.gmra.mrb[8].mxu1 %v6035_v60  ;;  %v6031_v21 = vmax.f32 %v10739_v36, 0.0  ;;  %v11806_v36 = vld [vmem:[%s16408_s3 + $0x10c8] ss:$20 sps:$4 sm:$0xff]  }
 0x924   : > { %v10742_v37 = vadd.f32 %v6024_v34, %v12742_v40  ;;  %10502 = vmatpush3.bf16.msra.mxu1 %v11801_v51  ;;  %v6032_v29 = vmax.f32 %v10740_v19, 0.0  ;;  %v11805_v51 = vld [vmem:[%s16408_s3 + $0xf60] ss:$20 sps:$4 sm:$0xff]   ;;  %v11808_v19 = vld [vmem:[%s16408_s3 + $0x10f0] ss:$20 sps:$4 sm:$0xff]  }
 0x925   : > { %v6033_v0 = vmax.f32 %v10741_v33, 0.0  ;;  %10503 = vmatprep.subr.bf16.mxu1 %v11802_v15  ;;  %v11807_v15 = vld [vmem:[%s16408_s3 + $0xf88] ss:$20 sps:$4 sm:$0xff]   ;;  %v11809_v33 = vld [vmem:[%s16408_s3 + $0xfb0] ss:$20 sps:$4 sm:$0xff]  }
 0x926   : > { %v6034_v48 = vmax.f32 %v10742_v37, 0.0  ;;  %v11810_v34 = vld [vmem:[%s16408_s3 + $0x1118] ss:$20 sps:$4 sm:$0xff]   ;;  %v11812_v37 = vld [vmem:[%s16408_s3 + $0x1140] ss:$20 sps:$4 sm:$0xff]  }
 0x927   : > { %v6037_v54 = vpack.c.bf16 %v6033_v0, %v6031_v21  ;;  %v11814_v21 = vld [vmem:[%s16408_s3 + $0x1168] ss:$20 sps:$4 sm:$0xff]  }
 0x928   : > { %v6038_v43 = vpack.c.bf16 %v6034_v48, %v6032_v29  ;;  %10504 = vmatpush3.bf16.msra.mxu1 %v11803_v58  ;;  %v11813_v58 = vld [vmem:[%s16408_s3 + $0x1000] ss:$20 sps:$4 sm:$0xff]   ;;  %v11815_v0 = vld [vmem:[%s16408_s3 + $0x1028] ss:$20 sps:$4 sm:$0xff]  }
 0x929   : > { %10505 = vmatprep.subr.bf16.mxu1 %v11804_v20  ;;  %v6727_v20 = vld [vmem:[%s12328_s27 + $0x70] sm:$0xff] }
 0x92a   : > { %6594 = vmatprep.mubr.bf16.mxu0 %v6038_v43  ;;  %6647 = vmatprep.mubr.bf16.mxu1 %v6038_v43  ;;  %v6729_v29 = vld [vmem:[%s12328_s27 + $0xf0] sm:$0xff] }
 0x92b   : > { %6595 = vmatmul.mubr.bf16.gmra.mrb[12].mxu0 %v6037_v54  ;;  %6648 = vmatmul.mubr.bf16.gmra.mrb[12].mxu1 %v6037_v54  ;;  %v10055_v48 = vcombine.high %v6727_v20, %v6729_v29 }
 0x92c   : > { %10506 = vmatpush3.bf16.msra.mxu1 %v11805_v51  ;;  %6690 = vmatprep.mubr.bf16.mxu1 %v6036_v55  ;;  %v11811_v55 = vld [vmem:[%s16408_s3 + $0xfd8] ss:$20 sps:$4 sm:$0xff]   ;;  %v16623_v51 = vld [vmem:[#allocation24_spill] sm:$0xff] }
 0x92d   : > { %10507 = vmatprep.subr.bf16.mxu1 %v11806_v36 }
 0x930   : > { %10508 = vmatpush3.bf16.msra.mxu1 %v11807_v15  ;;  %v11819_v15 = vld [vmem:[%s16408_s3 + $0x1188] ss:$20 sps:$4 sm:$0xff]  }
 0x931   : > { %10509 = vmatprep.subr.bf16.mxu1 %v11808_v19  ;;  %v11827_v19 = vld [vmem:[%s16408_s3 + $0x11b4] ss:$20 sps:$4 sm:$0xff]  }
 0x934   : > { %10510 = vmatpush3.bf16.msra.mxu1 %v11809_v33  ;;  %v11866_v33 = vld [vmem:[%s16408_s3 + $0x12c4] ss:$20 sps:$4 sm:$0xff]  }
 0x935   : > { %10511 = vmatprep.subr.bf16.mxu1 %v11810_v34  ;;  %v11864_v34 = vld [vmem:[%s16408_s3 + $0x12c0] ss:$20 sps:$4 sm:$0xff]  }
 0x938   : > { %10512 = vmatpush3.bf16.msra.mxu1 %v11811_v55  ;;  %v11825_v55 = vld [vmem:[%s16408_s3 + $0x11b0] ss:$20 sps:$4 sm:$0xff]  }
 0x939   : > { %10513 = vmatprep.subr.bf16.mxu1 %v11812_v37  ;;  %v11872_v37 = vld [vmem:[%s16408_s3 + $0x12ec] ss:$20 sps:$4 sm:$0xff]  }
 0x93c   : > { %10514 = vmatpush3.bf16.msra.mxu1 %v11813_v58  ;;  %v11833_v58 = vld [vmem:[%s16408_s3 + $0x11dc] ss:$20 sps:$4 sm:$0xff]  }
 0x93d   : > { %10515 = vmatprep.subr.bf16.mxu1 %v11814_v21 }
 0x940   : > { %10516 = vmatpush3.bf16.msra.mxu1 %v11815_v0  ;;  %v11870_v0 = vld [vmem:[%s16408_s3 + $0x12e8] ss:$20 sps:$4 sm:$0xff]  }
 0x941   : > { %6775 = vmatprep.subr.bf16.mxu1 %v15092_v44  ;;  %v6733_v44 = vld [vmem:[%s12328_s27 + $0x1f0] sm:$0xff] }
 0x943   : > { %6691 = vmatmul.mubr.bf16.vlgmr.msra.gmra.mrb[56].mxu1 %v6035_v60 }
 0x944   : > { %6698 = vmatprep.mubr.bf16.mxu1 %v6038_v43  ;;  %6776 = vmatpush1.bf16.msra.mxu1 %v15098_v47  ;;  %v6731_v43 = vld [vmem:[%s12328_s27 + $0x170] sm:$0xff]  ;;  %v10054_v47 = vcombine.low %v6727_v20, %v6729_v29  ;;  %v11831_v20 = vld [vmem:[%s16408_s3 + $0x11d8] ss:$20 sps:$4 sm:$0xff]  }
 0x945   : > { %6777 = vmatprep.subr.bf16.mxu1 %v15104_v50  ;;  %v10059_v50 = vcombine.high %v6731_v43, %v6733_v44  ;;  %v11878_v29 = vld [vmem:[%s16408_s3 + $0x1314] ss:$20 sps:$4 sm:$0xff]  }
 0x948   : > { %6778 = vmatpush1.bf16.msra.mxu1 %v15116_v57  ;;  %v15797_v57 = vld [vmem:[%s12328_s27 + $0x78] sm:$0xff] }
 0x949   : > { %6779 = vmatprep.subr.bf16.mxu1 %v15124_v28  ;;  %v15800_v28 = vld [vmem:[%s12328_s27 + $0xf8] sm:$0xff] }
 0x94a   : > { %v10056_v60 = vcombine.low %v15797_v57, %v15800_v28 }
 0x94b   : > { %6699 = vmatmul.mubr.bf16.gmra.mrb[60].mxu1 %v6037_v54  ;;  %v11858_v54 = vld [vmem:[%s16408_s3 + $0x1298] ss:$20 sps:$4 sm:$0xff]  }
 0x94c   : > { %6780 = vmatpush1.bf16.msra.mxu1 %v15130_v30  ;;  %6807 = vmatprep.mubr.bf16.mxu1 %v10055_v48  ;;  %v10058_v30 = vcombine.low %v6731_v43, %v6733_v44  ;;  %v11839_v48 = vld [vmem:[%s16408_s3 + $0x1204] ss:$20 sps:$4 sm:$0xff]   ;;  %v11837_v44 = vld [vmem:[%s16408_s3 + $0x1200] ss:$20 sps:$4 sm:$0xff]  }
 0x94d   : > { %6781 = vmatprep.subr.bf16.mxu1 %v15136_v8  ;;  %v10057_v8 = vcombine.high %v15797_v57, %v15800_v28  ;;  %v11876_v43 = vld [vmem:[%s16408_s3 + $0x1310] ss:$20 sps:$4 sm:$0xff]   ;;  %v11882_v57 = vld [vmem:[%s16408_s3 + $0x1338] ss:$20 sps:$4 sm:$0xff]   ;;  %v11843_v28 = vld [vmem:[%s16408_s3 + $0x1228] ss:$20 sps:$4 sm:$0xff]  }
 0x950   : > { %6782 = vmatpush1.bf16.msra.mxu1 %v15142_v1  ;;  %v16604_v1 = vld [vmem:[#allocation28_spill] sm:$0xff] }
 0x951   : > { %6783 = vmatprep.subr.bf16.mxu1 %v15148_v32  ;;  %v16605_v32 = vld [vmem:[#allocation6_spill] sm:$0xff] }
 0x954   : > { %6784 = vmatpush1.bf16.msra.mxu1 %v15154_v41  ;;  %v16606_v41 = vld [vmem:[#allocation7_spill] sm:$0xff] }
 0x955   : > { %6785 = vmatprep.subr.bf16.mxu1 %v15160_v63  ;;  %v16607_v63 = vld [vmem:[#allocation8_spill] sm:$0xff] }
 0x958   : > { %6786 = vmatpush1.bf16.msra.mxu1 %v15166_v61  ;;  %v16608_v61 = vld [vmem:[#allocation9_spill] sm:$0xff] }
 0x959   : > { %6787 = vmatprep.subr.bf16.mxu1 %v15172_v52  ;;  %v16609_v52 = vld [vmem:[#allocation10_spill] sm:$0xff] }
 0x95c   : > { %6788 = vmatpush1.bf16.msra.mxu1 %v15178_v6  ;;  %v11816_v6 = vld [vmem:[%s16408_s3 + $0x1180] ss:$20 sps:$4 sm:$0xff]  }
 0x95d   : > { %6789 = vmatprep.subr.bf16.mxu1 %v15184_v42  ;;  %v11818_v42 = vld [vmem:[%s16408_s3 + $0x1184] ss:$20 sps:$4 sm:$0xff]  }
 0x95e   : > { %7406 = vmatprep.subr.bf16.mxu0 %v11818_v42  ;;  %v11861_v42 = vld [vmem:[%s16408_s3 + $0x12a0] ss:$20 sps:$4 sm:$0xff]  }
 0x95f   : > { %7407 = vmatpush1.bf16.msra.mxu0 %v11816_v6  ;;  %v11863_v6 = vld [vmem:[%s16408_s3 + $0x12a4] ss:$20 sps:$4 sm:$0xff]  }
 0x960   : > { %6790 = vmatpush1.bf16.msra.mxu1 %v15190_v62  ;;  %v16610_v62 = vld [vmem:[#allocation11_spill] sm:$0xff] }
 0x961   : > { %6791 = vmatprep.subr.bf16.mxu1 %v15196_v5  ;;  %v11824_v5 = vld [vmem:[%s16408_s3 + $0x11ac] ss:$20 sps:$4 sm:$0xff]  }
 0x962   : > { %7408 = vmatprep.subr.bf16.mxu0 %v11824_v5  ;;  %v11867_v5 = vld [vmem:[%s16408_s3 + $0x12c8] ss:$20 sps:$4 sm:$0xff]  }
 0x964   : > { %6792 = vmatpush1.bf16.msra.mxu1 %v15202_v39  ;;  %v11822_v39 = vld [vmem:[%s16408_s3 + $0x11a8] ss:$20 sps:$4 sm:$0xff]  }
 0x965   : > { %6793 = vmatprep.subr.bf16.mxu1 %v15208_v2  ;;  %v16611_v2 = vld [vmem:[#allocation12_spill] sm:$0xff]  ;;  %7409 = vmatpush1.bf16.msra.mxu0 %v11822_v39 }
 0x966   : > { %v11875_v39 = vld [vmem:[%s16408_s3 + $0x12f4] ss:$20 sps:$4 sm:$0xff]  }
 0x968   : > { %6794 = vmatpush1.bf16.msra.mxu1 %v15214_v4  ;;  %v11830_v4 = vld [vmem:[%s16408_s3 + $0x11d4] ss:$20 sps:$4 sm:$0xff]  }
 0x969   : > { %6795 = vmatprep.subr.bf16.mxu1 %v15220_v7  ;;  %v16612_v7 = vld [vmem:[#allocation13_spill] sm:$0xff]  ;;  %7410 = vmatprep.subr.bf16.mxu0 %v11830_v4 }
 0x96a   : > { %v11881_v4 = vld [vmem:[%s16408_s3 + $0x131c] ss:$20 sps:$4 sm:$0xff]  }
 0x96c   : > { %6796 = vmatpush1.bf16.msra.mxu1 %v15226_v13  ;;  %v11828_v13 = vld [vmem:[%s16408_s3 + $0x11d0] ss:$20 sps:$4 sm:$0xff]  }
 0x96d   : > { %6797 = vmatprep.subr.bf16.mxu1 %v15232_v56  ;;  %v16613_v56 = vld [vmem:[#allocation14_spill] sm:$0xff]  ;;  %7411 = vmatpush1.bf16.msra.mxu0 %v11828_v13 }
 0x96e   : > { %v11887_v13 = vld [vmem:[%s16408_s3 + $0x1344] ss:$20 sps:$4 sm:$0xff]  }
 0x970   : > { %6798 = vmatpush1.bf16.msra.mxu1 %v15238_v9  ;;  %v11836_v9 = vld [vmem:[%s16408_s3 + $0x11fc] ss:$20 sps:$4 sm:$0xff]  }
 0x971   : > { %6799 = vmatprep.subr.bf16.mxu1 %v15244_v3  ;;  %v16614_v3 = vld [vmem:[#allocation15_spill] sm:$0xff]  ;;  %7412 = vmatprep.subr.bf16.mxu0 %v11836_v9 }
 0x972   : > { %v11893_v9 = vld [vmem:[%s16408_s3 + $0x136c] ss:$20 sps:$4 sm:$0xff]  }
 0x974   : > { %6800 = vmatpush1.bf16.msra.mxu1 %v15250_v11  ;;  %v11834_v11 = vld [vmem:[%s16408_s3 + $0x11f8] ss:$20 sps:$4 sm:$0xff]  }
 0x975   : > { %6801 = vmatprep.subr.bf16.mxu1 %v15256_v45  ;;  %v16615_v45 = vld [vmem:[#allocation16_spill] sm:$0xff]  ;;  %7413 = vmatpush1.bf16.msra.mxu0 %v11834_v11 }
 0x976   : > { %v11899_v11 = vld [vmem:[%s16408_s3 + $0x1394] ss:$20 sps:$4 sm:$0xff]  }
 0x978   : > { %6802 = vmatpush1.bf16.msra.mxu1 %v15262_v12  ;;  %v11842_v12 = vld [vmem:[%s16408_s3 + $0x1224] ss:$20 sps:$4 sm:$0xff]  }
 0x979   : > { %6803 = vmatprep.subr.bf16.mxu1 %v15268_v10  ;;  %v16616_v10 = vld [vmem:[#allocation17_spill] sm:$0xff]  ;;  %7414 = vmatprep.subr.bf16.mxu0 %v11842_v12 }
 0x97c   : > { %6804 = vmatpush1.bf16.msra.mxu1 %v15274_v35  ;;  %v11840_v35 = vld [vmem:[%s16408_s3 + $0x1220] ss:$20 sps:$4 sm:$0xff]  }
 0x97d   : > { %6805 = vmatprep.subr.bf16.mxu1 %v15280_v17  ;;  %v16617_v17 = vld [vmem:[#allocation18_spill] sm:$0xff]  ;;  %7415 = vmatpush1.bf16.msra.mxu0 %v11840_v35 }
 0x980   : > { %6806 = vmatpush1.bf16.msra.mxu1 %v15290_v38  ;;  %v11848_v38 = vld [vmem:[%s16408_s3 + $0x124c] ss:$20 sps:$4 sm:$0xff]  }
 0x981   : > { %6828 = vmatprep.subr.bf16.mxu1 %v15296_v16  ;;  %v16618_v16 = vld [vmem:[#allocation19_spill] sm:$0xff]  ;;  %7416 = vmatprep.subr.bf16.mxu0 %v11848_v38  ;;  %v11905_v38 = vld [vmem:[%s16408_s3 + $0x13bc] ss:$20 sps:$4 sm:$0xff]  }
 0x983   : > { %6808 = vmatmul.mubr.bf16.vlgmr.msra.gmra.mrb[64].mxu1 %v10054_v47  ;;  %v11884_v47 = vld [vmem:[%s16408_s3 + $0x133c] ss:$20 sps:$4 sm:$0xff]  }
 0x984   : > { %6829 = vmatpush1.bf16.msra.mxu1 %v15302_v18  ;;  %6817 = vmatprep.mubr.bf16.mxu1 %v10059_v50  ;;  %v11846_v18 = vld [vmem:[%s16408_s3 + $0x1248] ss:$20 sps:$4 sm:$0xff]   ;;  %v11845_v50 = vld [vmem:[%s16408_s3 + $0x122c] ss:$20 sps:$4 sm:$0xff]  }
 0x985   : > { %6830 = vmatprep.subr.bf16.mxu1 %v15308_v49  ;;  %v16619_v49 = vld [vmem:[#allocation20_spill] sm:$0xff]  ;;  %7417 = vmatpush1.bf16.msra.mxu0 %v11846_v18 }
 0x988   : > { %6831 = vmatpush1.bf16.msra.mxu1 %v15320_v14  ;;  %v11854_v14 = vld [vmem:[%s16408_s3 + $0x1274] ss:$20 sps:$4 sm:$0xff]  }
 0x989   : > { %6832 = vmatprep.subr.bf16.mxu1 %v15328_v46  ;;  %v16620_v46 = vld [vmem:[#allocation21_spill] sm:$0xff]  ;;  %7418 = vmatprep.subr.bf16.mxu0 %v11854_v14 }
 0x98b   : > { %6818 = vmatmul.mubr.bf16.gmra.mrb[68].mxu1 %v10058_v30  ;;  %v11890_v30 = vld [vmem:[%s16408_s3 + $0x1364] ss:$20 sps:$4 sm:$0xff]  }
 0x98c   : > { %6833 = vmatpush1.bf16.msra.mxu1 %v15334_v23  ;;  %6860 = vmatprep.mubr.bf16.mxu1 %v10057_v8  ;;  %v11852_v23 = vld [vmem:[%s16408_s3 + $0x1270] ss:$20 sps:$4 sm:$0xff]   ;;  %v11851_v8 = vld [vmem:[%s16408_s3 + $0x1254] ss:$20 sps:$4 sm:$0xff]  }
 0x98d   : > { %6834 = vmatprep.subr.bf16.mxu1 %v15340_v53  ;;  %v16621_v53 = vld [vmem:[#allocation22_spill] sm:$0xff]  ;;  %7419 = vmatpush1.bf16.msra.mxu0 %v11852_v23 }
 0x990   : > { %6835 = vmatpush1.bf16.msra.mxu1 %v15346_v24  ;;  %v11860_v24 = vld [vmem:[%s16408_s3 + $0x129c] ss:$20 sps:$4 sm:$0xff]  }
 0x991   : > { %6836 = vmatprep.subr.bf16.mxu1 %v15352_v25  ;;  %v16622_v25 = vld [vmem:[#allocation23_spill] sm:$0xff]  ;;  %7420 = vmatprep.subr.bf16.mxu0 %v11860_v24  ;;  %v11908_v24 = vld [vmem:[%s16408_s3 + $0x13dc] ss:$20 sps:$4 sm:$0xff]  }
 0x992   : > { %7421 = vmatpush1.bf16.msra.mxu0 %v11858_v54 }
 0x993   : > { %7422 = vmatprep.subr.bf16.mxu0 %v11866_v33 }
 0x994   : > { %6837 = vmatpush1.bf16.msra.mxu1 %v15358_v26  ;;  %v6732_v26 = vld [vmem:[%s12328_s27 + $0x178] sm:$0xff] }
 0x995   : > { %6838 = vmatprep.subr.bf16.mxu1 %v15364_v27  ;;  %v6734_v27 = vld [vmem:[%s12328_s27 + $0x1f8] sm:$0xff] }
 0x996   : > { %v10061_v36 = vcombine.high %v6732_v26, %v6734_v27  ;;  %v10060_v21 = vcombine.low %v6732_v26, %v6734_v27  ;;  %7423 = vmatpush1.bf16.msra.mxu0 %v11864_v34  ;;  %v11911_v26 = vld [vmem:[%s16408_s3 + $0x13e4] ss:$20 sps:$4 sm:$0xff]  }
 0x997   : > { %7424 = vmatprep.subr.bf16.mxu0 %v11872_v37  ;;  %v16625_v27 = vld [vmem:[#allocation26_spill] sm:$0xff] }
 0x998   : > { %6839 = vmatpush1.bf16.msra.mxu1 %v15370_v31  ;;  %v11821_v31 = vld [vmem:[%s16408_s3 + $0x118c] ss:$20 sps:$4 sm:$0xff]  }
 0x999   : > { %6840 = vmatprep.subr.bf16.mxu1 %v16604_v1  ;;  %v11888_v1 = vld [vmem:[%s16408_s3 + $0x1360] ss:$20 sps:$4 sm:$0xff]  }
 0x99a   : > { %7425 = vmatpush1.bf16.msra.mxu0 %v11870_v0  ;;  %v16626_v0 = vld [vmem:[#allocation5_spill] sm:$0xff] }
 0x99b   : > { %7426 = vmatprep.subr.bf16.mxu0 %v11878_v29 }
 0x99c   : > { %6841 = vmatpush1.bf16.msra.mxu1 %v16605_v32  ;;  %v11849_v32 = vld [vmem:[%s16408_s3 + $0x1250] ss:$20 sps:$4 sm:$0xff]  }
 0x99d   : > { %6842 = vmatprep.subr.bf16.mxu1 %v16606_v41  ;;  %v11896_v41 = vld [vmem:[%s16408_s3 + $0x138c] ss:$20 sps:$4 sm:$0xff]  }
 0x99e   : > { %7427 = vmatpush1.bf16.msra.mxu0 %v11876_v43 }
 0x99f   : > { %7428 = vmatprep.subr.bf16.mxu0 %v11884_v47 }
 0x9a0   : > { %6843 = vmatpush1.bf16.msra.mxu1 %v16607_v63  ;;  %v11857_v63 = vld [vmem:[%s16408_s3 + $0x127c] ss:$20 sps:$4 sm:$0xff]  }
 0x9a1   : > { %6844 = vmatprep.subr.bf16.mxu1 %v16608_v61  ;;  %v11894_v61 = vld [vmem:[%s16408_s3 + $0x1388] ss:$20 sps:$4 sm:$0xff]  }
 0x9a2   : > { %7429 = vmatpush1.bf16.msra.mxu0 %v11882_v57 }
 0x9a3   : > { %7430 = vmatprep.subr.bf16.mxu0 %v11890_v30 }
 0x9a4   : > { %6845 = vmatpush1.bf16.msra.mxu1 %v16609_v52  ;;  %v11855_v52 = vld [vmem:[%s16408_s3 + $0x1278] ss:$20 sps:$4 sm:$0xff]  }
 0x9a5   : > { %6846 = vmatprep.subr.bf16.mxu1 %v16610_v62  ;;  %v11869_v62 = vld [vmem:[%s16408_s3 + $0x12cc] ss:$20 sps:$4 sm:$0xff]  }
 0x9a6   : > { %7431 = vmatpush1.bf16.msra.mxu0 %v11888_v1 }
 0x9a7   : > { %7432 = vmatprep.subr.bf16.mxu0 %v11896_v41  ;;  %v11931_v41 = vld [vmem:[%s16410_s5 + $0x80] sm:$0xff]  }
 0x9a8   : > { %6847 = vmatpush1.bf16.msra.mxu1 %v16611_v2  ;;  %v11873_v2 = vld [vmem:[%s16408_s3 + $0x12f0] ss:$20 sps:$4 sm:$0xff]  }
 0x9a9   : > { %6848 = vmatprep.subr.bf16.mxu1 %v16612_v7  ;;  %v11879_v7 = vld [vmem:[%s16408_s3 + $0x1318] ss:$20 sps:$4 sm:$0xff]  }
 0x9aa   : > { %7433 = vmatpush1.bf16.msra.mxu0 %v11894_v61 }
 0x9ac   : > { %6849 = vmatpush1.bf16.msra.mxu1 %v16613_v56  ;;  %v11885_v56 = vld [vmem:[%s16408_s3 + $0x1340] ss:$20 sps:$4 sm:$0xff]  }
 0x9ad   : > { %6850 = vmatprep.subr.bf16.mxu1 %v16614_v3  ;;  %v11891_v3 = vld [vmem:[%s16408_s3 + $0x1368] ss:$20 sps:$4 sm:$0xff]  }
 0x9b0   : > { %6851 = vmatpush1.bf16.msra.mxu1 %v16615_v45  ;;  %v11897_v45 = vld [vmem:[%s16408_s3 + $0x1390] ss:$20 sps:$4 sm:$0xff]  }
 0x9b1   : > { %6852 = vmatprep.subr.bf16.mxu1 %v16616_v10  ;;  %v11902_v10 = vld [vmem:[%s16408_s3 + $0x13b4] ss:$20 sps:$4 sm:$0xff]  }
 0x9b2   : > { %7434 = vmatprep.subr.bf16.mxu0 %v11902_v10  ;;  %v11917_v10 = vld [vmem:[%s16408_s3 + $0x11e0] ss:$20 sps:$4 sm:$0xff]  }
 0x9b4   : > { %6853 = vmatpush1.bf16.msra.mxu1 %v16617_v17  ;;  %v11900_v17 = vld [vmem:[%s16408_s3 + $0x13b0] ss:$20 sps:$4 sm:$0xff]  }
 0x9b5   : > { %6854 = vmatprep.subr.bf16.mxu1 %v16618_v16  ;;  %7435 = vmatpush1.bf16.msra.mxu0 %v11900_v17  ;;  %v11939_v17 = vld [vmem:[%s16410_s5 + $0x90] sm:$0xff]  }
 0x9b6   : > { %7436 = vmatprep.subr.bf16.mxu0 %v11908_v24  ;;  %v11947_v24 = vld [vmem:[%s16410_s5 + $0xa0] sm:$0xff]  }
 0x9b8   : > { %6855 = vmatpush1.bf16.msra.mxu1 %v16619_v49  ;;  %v11903_v49 = vld [vmem:[%s16408_s3 + $0x13b8] ss:$20 sps:$4 sm:$0xff]  }
 0x9b9   : > { %6856 = vmatprep.subr.bf16.mxu1 %v16620_v46  ;;  %v16624_v46 = vld [vmem:[#allocation25_spill] sm:$0xff] }
 0x9bc   : > { %6857 = vmatpush1.bf16.msra.mxu1 %v16621_v53 }
 0x9bd   : > { %6858 = vmatprep.subr.bf16.mxu1 %v16622_v25  ;;  %v11906_v25 = vld [vmem:[%s16408_s3 + $0x13d8] ss:$20 sps:$4 sm:$0xff]  }
 0x9be   : > { %7437 = vmatpush1.bf16.msra.mxu0 %v11906_v25  ;;  %v11949_v25 = vld [vmem:[%s16410_s5 + $0xe8] sm:$0xff]  }
 0x9c0   : > { %6859 = vmatpush1.bf16.msra.mxu1 %v16623_v51  ;;  %v11912_v51 = vld [vmem:[%s16408_s3 + $0x12d0] ss:$20 sps:$4 sm:$0xff]  }
 0x9c1   : > { %7459 = vmatprep.subr.bf16.mxu1 %v11821_v31  ;;  %10529 = vmatprep.subr.bf16.mxu0 %v11912_v51  ;;  %v11927_v51 = vld [vmem:[%s16408_s3 + $0x12a8] ss:$20 sps:$4 sm:$0xff]  }
 0x9c3   : > { %6861 = vmatmul.mubr.bf16.vlgmr.msra.gmra.mrb[64].mxu1 %v10056_v60  ;;  %v11909_v60 = vld [vmem:[%s16408_s3 + $0x13e0] ss:$20 sps:$4 sm:$0xff]  }
 0x9c4   : > { %6870 = vmatprep.mubr.bf16.mxu1 %v10061_v36  ;;  %7460 = vmatpush1.bf16.msra.mxu1 %v11819_v15 }
 0x9c5   : > { %7461 = vmatprep.subr.bf16.mxu1 %v11827_v19 }
 0x9c8   : > { %7462 = vmatpush1.bf16.msra.mxu1 %v11825_v55 }
 0x9c9   : > { %7463 = vmatprep.subr.bf16.mxu1 %v11833_v58  ;;  %v11929_v58 = vld [vmem:[%s16410_s5 + $0xc0] sm:$0xff]  }
 0x9cb   : > { %6871 = vmatmul.mubr.bf16.gmra.mrb[68].mxu1 %v10060_v21 }
 0x9cc   : > { %7464 = vmatpush1.bf16.msra.mxu1 %v11831_v20 }
 0x9cd   : > { %7465 = vmatprep.subr.bf16.mxu1 %v11839_v48 }
 0x9d0   : > { %7466 = vmatpush1.bf16.msra.mxu1 %v11837_v44 }
 0x9d1   : > { %7467 = vmatprep.subr.bf16.mxu1 %v11845_v50 }
 0x9d4   : > { %7468 = vmatpush1.bf16.msra.mxu1 %v11843_v28 }
 0x9d5   : > { %7469 = vmatprep.subr.bf16.mxu1 %v11851_v8 }
 0x9d8   : > { %7470 = vmatpush1.bf16.msra.mxu1 %v11849_v32  ;;  %v11913_v32 = vld [vmem:[%s16408_s3 + $0x1190] ss:$20 sps:$4 sm:$0xff]  }
 0x9d9   : > { %7471 = vmatprep.subr.bf16.mxu1 %v11857_v63 }
 0x9dc   : > { %7472 = vmatpush1.bf16.msra.mxu1 %v11855_v52  ;;  %v11914_v52 = vld [vmem:[%s16408_s3 + $0x12f8] ss:$20 sps:$4 sm:$0xff]  }
 0x9dd   : > { %7473 = vmatprep.subr.bf16.mxu1 %v11863_v6  ;;  %v11933_v6 = vld [vmem:[%s16410_s5 + $0xc8] sm:$0xff]  }
 0x9e0   : > { %7474 = vmatpush1.bf16.msra.mxu1 %v11861_v42 }
 0x9e1   : > { %7475 = vmatprep.subr.bf16.mxu1 %v11869_v62 }
 0x9e4   : > { %7476 = vmatpush1.bf16.msra.mxu1 %v11867_v5 }
 0x9e5   : > { %7477 = vmatprep.subr.bf16.mxu1 %v11875_v39 }
 0x9e8   : > { %7478 = vmatpush1.bf16.msra.mxu1 %v11873_v2 }
 0x9e9   : > { %7479 = vmatprep.subr.bf16.mxu1 %v11881_v4  ;;  %v11915_v4 = vld [vmem:[%s16408_s3 + $0x11b8] ss:$20 sps:$4 sm:$0xff]  }
 0x9ec   : > { %7480 = vmatpush1.bf16.msra.mxu1 %v11879_v7  ;;  %v11935_v7 = vld [vmem:[%s16410_s5 + $0x88] sm:$0xff]  }
 0x9ed   : > { %7481 = vmatprep.subr.bf16.mxu1 %v11887_v13 }
 0x9f0   : > { %7482 = vmatpush1.bf16.msra.mxu1 %v11885_v56 }
 0x9f1   : > { %7483 = vmatprep.subr.bf16.mxu1 %v11893_v9  ;;  %v11916_v9 = vld [vmem:[%s16408_s3 + $0x1320] ss:$20 sps:$4 sm:$0xff]  }
 0x9f4   : > { %7484 = vmatpush1.bf16.msra.mxu1 %v11891_v3 }
 0x9f5   : > { %7485 = vmatprep.subr.bf16.mxu1 %v11899_v11 }
 0x9f8   : > { %7486 = vmatpush1.bf16.msra.mxu1 %v11897_v45 }
 0x9f9   : > { %7487 = vmatprep.subr.bf16.mxu1 %v11905_v38  ;;  %v11941_v38 = vld [vmem:[%s16410_s5 + $0xd8] sm:$0xff]  }
 0x9fc   : > { %7488 = vmatpush1.bf16.msra.mxu1 %v11903_v49  ;;  %v11943_v49 = vld [vmem:[%s16410_s5 + $0x98] sm:$0xff]  }
 0x9fd   : > { %7489 = vmatprep.subr.bf16.mxu1 %v11911_v26  ;;  %v11923_v26 = vld [vmem:[%s16408_s3 + $0x1258] ss:$20 sps:$4 sm:$0xff]  }
 0xa00   : > { %7490 = vmatpush1.bf16.msra.mxu1 %v11909_v60  ;;  %v11925_v60 = vld [vmem:[%s16408_s3 + $0x1280] ss:$20 sps:$4 sm:$0xff]  }
 0xa01   : > { %10585 = vmatprep.subr.bf16.mxu1 %v11929_v58  ;;  %v11938_v58 = vld [vmem:[%s16410_s5 + $0x10] sm:$0xff]  }
 0xa16   : > { %v10517_v12 = vpop.f32.mrb[56].mxu1 }
 0xa17   : > { %v10518_v35 = vpop.f32.mrb[57].mxu1 }
 0xa18   : > { %v10519_v16 = vadd.f32 %v10518_v35, %v10517_v12  ;;  %v10520_v18 = vpop.f32.mrb[58].mxu1  ;;  %v11918_v35 = vld [vmem:[%s16408_s3 + $0x1348] ss:$20 sps:$4 sm:$0xff]  }
 0xa19   : > { %v10521_v14 = vpop.f32.mrb[59].mxu1 }
 0xa1a   : > { %v16018_v23 = vadd.f32 %v10519_v16, %v16624_v46  ;;  %v10522_v53 = vadd.f32 %v10521_v14, %v10520_v18  ;;  %v11919_v16 = vld [vmem:[%s16408_s3 + $0x1208] ss:$20 sps:$4 sm:$0xff]   ;;  %v11920_v18 = vld [vmem:[%s16408_s3 + $0x1370] ss:$20 sps:$4 sm:$0xff]  }
 0xa1b   : > { %v11945_v14 = vld [vmem:[%s16410_s5 + $0xe0] sm:$0xff]  }
 0xa1c   : > { %v16030_v31 = vadd.f32 %v10522_v53, %v16625_v27  ;;  %v11921_v46 = vld [vmem:[%s16408_s3 + $0x1230] ss:$20 sps:$4 sm:$0xff]   ;;  %v11922_v53 = vld [vmem:[%s16408_s3 + $0x1398] ss:$20 sps:$4 sm:$0xff]   ;;  %v11924_v27 = vld [vmem:[%s16408_s3 + $0x13c0] ss:$20 sps:$4 sm:$0xff]  }
 0xa1e   : > { %v10523_v54 = vpop.f32.mrb[60].mxu1 }
 0xa1f   : > { %v10524_v36 = vpop.f32.mrb[61].mxu1 }
 0xa20   : > { %v10525_v15 = vadd.f32 %v10524_v36, %v10523_v54  ;;  %v10526_v19 = vpop.f32.mrb[62].mxu1  ;;  %v11926_v54 = vld [vmem:[%s16408_s3 + $0x13e8] ss:$20 sps:$4 sm:$0xff]   ;;  %v11928_v36 = vld [vmem:[%s16410_s5 + $0x40] sm:$0xff]  }
 0xa21   : > { %v10527_v33 = vpop.f32.mrb[63].mxu1 }
 0xa22   : > { %v16039_v34 = vadd.f32 %v10525_v15, %v15699_v59  ;;  %v10528_v55 = vadd.f32 %v10527_v33, %v10526_v19  ;;  %v11930_v15 = vld [vmem:[%s16410_s5] sm:$0xff]   ;;  %v11932_v19 = vld [vmem:[%s16410_s5 + $0x48] sm:$0xff]  }
 0xa23   : > { %v11934_v33 = vld [vmem:[%s16410_s5 + $0x8] sm:$0xff]  }
 0xa24   : > { %v16042_v37 = vadd.f32 %v10528_v55, %v15702_v22  ;;  %v11936_v55 = vld [vmem:[%s16410_s5 + $0x50] sm:$0xff]  }
 0xa96   : > { %v6862_v21 = vpop.f32.mrb[64].mxu1 }
 0xa97   : > { %v10743_v20 = vadd.f32 %v6862_v21, %v16626_v0  ;;  %v6864_v29 = vpop.f32.mrb[65].mxu1  ;;  %v11940_v21 = vld [vmem:[%s16410_s5 + $0x58] sm:$0xff]  }
 0xa98   : > { %v10744_v48 = vadd.f32 %v6864_v29, %v12742_v40  ;;  %v6866_v43 = vpop.f32.mrb[66].mxu1  ;;  %v11946_v29 = vld [vmem:[%s16410_s5 + $0x20] sm:$0xff]  }
 0xa99   : > { %v10745_v44 = vadd.f32 %v6866_v43, %v16626_v0  ;;  %v6868_v59 = vpop.f32.mrb[67].mxu1  ;;  %v6881_v50 = vmax.f32 %v10743_v20, 0.0  ;;  %v11944_v20 = vld [vmem:[%s16410_s5 + $0x60] sm:$0xff]   ;;  %v11950_v43 = vld [vmem:[%s16410_s5 + $0x28] sm:$0xff]  }
 0xa9a   : > { %v10746_v47 = vadd.f32 %v6868_v59, %v12742_v40  ;;  %v6882_v57 = vmax.f32 %v10744_v48, 0.0  ;;  %v11948_v48 = vld [vmem:[%s16410_s5 + $0x68] sm:$0xff]   ;;  %v11952_v59 = vld [vmem:[%s16410_s5 + $0x70] sm:$0xff]  }
 0xa9b   : > { %v6883_v22 = vmax.f32 %v10745_v44, 0.0  ;;  %v11951_v44 = vld [vmem:[%s16410_s5 + $0xa8] sm:$0xff]  }
 0xa9c   : > { %v6884_v28 = vmax.f32 %v10746_v47, 0.0  ;;  %v11953_v47 = vld [vmem:[%s16410_s5 + $0xf0] sm:$0xff]  }
 0xa9d   : > { %v16051_v30 = vpack.c.bf16 %v6883_v22, %v6881_v50  ;;  %v11954_v50 = vld [vmem:[%s16410_s5 + $0x30] sm:$0xff]  }
 0xa9e   : > { %v6890_v8 = vpack.c.bf16 %v6884_v28, %v6882_v57  ;;  %v6872_v1 = vpop.f32.mrb[68].mxu1  ;;  %v11955_v22 = vld [vmem:[%s16410_s5 + $0xb0] sm:$0xff]   ;;  %v11956_v57 = vld [vmem:[%s16410_s5 + $0x78] sm:$0xff]  }
 0xa9f   : > { %v10747_v63 = vadd.f32 %v6872_v1, %v16626_v0  ;;  %v6874_v61 = vpop.f32.mrb[69].mxu1  ;;  %v11957_v28 = vld [vmem:[%s16410_s5 + $0xf8] sm:$0xff]   ;;  %v11960_v1 = vld [vmem:[%s16410_s5 + $0x100] sm:$0xff]  }
 0xaa0   : > { %v10748_v42 = vadd.f32 %v6874_v61, %v12742_v40  ;;  %v6876_v62 = vpop.f32.mrb[70].mxu1  ;;  %7438 = vmatprep.mubr.bf16.mxu0 %v6890_v8  ;;  %7491 = vmatprep.mubr.bf16.mxu1 %v6890_v8 }
 0xaa1   : > { %v10749_v5 = vadd.f32 %v6876_v62, %v16626_v0  ;;  %v6878_v39 = vpop.f32.mrb[71].mxu1  ;;  %7439 = vmatmul.mubr.bf16.vlgmr.msra.gmra.mrb[8].mxu0 %v16051_v30  ;;  %7492 = vmatmul.mubr.bf16.vlgmr.msra.gmra.mrb[8].mxu1 %v16051_v30  ;;  %v6885_v13 = vmax.f32 %v10747_v63, 0.0  ;;  %v11942_v0 = vld [vmem:[%s16410_s5 + $0x18] sm:$0xff]   ;;  %v16205_v63 = vld [vmem:[%s16409_s4] sm:$0x1f]  ;;  %v16629_v62 = vld [vmem:[#allocation4_spill] sm:$0xff] }
 0xaa2   : > { %v10750_v2 = vadd.f32 %v6878_v39, %v12742_v40  ;;  %10530 = vmatpush3.bf16.msra.mxu0 %v11913_v32  ;;  %10586 = vmatpush3.bf16.msra.mxu1 %v11931_v41  ;;  %v11937_v40 = vld [vmem:[%s16410_s5 + $0xd0] sm:$0xff]   ;;  %v6886_v3 = vmax.f32 %v10748_v42, 0.0  ;;  %v16627_v32 = vld [vmem:[#allocation2_spill] sm:$0xff] }
 0xaa3   : > { %v6887_v56 = vmax.f32 %v10749_v5, 0.0  ;;  %10531 = vmatprep.subr.bf16.mxu0 %v11914_v52  ;;  %10587 = vmatprep.subr.bf16.mxu1 %v11933_v6  ;;  %v7593_v41 = vsub.s32 2, %v16627_v32  ;;  %v7597_v61 = vsub.s32 3, %v16627_v32  ;;  %v16628_v52 = vld [vmem:[#allocation3_spill] sm:$0xff]  ;;  %v7590_v5 = vrot.slane %v16205_v63, %v16629_v62 }
 0xaa4   : > { %v6888_v11 = vmax.f32 %v10750_v2, 0.0  ;;  %v7586_v6 = vrot.slane %v16205_v63, %v16628_v52 }
 0xaa5   : > { %v6891_v45 = vpack.c.bf16 %v6887_v56, %v6885_v13  ;;  %v7594_v42 = vrot.slane %v16205_v63, %v7593_v41  ;;  %v7598_v39 = vrot.slane %v16205_v63, %v7597_v61 }
 0xaa6   : > { %v6892_v12 = vpack.c.bf16 %v6888_v11, %v6886_v3  ;;  %10532 = vmatpush3.bf16.msra.mxu0 %v11915_v4  ;;  %10588 = vmatpush3.bf16.msra.mxu1 %v11935_v7 }
 0xaa7   : > { %10533 = vmatprep.subr.bf16.mxu0 %v11916_v9  ;;  %10589 = vmatprep.subr.bf16.mxu1 %v11937_v40 }
 0xaa8   : > { %7448 = vmatprep.mubr.bf16.mxu0 %v6892_v12  ;;  %7501 = vmatprep.mubr.bf16.mxu1 %v6892_v12 }
 0xaa9   : > { %7449 = vmatmul.mubr.bf16.gmra.mrb[12].mxu0 %v6891_v45  ;;  %7502 = vmatmul.mubr.bf16.gmra.mrb[12].mxu1 %v6891_v45 }
 0xaaa   : > { %10534 = vmatpush3.bf16.msra.mxu0 %v11917_v10  ;;  %7544 = vmatprep.mubr.bf16.mxu0 %v6890_v8  ;;  %v11959_v8 = vld [vmem:[%s16410_s5 + $0xb8] sm:$0xff]  }
 0xaab   : > { %10535 = vmatprep.subr.bf16.mxu0 %v11918_v35  ;;  %10590 = vmatpush3.bf16.msra.mxu1 %v11939_v17 }
 0xaac   : > { %10591 = vmatprep.subr.bf16.mxu1 %v11941_v38 }
 0xaae   : > { %10536 = vmatpush3.bf16.msra.mxu0 %v11919_v16 }
 0xaaf   : > { %10537 = vmatprep.subr.bf16.mxu0 %v11920_v18  ;;  %10592 = vmatpush3.bf16.msra.mxu1 %v11943_v49 }
 0xab0   : > { %10593 = vmatprep.subr.bf16.mxu1 %v11945_v14 }
 0xab2   : > { %10538 = vmatpush3.bf16.msra.mxu0 %v11921_v46 }
 0xab3   : > { %10539 = vmatprep.subr.bf16.mxu0 %v11922_v53  ;;  %10594 = vmatpush3.bf16.msra.mxu1 %v11947_v24 }
 0xab4   : > { %10595 = vmatprep.subr.bf16.mxu1 %v11949_v25 }
 0xab6   : > { %10540 = vmatpush3.bf16.msra.mxu0 %v11923_v26 }
 0xab7   : > { %10541 = vmatprep.subr.bf16.mxu0 %v11924_v27  ;;  %10596 = vmatpush3.bf16.msra.mxu1 %v11951_v44 }
 0xab8   : > { %10597 = vmatprep.subr.bf16.mxu1 %v11953_v47 }
 0xaba   : > { %10542 = vmatpush3.bf16.msra.mxu0 %v11925_v60 }
 0xabb   : > { %10543 = vmatprep.subr.bf16.mxu0 %v11926_v54  ;;  %10598 = vmatpush3.bf16.msra.mxu1 %v11955_v22 }
 0xabc   : > { %10599 = vmatprep.subr.bf16.mxu1 %v11957_v28 }
 0xabe   : > { %10544 = vmatpush3.bf16.msra.mxu0 %v11927_v51 }
 0xabf   : > { %10557 = vmatprep.subr.bf16.mxu0 %v11928_v36  ;;  %10600 = vmatpush3.bf16.msra.mxu1 %v11959_v8 }
 0xac1   : > { %7545 = vmatmul.mubr.bf16.vlgmr.msra.gmra.mrb[64].mxu0 %v16051_v30  ;;  %v11958_v30 = vld [vmem:[%s16410_s5 + $0x38] sm:$0xff]  }
 0xac2   : > { %7552 = vmatprep.mubr.bf16.mxu0 %v6892_v12  ;;  %10558 = vmatpush3.bf16.msra.mxu0 %v11930_v15 }
 0xac3   : > { %10559 = vmatprep.subr.bf16.mxu0 %v11932_v19 }
 0xac6   : > { %10560 = vmatpush3.bf16.msra.mxu0 %v11934_v33 }
 0xac7   : > { %10561 = vmatprep.subr.bf16.mxu0 %v11936_v55 }
 0xac9   : > { %7553 = vmatmul.mubr.bf16.gmra.mrb[68].mxu0 %v6891_v45 }
 0xaca   : > { %10562 = vmatpush3.bf16.msra.mxu0 %v11938_v58 }
 0xacb   : > { %10563 = vmatprep.subr.bf16.mxu0 %v11940_v21  ;;  %v11961_v21 = vld [vmem:[%s16410_s5 + $0x108] sm:$0xff]  }
 0xace   : > { %10564 = vmatpush3.bf16.msra.mxu0 %v11942_v0 }
 0xacf   : > { %10565 = vmatprep.subr.bf16.mxu0 %v11944_v20 }
 0xad2   : > { %10566 = vmatpush3.bf16.msra.mxu0 %v11946_v29 }
 0xad3   : > { %10567 = vmatprep.subr.bf16.mxu0 %v11948_v48 }
 0xad6   : > { %10568 = vmatpush3.bf16.msra.mxu0 %v11950_v43 }
 0xad7   : > { %10569 = vmatprep.subr.bf16.mxu0 %v11952_v59 }
 0xada   : > { %10570 = vmatpush3.bf16.msra.mxu0 %v11954_v50 }
 0xadb   : > { %10571 = vmatprep.subr.bf16.mxu0 %v11956_v57 }
 0xade   : > { %10572 = vmatpush3.bf16.msra.mxu0 %v11958_v30 }
 0xadf   : > { %10675 = vmatprep.subr.bf16.mxu0 %v11960_v1 }
 0xb74   : > { %v7440_v2 = vpop.f32.mrb[8].mxu0  ;;  %v7493_v4 = vpop.f32.mrb[8].mxu1 }
 0xb75   : > { %v7608_v7 = vadd.f32 %v7586_v6, %v7440_v2  ;;  %v7610_v13 = vadd.f32 %v7594_v42, %v7493_v4  ;;  %v7442_v56 = vpop.f32.mrb[9].mxu0  ;;  %v7495_v9 = vpop.f32.mrb[9].mxu1  ;;  %v11962_v2 = vld [vmem:[%s16410_s5 + $0x110] sm:$0xff]  }
 0xb76   : > { %v7609_v40 = vadd.f32 %v7590_v5, %v7442_v56  ;;  %v7611_v3 = vadd.f32 %v7598_v39, %v7495_v9  ;;  %v7444_v11 = vpop.f32.mrb[10].mxu0  ;;  %v7497_v45 = vpop.f32.mrb[10].mxu1 }
 0xb77   : > { %v7613_v12 = vadd.f32 %v7586_v6, %v7444_v11  ;;  %v7615_v10 = vadd.f32 %v7594_v42, %v7497_v45  ;;  %v7446_v35 = vpop.f32.mrb[11].mxu0  ;;  %v7499_v17 = vpop.f32.mrb[11].mxu1  ;;  %v7628_v18 = vmax.f32 %v7608_v7, 0.0  ;;  %v7630_v49 = vmax.f32 %v7610_v13, 0.0 }
 0xb78   : > { %v7614_v38 = vadd.f32 %v7590_v5, %v7446_v35  ;;  %v7616_v16 = vadd.f32 %v7598_v39, %v7499_v17  ;;  %v7629_v53 = vmax.f32 %v7609_v40, 0.0  ;;  %v7631_v24 = vmax.f32 %v7611_v3, 0.0 }
 0xb79   : > { %v7633_v14 = vmax.f32 %v7613_v12, 0.0  ;;  %v7635_v46 = vmax.f32 %v7615_v10, 0.0 }
 0xb7a   : > { %v7634_v25 = vmax.f32 %v7614_v38, 0.0  ;;  %v7636_v26 = vmax.f32 %v7616_v16, 0.0 }
 0xb7b   : > { %v7648_v27 = vpack.c.bf16 %v7633_v14, %v7628_v18  ;;  %v7650_v60 = vpack.c.bf16 %v7635_v46, %v7630_v49 }
 0xb7c   : > { %v7649_v54 = vpack.c.bf16 %v7634_v25, %v7629_v53  ;;  %v7651_v51 = vpack.c.bf16 %v7636_v26, %v7631_v24  ;;  %v7450_v36 = vpop.f32.mrb[12].mxu0  ;;  %v7503_v15 = vpop.f32.mrb[12].mxu1 }
 0xb7d   : > { %v7618_v19 = vadd.f32 %v7586_v6, %v7450_v36  ;;  %v7620_v33 = vadd.f32 %v7594_v42, %v7503_v15  ;;  %v7452_v55 = vpop.f32.mrb[13].mxu0  ;;  %v7505_v58 = vpop.f32.mrb[13].mxu1 }
 0xb7e   : > { %v7619_v0 = vadd.f32 %v7590_v5, %v7452_v55  ;;  %v7621_v20 = vadd.f32 %v7598_v39, %v7505_v58  ;;  %v7454_v29 = vpop.f32.mrb[14].mxu0  ;;  %v7507_v48 = vpop.f32.mrb[14].mxu1  ;;  %7992 = vmatprep.mubr.bf16.mxu0 %v7649_v54  ;;  %8041 = vmatprep.mubr.bf16.mxu1 %v7651_v51  ;;  %v11972_v55 = vld [vmem:[%s16412_s7 + $0x24] ss:$16 sps:$4 sm:$0xff]   ;;  %v11975_v58 = vld [vmem:[%s16412_s7 + $0x2c] ss:$16 sps:$4 sm:$0xff]  }
 0xb7f   : > { %v7623_v43 = vadd.f32 %v7586_v6, %v7454_v29  ;;  %v7625_v44 = vadd.f32 %v7594_v42, %v7507_v48  ;;  %v7456_v59 = vpop.f32.mrb[15].mxu0  ;;  %v7509_v47 = vpop.f32.mrb[15].mxu1  ;;  %7993 = vmatmul.mubr.bf16.vlgmr.msra.gmra.mrb[72].mxu0 %v7648_v27  ;;  %8042 = vmatmul.mubr.bf16.vlgmr.msra.gmra.mrb[72].mxu1 %v7650_v60  ;;  %v7638_v57 = vmax.f32 %v7618_v19, 0.0  ;;  %v7640_v28 = vmax.f32 %v7620_v33, 0.0  ;;  %v11964_v19 = vld [vmem:[%s16412_s7] ss:$16 sps:$4 sm:$0xff]  }
 0xb80   : > { %v7624_v50 = vadd.f32 %v7590_v5, %v7456_v59  ;;  %v7626_v22 = vadd.f32 %v7598_v39, %v7509_v47  ;;  %10676 = vmatpush3.bf16.msra.mxu0 %v11960_v1  ;;  %v7639_v4 = vmax.f32 %v7619_v0, 0.0  ;;  %v7641_v7 = vmax.f32 %v7621_v20, 0.0  ;;  %v11963_v1 = vld [vmem:[%s16410_s5 + $0x118] sm:$0xff]   ;;  %v11978_v20 = vld [vmem:[%s16412_s7 + $0x44] ss:$16 sps:$4 sm:$0xff]  }
 0xb81   : > { %v7643_v30 = vmax.f32 %v7623_v43, 0.0  ;;  %v7645_v8 = vmax.f32 %v7625_v44, 0.0  ;;  %10677 = vmatprep.subr.bf16.mxu0 %v11961_v21  ;;  %v7601_v5 = vsub.s32 4, %v16627_v32  ;;  %v11969_v33 = vld [vmem:[%s16412_s7 + $0xc] ss:$16 sps:$4 sm:$0xff]  }
 0xb82   : > { %v7644_v6 = vmax.f32 %v7624_v50, 0.0  ;;  %v7646_v42 = vmax.f32 %v7626_v22, 0.0  ;;  %v11973_v0 = vld [vmem:[%s16412_s7 + $0x28] ss:$16 sps:$4 sm:$0xff]   ;;  %v11981_v29 = vld [vmem:[%s16412_s7 + $0x4c] ss:$16 sps:$4 sm:$0xff]  }
 0xb83   : > { %v7653_v13 = vpack.c.bf16 %v7643_v30, %v7638_v57  ;;  %v7655_v56 = vpack.c.bf16 %v7645_v8, %v7640_v28  ;;  %v7602_v45 = vrot.slane %v16205_v63, %v7601_v5  ;;  %v11976_v48 = vld [vmem:[%s16412_s7 + $0x40] ss:$16 sps:$4 sm:$0xff]   ;;  %v11979_v43 = vld [vmem:[%s16412_s7 + $0x48] ss:$16 sps:$4 sm:$0xff]   ;;  %v11984_v44 = vld [vmem:[%s16412_s7 + $0x64] ss:$16 sps:$4 sm:$0xff]  }
 0xb84   : > { %v7654_v9 = vpack.c.bf16 %v7644_v6, %v7639_v4  ;;  %v7656_v40 = vpack.c.bf16 %v7646_v42, %v7641_v7  ;;  %10678 = vmatpush3.bf16.msra.mxu0 %v11961_v21  ;;  %v11970_v21 = vld [vmem:[%s16412_s7 + $0x20] ss:$16 sps:$4 sm:$0xff]   ;;  %v11987_v59 = vld [vmem:[%s16412_s7 + $0x6c] ss:$16 sps:$4 sm:$0xff]   ;;  %v11985_v50 = vld [vmem:[%s16412_s7 + $0x68] ss:$16 sps:$4 sm:$0xff]  }
 0xb85   : > { %10679 = vmatprep.subr.bf16.mxu0 %v11962_v2  ;;  %v11982_v47 = vld [vmem:[%s16412_s7 + $0x60] ss:$16 sps:$4 sm:$0xff]   ;;  %v12220_v22 = vmov 0  }
 0xb86   : > { %8000 = vmatprep.mubr.bf16.mxu0 %v7654_v9  ;;  %8049 = vmatprep.mubr.bf16.mxu1 %v7656_v40  ;;  %v11988_v57 = vld [vmem:[%s16414_s9 + $0x40] sm:$0xff]  }
 0xb87   : > { %8001 = vmatmul.mubr.bf16.gmra.mrb[76].mxu0 %v7653_v13  ;;  %8050 = vmatmul.mubr.bf16.gmra.mrb[76].mxu1 %v7655_v56  ;;  %v11989_v28 = vld [vmem:[%s16414_s9 + $0xc0] sm:$0xff]  }
 0xb88   : > { %10680 = vmatpush3.bf16.msra.mxu0 %v11962_v2  ;;  %8269 = vmatprep.mubr.bf16.mxu1 %v12220_v22  ;;  %v10238_v2 = vld [vmem:[%s16411_s6] ss:$0 sm:$0xff] }
 0xb89   : > { %10681 = vmatprep.subr.bf16.mxu0 %v11963_v1 }
 0xb8c   : > { %10682 = vmatpush3.bf16.msra.mxu0 %v11963_v1 }
 0xb8d   : > { %8290 = vmatprep.subr.bf16.mxu0 %v11969_v33 }
 0xb94   : > { %v10545_v39 = vpop.f32.mrb[64].mxu0 }
 0xb95   : > { %v10546_v3 = vpop.f32.mrb[65].mxu0 }
 0xb96   : > { %v10547_v11 = vadd.f32 %v10546_v3, %v10545_v39  ;;  %v10548_v12 = vpop.f32.mrb[66].mxu0 }
 0xb97   : > { %v10549_v10 = vpop.f32.mrb[67].mxu0 }
 0xb98   : > { %v7565_v35 = vadd.f32 %v10547_v11, %v16018_v23  ;;  %v10550_v17 = vadd.f32 %v10549_v10, %v10548_v12 }
 0xb9a   : > { %v7612_v38 = vadd.f32 %v7602_v45, %v7565_v35  ;;  %v7570_v16 = vadd.f32 %v10550_v17, %v16030_v31 }
 0xb9c   : > { %v7617_v18 = vadd.f32 %v7602_v45, %v7570_v16  ;;  %v10551_v49 = vpop.f32.mrb[68].mxu0  ;;  %v7632_v46 = vmax.f32 %v7612_v38, 0.0 }
 0xb9d   : > { %v10552_v14 = vpop.f32.mrb[69].mxu0 }
 0xb9e   : > { %v7637_v53 = vmax.f32 %v7617_v18, 0.0  ;;  %v10553_v24 = vadd.f32 %v10552_v14, %v10551_v49  ;;  %v10554_v25 = vpop.f32.mrb[70].mxu0 }
 0xb9f   : > { %v10555_v26 = vpop.f32.mrb[71].mxu0 }
 0xba0   : > { %v7652_v27 = vpack.c.bf16 %v7637_v53, %v7632_v46  ;;  %v7575_v63 = vadd.f32 %v10553_v24, %v16039_v34  ;;  %v10556_v60 = vadd.f32 %v10555_v26, %v10554_v25  ;;  %v11966_v34 = vld [vmem:[%s16412_s7 + $0x4] ss:$16 sps:$4 sm:$0xff]  }
 0xba1   : > { %8237 = vmatprep.subr.bf16.mxu1 %v11966_v34 }
 0xba2   : > { %v7622_v54 = vadd.f32 %v7602_v45, %v7575_v63  ;;  %v7580_v23 = vadd.f32 %v10556_v60, %v16042_v37  ;;  %10683 = vmatprep.mubr.msk.bf16.mxu0 %vm7953_vm0, %v7652_v27  ;;  %v11967_v37 = vld [vmem:[%s16412_s7 + $0x8] ss:$16 sps:$4 sm:$0xff]   ;;  %8238 = vmatpush1.bf16.msra.mxu1 %v11964_v19 }
 0xba3   : > { %8239 = vmatprep.subr.bf16.mxu1 %v11972_v55 }
 0xba4   : > { %v7627_v51 = vadd.f32 %v7602_v45, %v7580_v23  ;;  %v7642_v31 = vmax.f32 %v7622_v54, 0.0 }
 0xba6   : > { %v7647_v36 = vmax.f32 %v7627_v51, 0.0  ;;  %8240 = vmatpush1.bf16.msra.mxu1 %v11970_v21 }
 0xba7   : > { %8241 = vmatprep.subr.bf16.mxu1 %v11978_v20  ;;  %v11991_v20 = vld [vmem:[%s16414_s9 + $0x80] sm:$0xff]  }
 0xba8   : > { %v7657_v15 = vpack.c.bf16 %v7647_v36, %v7642_v31 }
 0xbaa   : > { %10684 = vmatmul.mubr.msk.bf16.vlgmr.msra.gmra.mrb[80].mxu0 %vm7953_vm0, %v7657_v15  ;;  %8242 = vmatpush1.bf16.msra.mxu1 %v11976_v48  ;;  %v11993_v48 = vld [vmem:[%s16414_s9 + $0xc8] sm:$0xff]  }
 0xbab   : > { %8291 = vmatpush1.bf16.msra.mxu0 %v11967_v37  ;;  %8243 = vmatprep.subr.bf16.mxu1 %v11984_v44  ;;  %v11995_v44 = vld [vmem:[%s16414_s9 + $0x88] sm:$0xff]  }
 0xbac   : > { %8292 = vmatprep.subr.bf16.mxu0 %v11975_v58  ;;  %8322 = vmatprep.mubr.bf16.mxu0 %v12220_v22 }
 0xbae   : > { %8244 = vmatpush1.bf16.msra.mxu1 %v11982_v47  ;;  %v11997_v47 = vld [vmem:[%s16414_s9 + $0xd0] sm:$0xff]  }
 0xbaf   : > { %8293 = vmatpush1.bf16.msra.mxu0 %v11973_v0  ;;  %10619 = vmatprep.subr.bf16.mxu1 %v11988_v57  ;;  %v11990_v0 = vld [vmem:[%s16414_s9] sm:$0xff]   ;;  %v12000_v57 = vld [vmem:[%s16414_s9 + $0x58] sm:$0xff]  }
 0xbb0   : > { %8294 = vmatprep.subr.bf16.mxu0 %v11981_v29  ;;  %v11992_v29 = vld [vmem:[%s16414_s9 + $0x48] sm:$0xff]  }
 0xbb3   : > { %8295 = vmatpush1.bf16.msra.mxu0 %v11979_v43  ;;  %v11994_v43 = vld [vmem:[%s16414_s9 + $0x8] sm:$0xff]  }
 0xbb4   : > { %8296 = vmatprep.subr.bf16.mxu0 %v11987_v59  ;;  %v11996_v59 = vld [vmem:[%s16414_s9 + $0x50] sm:$0xff]  }
 0xbb7   : > { %8297 = vmatpush1.bf16.msra.mxu0 %v11985_v50  ;;  %v11998_v50 = vld [vmem:[%s16414_s9 + $0x10] sm:$0xff]  }
 0xbb8   : > { %10647 = vmatprep.subr.bf16.mxu0 %v11989_v28  ;;  %v12001_v28 = vld [vmem:[%s16414_s9 + $0xd8] sm:$0xff]  }
 0xc52   : > { %v10573_v30 = vpop.f32.mrb[72].mxu0  ;;  %v10601_v8 = vpop.f32.mrb[72].mxu1 }
 0xc53   : > { %v10574_v4 = vpop.f32.mrb[73].mxu0  ;;  %v10602_v7 = vpop.f32.mrb[73].mxu1 }
 0xc54   : > { %v10575_v6 = vadd.f32 %v10574_v4, %v10573_v30  ;;  %v10603_v42 = vadd.f32 %v10602_v7, %v10601_v8  ;;  %v10576_v13 = vpop.f32.mrb[74].mxu0  ;;  %v10604_v56 = vpop.f32.mrb[74].mxu1  ;;  %v12002_v30 = vld [vmem:[%s16414_s9 + $0x18] sm:$0xff]   ;;  %v12005_v4 = vld [vmem:[%s16414_s9 + $0xe0] sm:$0xff]  }
 0xc55   : > { %v10577_v9 = vpop.f32.mrb[75].mxu0  ;;  %v10605_v40 = vpop.f32.mrb[75].mxu1  ;;  %v12003_v8 = vld [vmem:[%s16414_s9 + $0x98] sm:$0xff]   ;;  %v12006_v7 = vld [vmem:[%s16414_s9 + $0x20] sm:$0xff]  }
 0xc56   : > { %v7995_v1 = vadd.f32 %v10575_v6, %v10238_v2  ;;  %v10578_v5 = vadd.f32 %v10577_v9, %v10576_v13  ;;  %v10606_v39 = vadd.f32 %v10605_v40, %v10604_v56  ;;  %v12007_v6 = vld [vmem:[%s16414_s9 + $0xa0] sm:$0xff]   ;;  %v12009_v13 = vld [vmem:[%s16414_s9 + $0xe8] sm:$0xff]   ;;  %v12012_v40 = vld [vmem:[%s16414_s9 + $0x70] sm:$0xff]  }
 0xc57   : > { %v12010_v56 = vld [vmem:[%s16414_s9 + $0x28] sm:$0xff]  }
 0xc58   : > { %v7998_v3 = vadd.f32 %v10578_v5, %v10238_v2  ;;  %v8044_v11 = vadd.f32 %v10603_v42, %v7995_v1  ;;  %v12008_v42 = vld [vmem:[%s16414_s9 + $0x68] sm:$0xff]   ;;  %v12013_v1 = vld [vmem:[%s16414_s9 + $0xf0] sm:$0xff]  }
 0xc59   : > { %v12011_v9 = vld [vmem:[%s16414_s9 + $0xa8] sm:$0xff]   ;;  %v12014_v5 = vld [vmem:[%s16414_s9 + $0x30] sm:$0xff]  }
 0xc5a   : > { %v10579_v45 = vpop.f32.mrb[76].mxu0  ;;  %v10607_v12 = vpop.f32.mrb[76].mxu1  ;;  %v8047_v10 = vadd.f32 %v10606_v39, %v7998_v3  ;;  %v12015_v39 = vld [vmem:[%s16414_s9 + $0xb0] sm:$0xff]   ;;  %v12016_v3 = vld [vmem:[%s16414_s9 + $0x78] sm:$0xff]  }
 0xc5b   : > { %v10580_v35 = vpop.f32.mrb[77].mxu0  ;;  %v10608_v17 = vpop.f32.mrb[77].mxu1 }
 0xc5c   : > { %v10581_v38 = vadd.f32 %v10580_v35, %v10579_v45  ;;  %v10609_v16 = vadd.f32 %v10608_v17, %v10607_v12  ;;  %v10582_v18 = vpop.f32.mrb[78].mxu0  ;;  %v10610_v49 = vpop.f32.mrb[78].mxu1  ;;  %v12018_v45 = vld [vmem:[%s16414_s9 + $0x38] sm:$0xff]  }
 0xc5d   : > { %v10583_v14 = vpop.f32.mrb[79].mxu0  ;;  %v10611_v46 = vpop.f32.mrb[79].mxu1  ;;  %v12019_v12 = vld [vmem:[%s16414_s9 + $0xb8] sm:$0xff]  }
 0xc5e   : > { %v8003_v53 = vadd.f32 %v10581_v38, %v10238_v2  ;;  %v10584_v24 = vadd.f32 %v10583_v14, %v10582_v18  ;;  %v10612_v25 = vadd.f32 %v10611_v46, %v10610_v49 }
 0xc60   : > { %v8006_v26 = vadd.f32 %v10584_v24, %v10238_v2  ;;  %v8052_v27 = vadd.f32 %v10609_v16, %v8003_v53  ;;  %v12004_v2 = vld [vmem:[%s16414_s9 + $0x60] sm:$0xff]  }
 0xc62   : > { %v8055_v63 = vadd.f32 %v10612_v25, %v8006_v26 }
 0xc7d   : > { %v10685_v60 = vpop.f32.mrb[80].mxu0 }
 0xc7e   : > { %v8101_v54 = vadd.f32 %v10685_v60, %v8052_v27  ;;  %v8092_v23 = vpop.f32.mrb[81].mxu0 }
 0xc7f   : > { %v8093_v51 = vadd.f32 %v8092_v23, %v8044_v11  ;;  %v10686_v31 = vpop.f32.mrb[82].mxu0  ;;  %v12017_v11 = vld [vmem:[%s16414_s9 + $0xf8] sm:$0xff]  }
 0xc80   : > { %v8104_v36 = vadd.f32 %v10686_v31, %v8055_v63  ;;  %v8095_v15 = vpop.f32.mrb[83].mxu0  ;;  %v8109_v34 = vmax.f32 %v8101_v54, 0.0 }
 0xc81   : > { %v8096_v19 = vadd.f32 %v8095_v15, %v8047_v10  ;;  %v8107_v33 = vmax.f32 %v8093_v51, 0.0  ;;  %v8129_v10 = vld [vmem:[%s16413_s8] sm:$0xf] }
 0xc82   : > { %v8110_v37 = vmax.f32 %v8104_v36, 0.0  ;;  %v8134_v35 = vrot.slane %v8129_v10, %v16628_v52  ;;  %v8142_v17 = vrot.slane %v8129_v10, %v7593_v41  ;;  %v8138_v38 = vrot.slane %v8129_v10, %v16629_v62 }
 0xc83   : > { %v8108_v55 = vmax.f32 %v8096_v19, 0.0  ;;  %v8146_v16 = vrot.slane %v8129_v10, %v7597_v61 }
 0xc84   : > { %v8112_v58 = vpack.c.bf16 %v8110_v37, %v8109_v34 }
 0xc85   : > { %v8111_v21 = vpack.c.bf16 %v8108_v55, %v8107_v33 }
 0xc87   : > { %10293 = vmatmul.mubr.msk.bf16.vlgmr.msra.gmra.mrb[80].mxu1 %vm7953_vm0, %v8111_v21  ;;  %10295 = vmatmul.mubr.msk.bf16.vlgmr.msra.gmra.mrb[84].mxu0 %vm7953_vm0, %v8111_v21 }
 0xc88   : > { %8279 = vmatprep.mubr.bf16.mxu1 %v12220_v22  ;;  %8332 = vmatprep.mubr.bf16.mxu0 %v12220_v22  ;;  %v11999_v22 = vld [vmem:[%s16414_s9 + $0x90] sm:$0xff]  }
 0xc89   : > { %10620 = vmatpush3.bf16.msra.mxu1 %v11990_v0  ;;  %10648 = vmatpush3.bf16.msra.mxu0 %v11991_v20 }
 0xc8a   : > { %10621 = vmatprep.subr.bf16.mxu1 %v11992_v29  ;;  %10649 = vmatprep.subr.bf16.mxu0 %v11993_v48 }
 0xc8d   : > { %10622 = vmatpush3.bf16.msra.mxu1 %v11994_v43  ;;  %10650 = vmatpush3.bf16.msra.mxu0 %v11995_v44 }
 0xc8e   : > { %10623 = vmatprep.subr.bf16.mxu1 %v11996_v59  ;;  %10651 = vmatprep.subr.bf16.mxu0 %v11997_v47 }
 0xc8f   : > { %10294 = vmatmul.mubr.msk.bf16.gmra.mrb[84].mxu1 %vm7953_vm0, %v8112_v58  ;;  %10296 = vmatmul.mubr.msk.bf16.gmra.mrb[88].mxu0 %vm7953_vm0, %v8112_v58 }
 0xc91   : > { %10624 = vmatpush3.bf16.msra.mxu1 %v11998_v50  ;;  %10652 = vmatpush3.bf16.msra.mxu0 %v11999_v22 }
 0xc92   : > { %10625 = vmatprep.subr.bf16.mxu1 %v12000_v57  ;;  %10653 = vmatprep.subr.bf16.mxu0 %v12001_v28 }
 0xc95   : > { %10626 = vmatpush3.bf16.msra.mxu1 %v12002_v30  ;;  %10654 = vmatpush3.bf16.msra.mxu0 %v12003_v8 }
 0xc96   : > { %10627 = vmatprep.subr.bf16.mxu1 %v12004_v2  ;;  %10655 = vmatprep.subr.bf16.mxu0 %v12005_v4 }
 0xc99   : > { %10628 = vmatpush3.bf16.msra.mxu1 %v12006_v7  ;;  %10656 = vmatpush3.bf16.msra.mxu0 %v12007_v6 }
 0xc9a   : > { %10629 = vmatprep.subr.bf16.mxu1 %v12008_v42  ;;  %10657 = vmatprep.subr.bf16.mxu0 %v12009_v13 }
 0xc9d   : > { %10630 = vmatpush3.bf16.msra.mxu1 %v12010_v56  ;;  %10658 = vmatpush3.bf16.msra.mxu0 %v12011_v9 }
 0xc9e   : > { %10631 = vmatprep.subr.bf16.mxu1 %v12012_v40  ;;  %10659 = vmatprep.subr.bf16.mxu0 %v12013_v1 }
 0xca1   : > { %10632 = vmatpush3.bf16.msra.mxu1 %v12014_v5  ;;  %10660 = vmatpush3.bf16.msra.mxu0 %v12015_v39 }
 0xca2   : > { %10633 = vmatprep.subr.bf16.mxu1 %v12016_v3  ;;  %10661 = vmatprep.subr.bf16.mxu0 %v12017_v11 }
 0xca5   : > { %10634 = vmatpush3.bf16.msra.mxu1 %v12018_v45  ;;  %10662 = vmatpush3.bf16.msra.mxu0 %v12019_v12  ;;  %v10297_v12 = vld [vmem:[%s16415_s10] ss:$0 sm:$0xff] }
 0xd5a   : > { %v8271_v18 = vpop.f32.mrb[80].mxu1  ;;  %v8324_v49 = vpop.f32.mrb[84].mxu0 }
 0xd5b   : > { %v8272_v14 = vadd.f32 %v8271_v18, %v8134_v35  ;;  %v8325_v46 = vadd.f32 %v8324_v49, %v8142_v17  ;;  %v8273_v53 = vpop.f32.mrb[81].mxu1  ;;  %v8326_v24 = vpop.f32.mrb[85].mxu0 }
 0xd5c   : > { %v8274_v25 = vadd.f32 %v8273_v53, %v8138_v38  ;;  %v8327_v26 = vadd.f32 %v8326_v24, %v8146_v16  ;;  %v8275_v27 = vpop.f32.mrb[82].mxu1  ;;  %v8328_v63 = vpop.f32.mrb[86].mxu0 }
 0xd5d   : > { %v8276_v60 = vadd.f32 %v8275_v27, %v8134_v35  ;;  %v8329_v52 = vadd.f32 %v8328_v63, %v8142_v17  ;;  %v8277_v54 = vpop.f32.mrb[83].mxu1  ;;  %v8330_v23 = vpop.f32.mrb[87].mxu0  ;;  %v8343_v62 = vmax.f32 %v8272_v14, 0.0  ;;  %v8345_v31 = vmax.f32 %v8325_v46, 0.0 }
 0xd5e   : > { %v8278_v41 = vadd.f32 %v8277_v54, %v8138_v38  ;;  %v8331_v51 = vadd.f32 %v8330_v23, %v8146_v16  ;;  %v8344_v36 = vmax.f32 %v8274_v25, 0.0  ;;  %v8346_v15 = vmax.f32 %v8327_v26, 0.0 }
 0xd5f   : > { %v8347_v32 = vmax.f32 %v8276_v60, 0.0  ;;  %v8349_v61 = vmax.f32 %v8329_v52, 0.0 }
 0xd60   : > { %v8348_v19 = vmax.f32 %v8278_v41, 0.0  ;;  %v8350_v34 = vmax.f32 %v8331_v51, 0.0 }
 0xd61   : > { %v8359_v37 = vpack.c.bf16 %v8347_v32, %v8343_v62  ;;  %v8361_v33 = vpack.c.bf16 %v8349_v61, %v8345_v31 }
 0xd62   : > { %v8360_v55 = vpack.c.bf16 %v8348_v19, %v8344_v36  ;;  %v8362_v58 = vpack.c.bf16 %v8350_v34, %v8346_v15  ;;  %v8281_v21 = vpop.f32.mrb[84].mxu1  ;;  %v8334_v0 = vpop.f32.mrb[88].mxu0 }
 0xd63   : > { %v8282_v20 = vadd.f32 %v8281_v21, %v8134_v35  ;;  %v8335_v29 = vadd.f32 %v8334_v0, %v8142_v17  ;;  %v8283_v48 = vpop.f32.mrb[85].mxu1  ;;  %v8336_v43 = vpop.f32.mrb[89].mxu0 }
 0xd64   : > { %v8284_v44 = vadd.f32 %v8283_v48, %v8138_v38  ;;  %v8337_v59 = vadd.f32 %v8336_v43, %v8146_v16  ;;  %v8285_v47 = vpop.f32.mrb[86].mxu1  ;;  %v8338_v50 = vpop.f32.mrb[90].mxu0  ;;  %8662 = vmatprep.mubr.bf16.mxu1 %v8360_v55  ;;  %8711 = vmatprep.mubr.bf16.mxu0 %v8362_v58 }
 0xd65   : > { %v8286_v22 = vadd.f32 %v8285_v47, %v8134_v35  ;;  %v8339_v57 = vadd.f32 %v8338_v50, %v8142_v17  ;;  %v8287_v28 = vpop.f32.mrb[87].mxu1  ;;  %v8340_v30 = vpop.f32.mrb[91].mxu0  ;;  %8663 = vmatmul.mubr.bf16.vlgmr.msra.gmra.mrb[88].mxu1 %v8359_v37  ;;  %8712 = vmatmul.mubr.bf16.vlgmr.msra.gmra.mrb[92].mxu0 %v8361_v33  ;;  %v8351_v4 = vmax.f32 %v8282_v20, 0.0  ;;  %v8353_v7 = vmax.f32 %v8335_v29, 0.0 }
 0xd66   : > { %v8288_v8 = vadd.f32 %v8287_v28, %v8138_v38  ;;  %v8341_v2 = vadd.f32 %v8340_v30, %v8146_v16  ;;  %v8352_v13 = vmax.f32 %v8284_v44, 0.0  ;;  %v8354_v56 = vmax.f32 %v8337_v59, 0.0 }
 0xd67   : > { %v8355_v6 = vmax.f32 %v8286_v22, 0.0  ;;  %v8357_v42 = vmax.f32 %v8339_v57, 0.0 }
 0xd68   : > { %v8356_v9 = vmax.f32 %v8288_v8, 0.0  ;;  %v8358_v40 = vmax.f32 %v8341_v2, 0.0 }
 0xd69   : > { %v8363_v1 = vpack.c.bf16 %v8355_v6, %v8351_v4  ;;  %v8365_v5 = vpack.c.bf16 %v8357_v42, %v8353_v7 }
 0xd6a   : > { %v8364_v39 = vpack.c.bf16 %v8356_v9, %v8352_v13  ;;  %v8366_v3 = vpack.c.bf16 %v8358_v40, %v8354_v56 }
 0xd6c   : > { %8670 = vmatprep.mubr.bf16.mxu1 %v8364_v39  ;;  %8719 = vmatprep.mubr.bf16.mxu0 %v8366_v3 }
 0xd6d   : > { %8671 = vmatmul.mubr.bf16.gmra.mrb[92].mxu1 %v8363_v1  ;;  %8720 = vmatmul.mubr.bf16.gmra.mrb[96].mxu0 %v8365_v5 }
 0xe38   : > { %v10635_v11 = vpop.f32.mrb[88].mxu1  ;;  %v10663_v45 = vpop.f32.mrb[92].mxu0 }
 0xe39   : > { %v10636_v10 = vpop.f32.mrb[89].mxu1  ;;  %v10664_v35 = vpop.f32.mrb[93].mxu0 }
 0xe3a   : > { %v10637_v17 = vadd.f32 %v10636_v10, %v10635_v11  ;;  %v10665_v38 = vadd.f32 %v10664_v35, %v10663_v45  ;;  %v10638_v16 = vpop.f32.mrb[90].mxu1  ;;  %v10666_v18 = vpop.f32.mrb[94].mxu0 }
 0xe3b   : > { %v10639_v49 = vpop.f32.mrb[91].mxu1  ;;  %v10667_v14 = vpop.f32.mrb[95].mxu0 }
 0xe3c   : > { %v8665_v46 = vadd.f32 %v10637_v17, %v10297_v12  ;;  %v10640_v53 = vadd.f32 %v10639_v49, %v10638_v16  ;;  %v10668_v24 = vadd.f32 %v10667_v14, %v10666_v18 }
 0xe3e   : > { %v8714_v25 = vadd.f32 %v10665_v38, %v8665_v46  ;;  %v8668_v26 = vadd.f32 %v10640_v53, %v10297_v12 }
 0xe40   : > { %8728 = vst [vmem:[%s391_s24] sm:$0xff] %v8714_v25  ;;  %v8717_v27 = vadd.f32 %v10668_v24, %v8668_v26  ;;  %v10641_v63 = vpop.f32.mrb[92].mxu1  ;;  %v10669_v60 = vpop.f32.mrb[96].mxu0 }
 0xe41   : > { %v10642_v52 = vpop.f32.mrb[93].mxu1  ;;  %v10670_v54 = vpop.f32.mrb[97].mxu0 }
 0xe42   : > { %8729 = vst [vmem:[%s391_s24 + $0x8] sm:$0xff] %v8717_v27  ;;  %v10643_v23 = vadd.f32 %v10642_v52, %v10641_v63  ;;  %v10671_v41 = vadd.f32 %v10670_v54, %v10669_v60  ;;  %v10644_v51 = vpop.f32.mrb[94].mxu1  ;;  %v10672_v62 = vpop.f32.mrb[98].mxu0 }
 0xe43   : > { %v10645_v31 = vpop.f32.mrb[95].mxu1  ;;  %v10673_v32 = vpop.f32.mrb[99].mxu0 }
 0xe44   : > { %v8673_v61 = vadd.f32 %v10643_v23, %v10297_v12  ;;  %v10646_v36 = vadd.f32 %v10645_v31, %v10644_v51  ;;  %v10674_v15 = vadd.f32 %v10673_v32, %v10672_v62 }
 0xe46   : > { %v8722_v19 = vadd.f32 %v10671_v41, %v8673_v61  ;;  %v8676_v34 = vadd.f32 %v10646_v36, %v10297_v12 }
 0xe48   : > { %8730 = vst [vmem:[%s391_s24 + $0x10] sm:$0xff] %v8722_v19  ;;  %v8725_v37 = vadd.f32 %v10674_v15, %v8676_v34 }
 0xe4a   : > { %8731 = vst [vmem:[%s391_s24 + $0x18] sm:$0xff] %v8725_v37 }
 0xe4b PF: > { %s21_s17 = sadd.s32 1, %s12218_s17  }
 0xe4c   : > { %p18_p4 = scmp.ge.s32.totalorder %s21_s17, 4  }
 0xe4e   :  { %20 = sbr.rel (!%p18_p4) target bundleno = 1 (0x1), region = 101 }

</bundles_post_ra>
